<compile_context>
chip_gen: v5e
topology: v5e:2x2
jax: 0.10.0
libtpu: 0.0.40
codegen_flags: <defaults>
</compile_context>

<pallas_src>
import jax
import jax.numpy as jnp
from jax import lax
from jax.experimental import pallas as pl
from jax.experimental.pallas import tpu as pltpu

LANE = 128


def _round_up(x, m):
    return (x + m - 1) // m * m


# ---------------------------------------------------------------------------
# Fused DoubleConv Pallas kernel (one batch element per grid step)
# ---------------------------------------------------------------------------
def _make_double_conv_kernel(hp, wp, lf):
    p = wp + 2                  # flat row pitch of the haloed activation
    m = hp * p                  # rows computed per conv (incl. 2 wrap cols per row)
    head = p + 1                # mid flat rows [0, head) not covered by interior store
    tail = (hp + 1) * p + 1     # mid flat rows [tail, lf) not covered either

    def kernel(x_ref, w1_ref, b1_ref, w2_ref, b2_ref, o_ref, mid_ref):
        # x_ref  : (1, lf, cin_p)      bf16  pooled input, zero halo, flattened
        # w1_ref : (9, cin_p, cmid_p)  bf16  BN scale folded in (tap-major)
        # b1_ref : (1, cmid_p)         f32   folded BN bias
        # w2_ref : (9, cmid_p, cout_p) bf16
        # b2_ref : (1, cout_p)         f32
        # o_ref  : (1, m, cout_p)      bf16  flat output at width wp+2
        # mid_ref: (lf, cmid_p)        bf16  VMEM scratch (haloed mid activation)
        cmid_p = mid_ref.shape[-1]
        cout_p = o_ref.shape[-1]

        # ---- conv1: 9 tap matmuls on contiguous flat slices (no reshape copies) ----
        acc1 = jnp.zeros((m, cmid_p), jnp.float32)
        for k in range(9):
            dy, dx = divmod(k, 3)
            off = dy * p + dx
            acc1 = acc1 + jnp.dot(x_ref[0, off:off + m, :], w1_ref[k],
                                  preferred_element_type=jnp.float32)
        h1 = jnp.maximum(acc1 + b1_ref[...], 0.0)

        # Zero the two wrap-around columns of every row: they land exactly in the
        # halo slots of the mid buffer, which must be zero for conv2's edges.
        col = lax.broadcasted_iota(jnp.int32, (m, 1), 0) % p
        h1 = jnp.where(col < wp, h1, 0.0).astype(mid_ref.dtype)

        # ---- refresh only the halo strips; interior is fully overwritten ----
        mid_ref[0:head, :] = jnp.zeros((head, cmid_p), mid_ref.dtype)
        mid_ref[tail:lf, :] = jnp.zeros((lf - tail, cmid_p), mid_ref.dtype)
        mid_ref[head:head + m, :] = h1

        # ---- conv2: same flat-offset structure ----
        acc2 = jnp.zeros((m, cout_p), jnp.float32)
        for k in range(9):
            dy, dx = divmod(k, 3)
            off = dy * p + dx
            acc2 = acc2 + jnp.dot(mid_ref[off:off + m, :], w2_ref[k],
                                  preferred_element_type=jnp.float32)
        h2 = jnp.maximum(acc2 + b2_ref[...], 0.0)
        o_ref[...] = h2.reshape(1, m, cout_p).astype(o_ref.dtype)

    return kernel


# ---------------------------------------------------------------------------
# Wrapper: layout prep in plain JAX, all conv/BN/ReLU compute in Pallas
# ---------------------------------------------------------------------------
def _prep_weight(w_oihw, bn_scale, cin_p, cout_p):
    """(Cout,Cin,3,3) with BN scale folded -> (9, cin_p, cout_p) bf16, zero-padded."""
    cout, cin, kh, kw = w_oihw.shape
    w = w_oihw.astype(jnp.float32) * bn_scale.reshape(cout, 1, 1, 1)  # fold BN scale
    w = jnp.transpose(w, (2, 3, 1, 0))                                # (3,3,Cin,Cout)
    w = jnp.pad(w, ((0, 0), (0, 0), (0, cin_p - cin), (0, cout_p - cout)))
    return w.reshape(kh * kw, cin_p, cout_p).astype(jnp.bfloat16)


def _prep_bias(b, cp):
    # Padded lanes stay 0 so padded output channels stay exactly 0 after ReLU.
    return jnp.pad(b, (0, cp - b.shape[0])).reshape(1, cp).astype(jnp.float32)


def _vmem_limit_bytes():
    # v5e/v6e: 128 MiB physical VMEM -> allow large whole-image blocks.
    # v7x:      64 MiB physical      -> stay conservative (<= ~48 MiB).
    try:
        cap = pltpu.get_tpu_info().vmem_capacity_bytes
        return int(min(96 * 1024 * 1024, cap * 3 // 4))
    except Exception:
        return 48 * 1024 * 1024


def down_forward(x_nchw, params):
    """Pallas implementation of Down.forward (NCHW in, NCHW f32 out)."""
    n, cin, h, w = x_nchw.shape
    hp, wp = h // 2, w // 2                      # MaxPool2d(2) floors, like PyTorch
    cmid = params["w1"].shape[0]
    cout = params["w2"].shape[0]
    cin_p = _round_up(cin, LANE)
    cmid_p = _round_up(cmid, LANE)
    cout_p = _round_up(cout, LANE)

    p = wp + 2
    lf0 = (hp + 2) * p
    lf = _round_up(lf0 + 2, 8)      # +2 so the (dy=2,dx=2) tap slice stays in-bounds
    m = hp * p

    # --- MaxPool2d(2): cheap fused XLA reshape+max on the small unpadded tensor ---
    # TODO(synk): fuse into the kernel on v5e to skip this HBM round trip.
    x = jnp.transpose(x_nchw, (0, 2, 3, 1))      # NCHW -> NHWC
    x = x[:, :2 * hp, :2 * wp, :]
    pooled = x.reshape(n, hp, 2, wp, 2, cin).max(axis=(2, 4))   # (N,Hp,Wp,Cin)

    # Zero spatial halo + zero channel pad, flatten spatial, bf16 for the MXU.
    xin = jnp.pad(pooled, ((0, 0), (1, 1), (1, 1), (0, cin_p - cin)))
    xin = xin.reshape(n, lf0, cin_p)
    xin = jnp.pad(xin, ((0, 0), (0, lf - lf0), (0, 0))).astype(jnp.bfloat16)

    w1 = _prep_weight(params["w1"], params["s1"], cin_p, cmid_p)
    w2 = _prep_weight(params["w2"], params["s2"], cmid_p, cout_p)
    b1 = _prep_bias(params["b1"], cmid_p)
    b2 = _prep_bias(params["b2"], cout_p)

    kernel = _make_double_conv_kernel(hp, wp, lf)

    def call(resident_kwargs):
        return pl.pallas_call(
            kernel,
            out_shape=jax.ShapeDtypeStruct((n, m, cout_p), jnp.bfloat16),
            grid=(n,),
            in_specs=[
                pl.BlockSpec((1, lf, cin_p), lambda b: (b, 0, 0)),
                pl.BlockSpec((9, cin_p, cmid_p), lambda b: (0, 0, 0),
                             **resident_kwargs),
                pl.BlockSpec((1, cmid_p), lambda b: (0, 0), **resident_kwargs),
                pl.BlockSpec((9, cmid_p, cout_p), lambda b: (0, 0, 0),
                             **resident_kwargs),
                pl.BlockSpec((1, cout_p), lambda b: (0, 0), **resident_kwargs),
            ],
            out_specs=pl.BlockSpec((1, m, cout_p), lambda b: (b, 0, 0)),
            scratch_shapes=[pltpu.VMEM((lf, cmid_p), jnp.bfloat16)],
            compiler_params=pltpu.CompilerParams(
                dimension_semantics=("parallel",),
                vmem_limit_bytes=_vmem_limit_bytes()),
        )(xin, w1, b1, w2, b2)

    try:
        # Weights/biases never change across grid steps: single-buffer them.
        out = call(dict(pipeline_mode=pl.Buffered(1)))
    except Exception:
        # Fallback for builds without single-buffered BlockSpec support.
        out = call({})

    # Drop the wrap columns and padded channel lanes; NHWC -> NCHW; f32 out.
    out = out.reshape(n, hp, p, cout_p)[:, :, :wp, :cout]
    return jnp.transpose(out, (0, 3, 1, 2)).astype(jnp.float32)


# ---------------------------------------------------------------------------
# Pure-JAX f32 reference (kernel feeds the MXU bf16 -> relaxed tolerance)
# ---------------------------------------------------------------------------
def ref_forward(x_nchw, params):
    pooled = lax.reduce_window(x_nchw, -jnp.inf, lax.max,
                               (1, 1, 2, 2), (1, 1, 2, 2), "VALID")

    def cbr(h, w, s, b):
        y = lax.conv_general_dilated(
            h, w, (1, 1), "SAME",
            dimension_numbers=("NCHW", "OIHW", "NCHW"),
            precision=lax.Precision.HIGHEST)
        y = y * s.reshape(1, -1, 1, 1) + b.reshape(1, -1, 1, 1)
        return jnp.maximum(y, 0.0)

    h = cbr(pooled, params["w1"], params["s1"], params["b1"])
    return cbr(h, params["w2"], params["s2"], params["b2"])


# ---------------------------------------------------------------------------
# Deterministic parameter construction (eval-mode BN folded to scale/bias)
# ---------------------------------------------------------------------------
def make_params(key, in_channels, out_channels, eps=1e-5):
    mid_channels = in_channels  # DoubleConv default: mid_channels = in_channels
    ks = jax.random.split(key, 10)

    def bn_fold(kg, kb, km, kv, c):
        gamma = jax.random.uniform(kg, (c,), jnp.float32, 0.5, 1.5)
        beta = 0.1 * jax.random.normal(kb, (c,), jnp.float32)
        rmean = 0.1 * jax.random.normal(km, (c,), jnp.float32)
        rvar = jax.random.uniform(kv, (c,), jnp.float32, 0.5, 1.5)
        scale = gamma / jnp.sqrt(rvar + eps)
        bias = beta - rmean * scale
        return scale, bias

    w1 = 0.1 * jax.random.normal(ks[0], (mid_channels, in_channels, 3, 3), jnp.float32)
    w2 = 0.1 * jax.random.normal(ks[1], (out_channels, mid_channels, 3, 3), jnp.float32)
    s1, b1 = bn_fold(ks[2], ks[3], ks[4], ks[5], mid_channels)
    s2, b2 = bn_fold(ks[6], ks[7], ks[8], ks[9], out_channels)
    return {"w1": w1, "s1": s1, "b1": b1, "w2": w2, "s2": s2, "b2": b2}


# ---------------------------------------------------------------------------
if __name__ == "__main__":
    N, Cin, Cout, H, W = 2, 4, 8, 16, 16
    key = jax.random.PRNGKey(0)
    kx, kp = jax.random.split(key)
    x = jax.random.normal(kx, (N, Cin, H, W), jnp.float32)
    params = make_params(kp, Cin, Cout)

    out = jax.block_until_ready(down_forward(x, params))
    ref = jax.block_until_ready(ref_forward(x, params))

    assert out.shape == (N, Cout, H // 2, W // 2), out.shape
    max_err = float(jnp.max(jnp.abs(out - ref)))
    # bf16 MXU operands / bf16 mid+output vs f32 HIGHEST reference.
    assert jnp.allclose(out, ref, atol=5e-2, rtol=5e-2), \
        f"mismatch vs reference (max abs err {max_err})"

    print("KERNEL_OK")
</pallas_src>

<mosaic_0001>
module attributes {stable_mosaic.version = 11 : i64} {
  func.func @kernel(%arg0: i32, %arg1: memref<1x104x128xbf16, #tpu.memory_space<vmem>>, %arg2: memref<9x128x128xbf16, #tpu.memory_space<vmem>>, %arg3: memref<1x128xf32, #tpu.memory_space<vmem>>, %arg4: memref<9x128x128xbf16, #tpu.memory_space<vmem>>, %arg5: memref<1x128xf32, #tpu.memory_space<vmem>>, %arg6: memref<1x80x128xbf16, #tpu.memory_space<vmem>>, %arg7: memref<104x128xbf16, #tpu.memory_space<vmem>>) attributes {dimension_semantics = [#tpu.dimension_semantics<parallel>], iteration_bounds = array<i64: 2>, scalar_prefetch = 0 : i64, scratch_operands = 1 : i64, tpu.core_type = #tpu.core_type<tc>, window_params = [{transform_indices = @transform_0, window_bounds = array<i64: 1, 104, 128>}, {pipeline_mode = #tpu.pipeline_mode<synchronous>, transform_indices = @transform_1, window_bounds = array<i64: 9, 128, 128>}, {pipeline_mode = #tpu.pipeline_mode<synchronous>, transform_indices = @transform_2, window_bounds = array<i64: 1, 128>}, {pipeline_mode = #tpu.pipeline_mode<synchronous>, transform_indices = @transform_3, window_bounds = array<i64: 9, 128, 128>}, {pipeline_mode = #tpu.pipeline_mode<synchronous>, transform_indices = @transform_4, window_bounds = array<i64: 1, 128>}, {transform_indices = @transform_5, window_bounds = array<i64: 1, 80, 128>}]} {
    %cst = arith.constant 0.000000e+00 : f32
    %0 = vector.broadcast %cst : f32 to vector<80x128xf32>
    %c0 = arith.constant 0 : index
    %c0_0 = arith.constant 0 : index
    %c0_1 = arith.constant 0 : index
    %1 = vector.load %arg1[%c0, %c0_0, %c0_1] : memref<1x104x128xbf16, #tpu.memory_space<vmem>>, vector<1x80x128xbf16>
    %2 = vector.shape_cast %1 : vector<1x80x128xbf16> to vector<80x128xbf16>
    %c0_2 = arith.constant 0 : index
    %c0_3 = arith.constant 0 : index
    %c0_4 = arith.constant 0 : index
    %3 = vector.load %arg2[%c0_2, %c0_3, %c0_4] : memref<9x128x128xbf16, #tpu.memory_space<vmem>>, vector<1x128x128xbf16>
    %4 = vector.shape_cast %3 : vector<1x128x128xbf16> to vector<128x128xbf16>
    %cst_5 = arith.constant dense<0.000000e+00> : vector<80x128xf32>
    %5 = tpu.matmul %2, %4, %cst_5 {dimension_numbers = #tpu.dot_dimension_numbers<[1], [0], [0], [1], [0, 0, 1, 1], [], []>} : vector<80x128xbf16>, vector<128x128xbf16>, vector<80x128xf32> -> vector<80x128xf32>
    %6 = arith.addf %0, %5 : vector<80x128xf32>
    %c0_6 = arith.constant 0 : index
    %c1 = arith.constant 1 : index
    %c0_7 = arith.constant 0 : index
    %7 = vector.load %arg1[%c0_6, %c1, %c0_7] : memref<1x104x128xbf16, #tpu.memory_space<vmem>>, vector<1x80x128xbf16>
    %8 = vector.shape_cast %7 : vector<1x80x128xbf16> to vector<80x128xbf16>
    %c1_8 = arith.constant 1 : index
    %c0_9 = arith.constant 0 : index
    %c0_10 = arith.constant 0 : index
    %9 = vector.load %arg2[%c1_8, %c0_9, %c0_10] : memref<9x128x128xbf16, #tpu.memory_space<vmem>>, vector<1x128x128xbf16>
    %10 = vector.shape_cast %9 : vector<1x128x128xbf16> to vector<128x128xbf16>
    %cst_11 = arith.constant dense<0.000000e+00> : vector<80x128xf32>
    %11 = tpu.matmul %8, %10, %cst_11 {dimension_numbers = #tpu.dot_dimension_numbers<[1], [0], [0], [1], [0, 0, 1, 1], [], []>} : vector<80x128xbf16>, vector<128x128xbf16>, vector<80x128xf32> -> vector<80x128xf32>
    %12 = arith.addf %6, %11 : vector<80x128xf32>
    %c0_12 = arith.constant 0 : index
    %c2 = arith.constant 2 : index
    %c0_13 = arith.constant 0 : index
    %13 = vector.load %arg1[%c0_12, %c2, %c0_13] : memref<1x104x128xbf16, #tpu.memory_space<vmem>>, vector<1x80x128xbf16>
    %14 = vector.shape_cast %13 : vector<1x80x128xbf16> to vector<80x128xbf16>
    %c2_14 = arith.constant 2 : index
    %c0_15 = arith.constant 0 : index
    %c0_16 = arith.constant 0 : index
    %15 = vector.load %arg2[%c2_14, %c0_15, %c0_16] : memref<9x128x128xbf16, #tpu.memory_space<vmem>>, vector<1x128x128xbf16>
    %16 = vector.shape_cast %15 : vector<1x128x128xbf16> to vector<128x128xbf16>
    %cst_17 = arith.constant dense<0.000000e+00> : vector<80x128xf32>
    %17 = tpu.matmul %14, %16, %cst_17 {dimension_numbers = #tpu.dot_dimension_numbers<[1], [0], [0], [1], [0, 0, 1, 1], [], []>} : vector<80x128xbf16>, vector<128x128xbf16>, vector<80x128xf32> -> vector<80x128xf32>
    %18 = arith.addf %12, %17 : vector<80x128xf32>
    %c0_18 = arith.constant 0 : index
    %c10 = arith.constant 10 : index
    %c0_19 = arith.constant 0 : index
    %19 = vector.load %arg1[%c0_18, %c10, %c0_19] : memref<1x104x128xbf16, #tpu.memory_space<vmem>>, vector<1x80x128xbf16>
    %20 = vector.shape_cast %19 : vector<1x80x128xbf16> to vector<80x128xbf16>
    %c3 = arith.constant 3 : index
    %c0_20 = arith.constant 0 : index
    %c0_21 = arith.constant 0 : index
    %21 = vector.load %arg2[%c3, %c0_20, %c0_21] : memref<9x128x128xbf16, #tpu.memory_space<vmem>>, vector<1x128x128xbf16>
    %22 = vector.shape_cast %21 : vector<1x128x128xbf16> to vector<128x128xbf16>
    %cst_22 = arith.constant dense<0.000000e+00> : vector<80x128xf32>
    %23 = tpu.matmul %20, %22, %cst_22 {dimension_numbers = #tpu.dot_dimension_numbers<[1], [0], [0], [1], [0, 0, 1, 1], [], []>} : vector<80x128xbf16>, vector<128x128xbf16>, vector<80x128xf32> -> vector<80x128xf32>
    %24 = arith.addf %18, %23 : vector<80x128xf32>
    %c0_23 = arith.constant 0 : index
    %c11 = arith.constant 11 : index
    %c0_24 = arith.constant 0 : index
    %25 = vector.load %arg1[%c0_23, %c11, %c0_24] : memref<1x104x128xbf16, #tpu.memory_space<vmem>>, vector<1x80x128xbf16>
    %26 = vector.shape_cast %25 : vector<1x80x128xbf16> to vector<80x128xbf16>
    %c4 = arith.constant 4 : index
    %c0_25 = arith.constant 0 : index
    %c0_26 = arith.constant 0 : index
    %27 = vector.load %arg2[%c4, %c0_25, %c0_26] : memref<9x128x128xbf16, #tpu.memory_space<vmem>>, vector<1x128x128xbf16>
    %28 = vector.shape_cast %27 : vector<1x128x128xbf16> to vector<128x128xbf16>
    %cst_27 = arith.constant dense<0.000000e+00> : vector<80x128xf32>
    %29 = tpu.matmul %26, %28, %cst_27 {dimension_numbers = #tpu.dot_dimension_numbers<[1], [0], [0], [1], [0, 0, 1, 1], [], []>} : vector<80x128xbf16>, vector<128x128xbf16>, vector<80x128xf32> -> vector<80x128xf32>
    %30 = arith.addf %24, %29 : vector<80x128xf32>
    %c0_28 = arith.constant 0 : index
    %c12 = arith.constant 12 : index
    %c0_29 = arith.constant 0 : index
    %31 = vector.load %arg1[%c0_28, %c12, %c0_29] : memref<1x104x128xbf16, #tpu.memory_space<vmem>>, vector<1x80x128xbf16>
    %32 = vector.shape_cast %31 : vector<1x80x128xbf16> to vector<80x128xbf16>
    %c5 = arith.constant 5 : index
    %c0_30 = arith.constant 0 : index
    %c0_31 = arith.constant 0 : index
    %33 = vector.load %arg2[%c5, %c0_30, %c0_31] : memref<9x128x128xbf16, #tpu.memory_space<vmem>>, vector<1x128x128xbf16>
    %34 = vector.shape_cast %33 : vector<1x128x128xbf16> to vector<128x128xbf16>
    %cst_32 = arith.constant dense<0.000000e+00> : vector<80x128xf32>
    %35 = tpu.matmul %32, %34, %cst_32 {dimension_numbers = #tpu.dot_dimension_numbers<[1], [0], [0], [1], [0, 0, 1, 1], [], []>} : vector<80x128xbf16>, vector<128x128xbf16>, vector<80x128xf32> -> vector<80x128xf32>
    %36 = arith.addf %30, %35 : vector<80x128xf32>
    %c0_33 = arith.constant 0 : index
    %c20 = arith.constant 20 : index
    %c0_34 = arith.constant 0 : index
    %37 = vector.load %arg1[%c0_33, %c20, %c0_34] : memref<1x104x128xbf16, #tpu.memory_space<vmem>>, vector<1x80x128xbf16>
    %38 = vector.shape_cast %37 : vector<1x80x128xbf16> to vector<80x128xbf16>
    %c6 = arith.constant 6 : index
    %c0_35 = arith.constant 0 : index
    %c0_36 = arith.constant 0 : index
    %39 = vector.load %arg2[%c6, %c0_35, %c0_36] : memref<9x128x128xbf16, #tpu.memory_space<vmem>>, vector<1x128x128xbf16>
    %40 = vector.shape_cast %39 : vector<1x128x128xbf16> to vector<128x128xbf16>
    %cst_37 = arith.constant dense<0.000000e+00> : vector<80x128xf32>
    %41 = tpu.matmul %38, %40, %cst_37 {dimension_numbers = #tpu.dot_dimension_numbers<[1], [0], [0], [1], [0, 0, 1, 1], [], []>} : vector<80x128xbf16>, vector<128x128xbf16>, vector<80x128xf32> -> vector<80x128xf32>
    %42 = arith.addf %36, %41 : vector<80x128xf32>
    %c0_38 = arith.constant 0 : index
    %c21 = arith.constant 21 : index
    %c0_39 = arith.constant 0 : index
    %43 = vector.load %arg1[%c0_38, %c21, %c0_39] : memref<1x104x128xbf16, #tpu.memory_space<vmem>>, vector<1x80x128xbf16>
    %44 = vector.shape_cast %43 : vector<1x80x128xbf16> to vector<80x128xbf16>
    %c7 = arith.constant 7 : index
    %c0_40 = arith.constant 0 : index
    %c0_41 = arith.constant 0 : index
    %45 = vector.load %arg2[%c7, %c0_40, %c0_41] : memref<9x128x128xbf16, #tpu.memory_space<vmem>>, vector<1x128x128xbf16>
    %46 = vector.shape_cast %45 : vector<1x128x128xbf16> to vector<128x128xbf16>
    %cst_42 = arith.constant dense<0.000000e+00> : vector<80x128xf32>
    %47 = tpu.matmul %44, %46, %cst_42 {dimension_numbers = #tpu.dot_dimension_numbers<[1], [0], [0], [1], [0, 0, 1, 1], [], []>} : vector<80x128xbf16>, vector<128x128xbf16>, vector<80x128xf32> -> vector<80x128xf32>
    %48 = arith.addf %42, %47 : vector<80x128xf32>
    %c0_43 = arith.constant 0 : index
    %c22 = arith.constant 22 : index
    %c0_44 = arith.constant 0 : index
    %49 = vector.load %arg1[%c0_43, %c22, %c0_44] : memref<1x104x128xbf16, #tpu.memory_space<vmem>>, vector<1x80x128xbf16>
    %50 = vector.shape_cast %49 : vector<1x80x128xbf16> to vector<80x128xbf16>
    %c8 = arith.constant 8 : index
    %c0_45 = arith.constant 0 : index
    %c0_46 = arith.constant 0 : index
    %51 = vector.load %arg2[%c8, %c0_45, %c0_46] : memref<9x128x128xbf16, #tpu.memory_space<vmem>>, vector<1x128x128xbf16>
    %52 = vector.shape_cast %51 : vector<1x128x128xbf16> to vector<128x128xbf16>
    %cst_47 = arith.constant dense<0.000000e+00> : vector<80x128xf32>
    %53 = tpu.matmul %50, %52, %cst_47 {dimension_numbers = #tpu.dot_dimension_numbers<[1], [0], [0], [1], [0, 0, 1, 1], [], []>} : vector<80x128xbf16>, vector<128x128xbf16>, vector<80x128xf32> -> vector<80x128xf32>
    %54 = arith.addf %48, %53 : vector<80x128xf32>
    %c0_48 = arith.constant 0 : index
    %c0_49 = arith.constant 0 : index
    %55 = vector.load %arg3[%c0_48, %c0_49] : memref<1x128xf32, #tpu.memory_space<vmem>>, vector<1x128xf32>
    %56 = vector.broadcast %55 : vector<1x128xf32> to vector<80x128xf32>
    %57 = arith.addf %54, %56 : vector<80x128xf32>
    %cst_50 = arith.constant 0.000000e+00 : f32
    %58 = vector.broadcast %cst_50 : f32 to vector<80x128xf32>
    %59 = arith.maximumf %57, %58 : vector<80x128xf32>
    %60 = tpu.iota {dimensions = array<i32: 0>} : vector<80x1xi32>
    %c10_i32 = arith.constant 10 : i32
    %c0_i32 = arith.constant 0 : i32
    %61 = arith.cmpi eq, %c10_i32, %c0_i32 : i32
    %c1_i32 = arith.constant 1 : i32
    %62 = arith.select %61, %c1_i32, %c10_i32 : i32
    %63 = vector.broadcast %62 : i32 to vector<80x1xi32>
    %64 = arith.remsi %60, %63 : vector<80x1xi32>
    %c0_i32_51 = arith.constant 0 : i32
    %65 = vector.broadcast %c0_i32_51 : i32 to vector<80x1xi32>
    %66 = arith.cmpi ne, %64, %65 : vector<80x1xi32>
    %c0_i32_52 = arith.constant 0 : i32
    %67 = vector.broadcast %c0_i32_52 : i32 to vector<80x1xi32>
    %68 = arith.cmpi slt, %64, %67 : vector<80x1xi32>
    %c0_i32_53 = arith.constant 0 : i32
    %69 = arith.cmpi slt, %62, %c0_i32_53 : i32
    %70 = vector.broadcast %69 : i1 to vector<80x1xi1>
    %71 = vector.broadcast %70 : vector<80x1xi1> to vector<80x1xi1>
    %72 = arith.xori %68, %71 : vector<80x1xi1>
    %73 = arith.andi %72, %66 : vector<80x1xi1>
    %74 = vector.broadcast %62 : i32 to vector<80x1xi32>
    %75 = arith.addi %64, %74 : vector<80x1xi32>
    %76 = arith.select %73, %75, %64 : vector<80x1xi1>, vector<80x1xi32>
    %c8_i32 = arith.constant 8 : i32
    %77 = vector.broadcast %c8_i32 : i32 to vector<80x1xi32>
    %78 = arith.cmpi slt, %76, %77 : vector<80x1xi32>
    %cst_54 = arith.constant 0.000000e+00 : f32
    %79 = vector.shape_cast %78 : vector<80x1xi1> to vector<80x1xi1>
    %80 = vector.broadcast %79 : vector<80x1xi1> to vector<80x128xi1>
    %81 = vector.broadcast %cst_54 : f32 to vector<80x128xf32>
    %82 = arith.select %80, %59, %81 : vector<80x128xi1>, vector<80x128xf32>
    %83 = arith.truncf %82 : vector<80x128xf32> to vector<80x128xbf16>
    %cst_55 = arith.constant 0.000000e+00 : bf16
    %84 = vector.broadcast %cst_55 : bf16 to vector<11x128xbf16>
    %c0_56 = arith.constant 0 : index
    %c0_57 = arith.constant 0 : index
    %85 = vector.load %arg7[%c0_56, %c0_57] : memref<104x128xbf16, #tpu.memory_space<vmem>>, vector<11x128xbf16>
    tpu.vector_store %arg7[%c0_56, %c0_57], %84 {strides = array<i32>} : memref<104x128xbf16, #tpu.memory_space<vmem>>, vector<11x128xbf16>,
    %cst_58 = arith.constant 0.000000e+00 : bf16
    %86 = vector.broadcast %cst_58 : bf16 to vector<13x128xbf16>
    %c91 = arith.constant 91 : index
    %c0_59 = arith.constant 0 : index
    %87 = vector.load %arg7[%c91, %c0_59] : memref<104x128xbf16, #tpu.memory_space<vmem>>, vector<13x128xbf16>
    tpu.vector_store %arg7[%c91, %c0_59], %86 {strides = array<i32>} : memref<104x128xbf16, #tpu.memory_space<vmem>>, vector<13x128xbf16>,
    %c11_60 = arith.constant 11 : index
    %c0_61 = arith.constant 0 : index
    %88 = vector.load %arg7[%c11_60, %c0_61] : memref<104x128xbf16, #tpu.memory_space<vmem>>, vector<80x128xbf16>
    tpu.vector_store %arg7[%c11_60, %c0_61], %83 {strides = array<i32>} : memref<104x128xbf16, #tpu.memory_space<vmem>>, vector<80x128xbf16>,
    %cst_62 = arith.constant 0.000000e+00 : f32
    %89 = vector.broadcast %cst_62 : f32 to vector<80x128xf32>
    %c0_63 = arith.constant 0 : index
    %c0_64 = arith.constant 0 : index
    %90 = vector.load %arg7[%c0_63, %c0_64] : memref<104x128xbf16, #tpu.memory_space<vmem>>, vector<80x128xbf16>
    %c0_65 = arith.constant 0 : index
    %c0_66 = arith.constant 0 : index
    %c0_67 = arith.constant 0 : index
    %91 = vector.load %arg4[%c0_65, %c0_66, %c0_67] : memref<9x128x128xbf16, #tpu.memory_space<vmem>>, vector<1x128x128xbf16>
    %92 = vector.shape_cast %91 : vector<1x128x128xbf16> to vector<128x128xbf16>
    %cst_68 = arith.constant dense<0.000000e+00> : vector<80x128xf32>
    %93 = tpu.matmul %90, %92, %cst_68 {dimension_numbers = #tpu.dot_dimension_numbers<[1], [0], [0], [1], [0, 0, 1, 1], [], []>} : vector<80x128xbf16>, vector<128x128xbf16>, vector<80x128xf32> -> vector<80x128xf32>
    %94 = arith.addf %89, %93 : vector<80x128xf32>
    %c1_69 = arith.constant 1 : index
    %c0_70 = arith.constant 0 : index
    %95 = vector.load %arg7[%c1_69, %c0_70] : memref<104x128xbf16, #tpu.memory_space<vmem>>, vector<80x128xbf16>
    %c1_71 = arith.constant 1 : index
    %c0_72 = arith.constant 0 : index
    %c0_73 = arith.constant 0 : index
    %96 = vector.load %arg4[%c1_71, %c0_72, %c0_73] : memref<9x128x128xbf16, #tpu.memory_space<vmem>>, vector<1x128x128xbf16>
    %97 = vector.shape_cast %96 : vector<1x128x128xbf16> to vector<128x128xbf16>
    %cst_74 = arith.constant dense<0.000000e+00> : vector<80x128xf32>
    %98 = tpu.matmul %95, %97, %cst_74 {dimension_numbers = #tpu.dot_dimension_numbers<[1], [0], [0], [1], [0, 0, 1, 1], [], []>} : vector<80x128xbf16>, vector<128x128xbf16>, vector<80x128xf32> -> vector<80x128xf32>
    %99 = arith.addf %94, %98 : vector<80x128xf32>
    %c2_75 = arith.constant 2 : index
    %c0_76 = arith.constant 0 : index
    %100 = vector.load %arg7[%c2_75, %c0_76] : memref<104x128xbf16, #tpu.memory_space<vmem>>, vector<80x128xbf16>
    %c2_77 = arith.constant 2 : index
    %c0_78 = arith.constant 0 : index
    %c0_79 = arith.constant 0 : index
    %101 = vector.load %arg4[%c2_77, %c0_78, %c0_79] : memref<9x128x128xbf16, #tpu.memory_space<vmem>>, vector<1x128x128xbf16>
    %102 = vector.shape_cast %101 : vector<1x128x128xbf16> to vector<128x128xbf16>
    %cst_80 = arith.constant dense<0.000000e+00> : vector<80x128xf32>
    %103 = tpu.matmul %100, %102, %cst_80 {dimension_numbers = #tpu.dot_dimension_numbers<[1], [0], [0], [1], [0, 0, 1, 1], [], []>} : vector<80x128xbf16>, vector<128x128xbf16>, vector<80x128xf32> -> vector<80x128xf32>
    %104 = arith.addf %99, %103 : vector<80x128xf32>
    %c10_81 = arith.constant 10 : index
    %c0_82 = arith.constant 0 : index
    %105 = vector.load %arg7[%c10_81, %c0_82] : memref<104x128xbf16, #tpu.memory_space<vmem>>, vector<80x128xbf16>
    %c3_83 = arith.constant 3 : index
    %c0_84 = arith.constant 0 : index
    %c0_85 = arith.constant 0 : index
    %106 = vector.load %arg4[%c3_83, %c0_84, %c0_85] : memref<9x128x128xbf16, #tpu.memory_space<vmem>>, vector<1x128x128xbf16>
    %107 = vector.shape_cast %106 : vector<1x128x128xbf16> to vector<128x128xbf16>
    %cst_86 = arith.constant dense<0.000000e+00> : vector<80x128xf32>
    %108 = tpu.matmul %105, %107, %cst_86 {dimension_numbers = #tpu.dot_dimension_numbers<[1], [0], [0], [1], [0, 0, 1, 1], [], []>} : vector<80x128xbf16>, vector<128x128xbf16>, vector<80x128xf32> -> vector<80x128xf32>
    %109 = arith.addf %104, %108 : vector<80x128xf32>
    %c11_87 = arith.constant 11 : index
    %c0_88 = arith.constant 0 : index
    %110 = vector.load %arg7[%c11_87, %c0_88] : memref<104x128xbf16, #tpu.memory_space<vmem>>, vector<80x128xbf16>
    %c4_89 = arith.constant 4 : index
    %c0_90 = arith.constant 0 : index
    %c0_91 = arith.constant 0 : index
    %111 = vector.load %arg4[%c4_89, %c0_90, %c0_91] : memref<9x128x128xbf16, #tpu.memory_space<vmem>>, vector<1x128x128xbf16>
    %112 = vector.shape_cast %111 : vector<1x128x128xbf16> to vector<128x128xbf16>
    %cst_92 = arith.constant dense<0.000000e+00> : vector<80x128xf32>
    %113 = tpu.matmul %110, %112, %cst_92 {dimension_numbers = #tpu.dot_dimension_numbers<[1], [0], [0], [1], [0, 0, 1, 1], [], []>} : vector<80x128xbf16>, vector<128x128xbf16>, vector<80x128xf32> -> vector<80x128xf32>
    %114 = arith.addf %109, %113 : vector<80x128xf32>
    %c12_93 = arith.constant 12 : index
    %c0_94 = arith.constant 0 : index
    %115 = vector.load %arg7[%c12_93, %c0_94] : memref<104x128xbf16, #tpu.memory_space<vmem>>, vector<80x128xbf16>
    %c5_95 = arith.constant 5 : index
    %c0_96 = arith.constant 0 : index
    %c0_97 = arith.constant 0 : index
    %116 = vector.load %arg4[%c5_95, %c0_96, %c0_97] : memref<9x128x128xbf16, #tpu.memory_space<vmem>>, vector<1x128x128xbf16>
    %117 = vector.shape_cast %116 : vector<1x128x128xbf16> to vector<128x128xbf16>
    %cst_98 = arith.constant dense<0.000000e+00> : vector<80x128xf32>
    %118 = tpu.matmul %115, %117, %cst_98 {dimension_numbers = #tpu.dot_dimension_numbers<[1], [0], [0], [1], [0, 0, 1, 1], [], []>} : vector<80x128xbf16>, vector<128x128xbf16>, vector<80x128xf32> -> vector<80x128xf32>
    %119 = arith.addf %114, %118 : vector<80x128xf32>
    %c20_99 = arith.constant 20 : index
    %c0_100 = arith.constant 0 : index
    %120 = vector.load %arg7[%c20_99, %c0_100] : memref<104x128xbf16, #tpu.memory_space<vmem>>, vector<80x128xbf16>
    %c6_101 = arith.constant 6 : index
    %c0_102 = arith.constant 0 : index
    %c0_103 = arith.constant 0 : index
    %121 = vector.load %arg4[%c6_101, %c0_102, %c0_103] : memref<9x128x128xbf16, #tpu.memory_space<vmem>>, vector<1x128x128xbf16>
    %122 = vector.shape_cast %121 : vector<1x128x128xbf16> to vector<128x128xbf16>
    %cst_104 = arith.constant dense<0.000000e+00> : vector<80x128xf32>
    %123 = tpu.matmul %120, %122, %cst_104 {dimension_numbers = #tpu.dot_dimension_numbers<[1], [0], [0], [1], [0, 0, 1, 1], [], []>} : vector<80x128xbf16>, vector<128x128xbf16>, vector<80x128xf32> -> vector<80x128xf32>
    %124 = arith.addf %119, %123 : vector<80x128xf32>
    %c21_105 = arith.constant 21 : index
    %c0_106 = arith.constant 0 : index
    %125 = vector.load %arg7[%c21_105, %c0_106] : memref<104x128xbf16, #tpu.memory_space<vmem>>, vector<80x128xbf16>
    %c7_107 = arith.constant 7 : index
    %c0_108 = arith.constant 0 : index
    %c0_109 = arith.constant 0 : index
    %126 = vector.load %arg4[%c7_107, %c0_108, %c0_109] : memref<9x128x128xbf16, #tpu.memory_space<vmem>>, vector<1x128x128xbf16>
    %127 = vector.shape_cast %126 : vector<1x128x128xbf16> to vector<128x128xbf16>
    %cst_110 = arith.constant dense<0.000000e+00> : vector<80x128xf32>
    %128 = tpu.matmul %125, %127, %cst_110 {dimension_numbers = #tpu.dot_dimension_numbers<[1], [0], [0], [1], [0, 0, 1, 1], [], []>} : vector<80x128xbf16>, vector<128x128xbf16>, vector<80x128xf32> -> vector<80x128xf32>
    %129 = arith.addf %124, %128 : vector<80x128xf32>
    %c22_111 = arith.constant 22 : index
    %c0_112 = arith.constant 0 : index
    %130 = vector.load %arg7[%c22_111, %c0_112] : memref<104x128xbf16, #tpu.memory_space<vmem>>, vector<80x128xbf16>
    %c8_113 = arith.constant 8 : index
    %c0_114 = arith.constant 0 : index
    %c0_115 = arith.constant 0 : index
    %131 = vector.load %arg4[%c8_113, %c0_114, %c0_115] : memref<9x128x128xbf16, #tpu.memory_space<vmem>>, vector<1x128x128xbf16>
    %132 = vector.shape_cast %131 : vector<1x128x128xbf16> to vector<128x128xbf16>
    %cst_116 = arith.constant dense<0.000000e+00> : vector<80x128xf32>
    %133 = tpu.matmul %130, %132, %cst_116 {dimension_numbers = #tpu.dot_dimension_numbers<[1], [0], [0], [1], [0, 0, 1, 1], [], []>} : vector<80x128xbf16>, vector<128x128xbf16>, vector<80x128xf32> -> vector<80x128xf32>
    %134 = arith.addf %129, %133 : vector<80x128xf32>
    %c0_117 = arith.constant 0 : index
    %c0_118 = arith.constant 0 : index
    %135 = vector.load %arg5[%c0_117, %c0_118] : memref<1x128xf32, #tpu.memory_space<vmem>>, vector<1x128xf32>
    %136 = vector.broadcast %135 : vector<1x128xf32> to vector<80x128xf32>
    %137 = arith.addf %134, %136 : vector<80x128xf32>
    %cst_119 = arith.constant 0.000000e+00 : f32
    %138 = vector.broadcast %cst_119 : f32 to vector<80x128xf32>
    %139 = arith.maximumf %137, %138 : vector<80x128xf32>
    %140 = vector.shape_cast %139 : vector<80x128xf32> to vector<1x80x128xf32>
    %141 = arith.truncf %140 : vector<1x80x128xf32> to vector<1x80x128xbf16>
    %c0_120 = arith.constant 0 : index
    %c0_121 = arith.constant 0 : index
    %c0_122 = arith.constant 0 : index
    %142 = vector.load %arg6[%c0_120, %c0_121, %c0_122] : memref<1x80x128xbf16, #tpu.memory_space<vmem>>, vector<1x80x128xbf16>
    tpu.vector_store %arg6[%c0_120, %c0_121, %c0_122], %141 {strides = array<i32>} : memref<1x80x128xbf16, #tpu.memory_space<vmem>>, vector<1x80x128xbf16>,
    return
  }
  func.func @transform_0(%arg0: i32) -> (i32, i32, i32) {
    %c0_i32 = arith.constant 0 : i32
    %c0_i32_0 = arith.constant 0 : i32
    %c0_i32_1 = arith.constant 0 : i32
    return %arg0, %c0_i32, %c0_i32_0 : i32, i32, i32
  }
  func.func @transform_1(%arg0: i32) -> (i32, i32, i32) {
    %c0_i32 = arith.constant 0 : i32
    %c0_i32_0 = arith.constant 0 : i32
    %c0_i32_1 = arith.constant 0 : i32
    %c0_i32_2 = arith.constant 0 : i32
    return %c0_i32, %c0_i32_0, %c0_i32_1 : i32, i32, i32
  }
  func.func @transform_2(%arg0: i32) -> (i32, i32) {
    %c0_i32 = arith.constant 0 : i32
    %c0_i32_0 = arith.constant 0 : i32
    %c0_i32_1 = arith.constant 0 : i32
    return %c0_i32, %c0_i32_0 : i32, i32
  }
  func.func @transform_3(%arg0: i32) -> (i32, i32, i32) {
    %c0_i32 = arith.constant 0 : i32
    %c0_i32_0 = arith.constant 0 : i32
    %c0_i32_1 = arith.constant 0 : i32
    %c0_i32_2 = arith.constant 0 : i32
    return %c0_i32, %c0_i32_0, %c0_i32_1 : i32, i32, i32
  }
  func.func @transform_4(%arg0: i32) -> (i32, i32) {
    %c0_i32 = arith.constant 0 : i32
    %c0_i32_0 = arith.constant 0 : i32
    %c0_i32_1 = arith.constant 0 : i32
    return %c0_i32, %c0_i32_0 : i32, i32
  }
  func.func @transform_5(%arg0: i32) -> (i32, i32, i32) {
    %c0_i32 = arith.constant 0 : i32
    %c0_i32_0 = arith.constant 0 : i32
    %c0_i32_1 = arith.constant 0 : i32
    return %arg0, %c0_i32, %c0_i32_0 : i32, i32, i32
  }
}

module attributes {stable_mosaic.version = 11 : i64} {
  func.func @kernel(%arg0: i32, %arg1: memref<1x104x128xbf16, #tpu.memory_space<vmem>>, %arg2: memref<9x128x128xbf16, #tpu.memory_space<vmem>>, %arg3: memref<1x128xf32, #tpu.memory_space<vmem>>, %arg4: memref<9x128x128xbf16, #tpu.memory_space<vmem>>, %arg5: memref<1x128xf32, #tpu.memory_space<vmem>>, %arg6: memref<1x80x128xbf16, #tpu.memory_space<vmem>>, %arg7: memref<104x128xbf16, #tpu.memory_space<vmem>>) attributes {dimension_semantics = [#tpu.dimension_semantics<parallel>], iteration_bounds = array<i64: 2>, scalar_prefetch = 0 : i64, scratch_operands = 1 : i64, tpu.core_type = #tpu.core_type<tc>, window_params = [{transform_indices = @transform_0, window_bounds = array<i64: 1, 104, 128>}, {pipeline_mode = #tpu.pipeline_mode<synchronous>, transform_indices = @transform_1, window_bounds = array<i64: 9, 128, 128>}, {pipeline_mode = #tpu.pipeline_mode<synchronous>, transform_indices = @transform_2, window_bounds = array<i64: 1, 128>}, {pipeline_mode = #tpu.pipeline_mode<synchronous>, transform_indices = @transform_3, window_bounds = array<i64: 9, 128, 128>}, {pipeline_mode = #tpu.pipeline_mode<synchronous>, transform_indices = @transform_4, window_bounds = array<i64: 1, 128>}, {transform_indices = @transform_5, window_bounds = array<i64: 1, 80, 128>}]} {
    %cst = arith.constant 0.000000e+00 : f32
    %0 = vector.broadcast %cst : f32 to vector<80x128xf32>
    %c0 = arith.constant 0 : index
    %c0_0 = arith.constant 0 : index
    %c0_1 = arith.constant 0 : index
    %1 = vector.load %arg1[%c0, %c0_0, %c0_1] : memref<1x104x128xbf16, #tpu.memory_space<vmem>>, vector<1x80x128xbf16>
    %2 = vector.shape_cast %1 : vector<1x80x128xbf16> to vector<80x128xbf16>
    %c0_2 = arith.constant 0 : index
    %c0_3 = arith.constant 0 : index
    %c0_4 = arith.constant 0 : index
    %3 = vector.load %arg2[%c0_2, %c0_3, %c0_4] : memref<9x128x128xbf16, #tpu.memory_space<vmem>>, vector<1x128x128xbf16>
    %4 = vector.shape_cast %3 : vector<1x128x128xbf16> to vector<128x128xbf16>
    %cst_5 = arith.constant dense<0.000000e+00> : vector<80x128xf32>
    %5 = tpu.matmul %2, %4, %cst_5 {dimension_numbers = #tpu.dot_dimension_numbers<[1], [0], [0], [1], [0, 0, 1, 1], [], []>} : vector<80x128xbf16>, vector<128x128xbf16>, vector<80x128xf32> -> vector<80x128xf32>
    %6 = arith.addf %0, %5 : vector<80x128xf32>
    %c0_6 = arith.constant 0 : index
    %c1 = arith.constant 1 : index
    %c0_7 = arith.constant 0 : index
    %7 = vector.load %arg1[%c0_6, %c1, %c0_7] : memref<1x104x128xbf16, #tpu.memory_space<vmem>>, vector<1x80x128xbf16>
    %8 = vector.shape_cast %7 : vector<1x80x128xbf16> to vector<80x128xbf16>
    %c1_8 = arith.constant 1 : index
    %c0_9 = arith.constant 0 : index
    %c0_10 = arith.constant 0 : index
    %9 = vector.load %arg2[%c1_8, %c0_9, %c0_10] : memref<9x128x128xbf16, #tpu.memory_space<vmem>>, vector<1x128x128xbf16>
    %10 = vector.shape_cast %9 : vector<1x128x128xbf16> to vector<128x128xbf16>
    %cst_11 = arith.constant dense<0.000000e+00> : vector<80x128xf32>
    %11 = tpu.matmul %8, %10, %cst_11 {dimension_numbers = #tpu.dot_dimension_numbers<[1], [0], [0], [1], [0, 0, 1, 1], [], []>} : vector<80x128xbf16>, vector<128x128xbf16>, vector<80x128xf32> -> vector<80x128xf32>
    %12 = arith.addf %6, %11 : vector<80x128xf32>
    %c0_12 = arith.constant 0 : index
    %c2 = arith.constant 2 : index
    %c0_13 = arith.constant 0 : index
    %13 = vector.load %arg1[%c0_12, %c2, %c0_13] : memref<1x104x128xbf16, #tpu.memory_space<vmem>>, vector<1x80x128xbf16>
    %14 = vector.shape_cast %13 : vector<1x80x128xbf16> to vector<80x128xbf16>
    %c2_14 = arith.constant 2 : index
    %c0_15 = arith.constant 0 : index
    %c0_16 = arith.constant 0 : index
    %15 = vector.load %arg2[%c2_14, %c0_15, %c0_16] : memref<9x128x128xbf16, #tpu.memory_space<vmem>>, vector<1x128x128xbf16>
    %16 = vector.shape_cast %15 : vector<1x128x128xbf16> to vector<128x128xbf16>
    %cst_17 = arith.constant dense<0.000000e+00> : vector<80x128xf32>
    %17 = tpu.matmul %14, %16, %cst_17 {dimension_numbers = #tpu.dot_dimension_numbers<[1], [0], [0], [1], [0, 0, 1, 1], [], []>} : vector<80x128xbf16>, vector<128x128xbf16>, vector<80x128xf32> -> vector<80x128xf32>
    %18 = arith.addf %12, %17 : vector<80x128xf32>
    %c0_18 = arith.constant 0 : index
    %c10 = arith.constant 10 : index
    %c0_19 = arith.constant 0 : index
    %19 = vector.load %arg1[%c0_18, %c10, %c0_19] : memref<1x104x128xbf16, #tpu.memory_space<vmem>>, vector<1x80x128xbf16>
    %20 = vector.shape_cast %19 : vector<1x80x128xbf16> to vector<80x128xbf16>
    %c3 = arith.constant 3 : index
    %c0_20 = arith.constant 0 : index
    %c0_21 = arith.constant 0 : index
    %21 = vector.load %arg2[%c3, %c0_20, %c0_21] : memref<9x128x128xbf16, #tpu.memory_space<vmem>>, vector<1x128x128xbf16>
    %22 = vector.shape_cast %21 : vector<1x128x128xbf16> to vector<128x128xbf16>
    %cst_22 = arith.constant dense<0.000000e+00> : vector<80x128xf32>
    %23 = tpu.matmul %20, %22, %cst_22 {dimension_numbers = #tpu.dot_dimension_numbers<[1], [0], [0], [1], [0, 0, 1, 1], [], []>} : vector<80x128xbf16>, vector<128x128xbf16>, vector<80x128xf32> -> vector<80x128xf32>
    %24 = arith.addf %18, %23 : vector<80x128xf32>
    %c0_23 = arith.constant 0 : index
    %c11 = arith.constant 11 : index
    %c0_24 = arith.constant 0 : index
    %25 = vector.load %arg1[%c0_23, %c11, %c0_24] : memref<1x104x128xbf16, #tpu.memory_space<vmem>>, vector<1x80x128xbf16>
    %26 = vector.shape_cast %25 : vector<1x80x128xbf16> to vector<80x128xbf16>
    %c4 = arith.constant 4 : index
    %c0_25 = arith.constant 0 : index
    %c0_26 = arith.constant 0 : index
    %27 = vector.load %arg2[%c4, %c0_25, %c0_26] : memref<9x128x128xbf16, #tpu.memory_space<vmem>>, vector<1x128x128xbf16>
    %28 = vector.shape_cast %27 : vector<1x128x128xbf16> to vector<128x128xbf16>
    %cst_27 = arith.constant dense<0.000000e+00> : vector<80x128xf32>
    %29 = tpu.matmul %26, %28, %cst_27 {dimension_numbers = #tpu.dot_dimension_numbers<[1], [0], [0], [1], [0, 0, 1, 1], [], []>} : vector<80x128xbf16>, vector<128x128xbf16>, vector<80x128xf32> -> vector<80x128xf32>
    %30 = arith.addf %24, %29 : vector<80x128xf32>
    %c0_28 = arith.constant 0 : index
    %c12 = arith.constant 12 : index
    %c0_29 = arith.constant 0 : index
    %31 = vector.load %arg1[%c0_28, %c12, %c0_29] : memref<1x104x128xbf16, #tpu.memory_space<vmem>>, vector<1x80x128xbf16>
    %32 = vector.shape_cast %31 : vector<1x80x128xbf16> to vector<80x128xbf16>
    %c5 = arith.constant 5 : index
    %c0_30 = arith.constant 0 : index
    %c0_31 = arith.constant 0 : index
    %33 = vector.load %arg2[%c5, %c0_30, %c0_31] : memref<9x128x128xbf16, #tpu.memory_space<vmem>>, vector<1x128x128xbf16>
    %34 = vector.shape_cast %33 : vector<1x128x128xbf16> to vector<128x128xbf16>
    %cst_32 = arith.constant dense<0.000000e+00> : vector<80x128xf32>
    %35 = tpu.matmul %32, %34, %cst_32 {dimension_numbers = #tpu.dot_dimension_numbers<[1], [0], [0], [1], [0, 0, 1, 1], [], []>} : vector<80x128xbf16>, vector<128x128xbf16>, vector<80x128xf32> -> vector<80x128xf32>
    %36 = arith.addf %30, %35 : vector<80x128xf32>
    %c0_33 = arith.constant 0 : index
    %c20 = arith.constant 20 : index
    %c0_34 = arith.constant 0 : index
    %37 = vector.load %arg1[%c0_33, %c20, %c0_34] : memref<1x104x128xbf16, #tpu.memory_space<vmem>>, vector<1x80x128xbf16>
    %38 = vector.shape_cast %37 : vector<1x80x128xbf16> to vector<80x128xbf16>
    %c6 = arith.constant 6 : index
    %c0_35 = arith.constant 0 : index
    %c0_36 = arith.constant 0 : index
    %39 = vector.load %arg2[%c6, %c0_35, %c0_36] : memref<9x128x128xbf16, #tpu.memory_space<vmem>>, vector<1x128x128xbf16>
    %40 = vector.shape_cast %39 : vector<1x128x128xbf16> to vector<128x128xbf16>
    %cst_37 = arith.constant dense<0.000000e+00> : vector<80x128xf32>
    %41 = tpu.matmul %38, %40, %cst_37 {dimension_numbers = #tpu.dot_dimension_numbers<[1], [0], [0], [1], [0, 0, 1, 1], [], []>} : vector<80x128xbf16>, vector<128x128xbf16>, vector<80x128xf32> -> vector<80x128xf32>
    %42 = arith.addf %36, %41 : vector<80x128xf32>
    %c0_38 = arith.constant 0 : index
    %c21 = arith.constant 21 : index
    %c0_39 = arith.constant 0 : index
    %43 = vector.load %arg1[%c0_38, %c21, %c0_39] : memref<1x104x128xbf16, #tpu.memory_space<vmem>>, vector<1x80x128xbf16>
    %44 = vector.shape_cast %43 : vector<1x80x128xbf16> to vector<80x128xbf16>
    %c7 = arith.constant 7 : index
    %c0_40 = arith.constant 0 : index
    %c0_41 = arith.constant 0 : index
    %45 = vector.load %arg2[%c7, %c0_40, %c0_41] : memref<9x128x128xbf16, #tpu.memory_space<vmem>>, vector<1x128x128xbf16>
    %46 = vector.shape_cast %45 : vector<1x128x128xbf16> to vector<128x128xbf16>
    %cst_42 = arith.constant dense<0.000000e+00> : vector<80x128xf32>
    %47 = tpu.matmul %44, %46, %cst_42 {dimension_numbers = #tpu.dot_dimension_numbers<[1], [0], [0], [1], [0, 0, 1, 1], [], []>} : vector<80x128xbf16>, vector<128x128xbf16>, vector<80x128xf32> -> vector<80x128xf32>
    %48 = arith.addf %42, %47 : vector<80x128xf32>
    %c0_43 = arith.constant 0 : index
    %c22 = arith.constant 22 : index
    %c0_44 = arith.constant 0 : index
    %49 = vector.load %arg1[%c0_43, %c22, %c0_44] : memref<1x104x128xbf16, #tpu.memory_space<vmem>>, vector<1x80x128xbf16>
    %50 = vector.shape_cast %49 : vector<1x80x128xbf16> to vector<80x128xbf16>
    %c8 = arith.constant 8 : index
    %c0_45 = arith.constant 0 : index
    %c0_46 = arith.constant 0 : index
    %51 = vector.load %arg2[%c8, %c0_45, %c0_46] : memref<9x128x128xbf16, #tpu.memory_space<vmem>>, vector<1x128x128xbf16>
    %52 = vector.shape_cast %51 : vector<1x128x128xbf16> to vector<128x128xbf16>
    %cst_47 = arith.constant dense<0.000000e+00> : vector<80x128xf32>
    %53 = tpu.matmul %50, %52, %cst_47 {dimension_numbers = #tpu.dot_dimension_numbers<[1], [0], [0], [1], [0, 0, 1, 1], [], []>} : vector<80x128xbf16>, vector<128x128xbf16>, vector<80x128xf32> -> vector<80x128xf32>
    %54 = arith.addf %48, %53 : vector<80x128xf32>
    %c0_48 = arith.constant 0 : index
    %c0_49 = arith.constant 0 : index
    %55 = vector.load %arg3[%c0_48, %c0_49] : memref<1x128xf32, #tpu.memory_space<vmem>>, vector<1x128xf32>
    %56 = vector.broadcast %55 : vector<1x128xf32> to vector<80x128xf32>
    %57 = arith.addf %54, %56 : vector<80x128xf32>
    %cst_50 = arith.constant 0.000000e+00 : f32
    %58 = vector.broadcast %cst_50 : f32 to vector<80x128xf32>
    %59 = arith.maximumf %57, %58 : vector<80x128xf32>
    %60 = tpu.iota {dimensions = array<i32: 0>} : vector<80x1xi32>
    %c10_i32 = arith.constant 10 : i32
    %c0_i32 = arith.constant 0 : i32
    %61 = arith.cmpi eq, %c10_i32, %c0_i32 : i32
    %c1_i32 = arith.constant 1 : i32
    %62 = arith.select %61, %c1_i32, %c10_i32 : i32
    %63 = vector.broadcast %62 : i32 to vector<80x1xi32>
    %64 = arith.remsi %60, %63 : vector<80x1xi32>
    %c0_i32_51 = arith.constant 0 : i32
    %65 = vector.broadcast %c0_i32_51 : i32 to vector<80x1xi32>
    %66 = arith.cmpi ne, %64, %65 : vector<80x1xi32>
    %c0_i32_52 = arith.constant 0 : i32
    %67 = vector.broadcast %c0_i32_52 : i32 to vector<80x1xi32>
    %68 = arith.cmpi slt, %64, %67 : vector<80x1xi32>
    %c0_i32_53 = arith.constant 0 : i32
    %69 = arith.cmpi slt, %62, %c0_i32_53 : i32
    %70 = vector.broadcast %69 : i1 to vector<80x1xi1>
    %71 = vector.broadcast %70 : vector<80x1xi1> to vector<80x1xi1>
    %72 = arith.xori %68, %71 : vector<80x1xi1>
    %73 = arith.andi %72, %66 : vector<80x1xi1>
    %74 = vector.broadcast %62 : i32 to vector<80x1xi32>
    %75 = arith.addi %64, %74 : vector<80x1xi32>
    %76 = arith.select %73, %75, %64 : vector<80x1xi1>, vector<80x1xi32>
    %c8_i32 = arith.constant 8 : i32
    %77 = vector.broadcast %c8_i32 : i32 to vector<80x1xi32>
    %78 = arith.cmpi slt, %76, %77 : vector<80x1xi32>
    %cst_54 = arith.constant 0.000000e+00 : f32
    %79 = vector.shape_cast %78 : vector<80x1xi1> to vector<80x1xi1>
    %80 = vector.broadcast %79 : vector<80x1xi1> to vector<80x128xi1>
    %81 = vector.broadcast %cst_54 : f32 to vector<80x128xf32>
    %82 = arith.select %80, %59, %81 : vector<80x128xi1>, vector<80x128xf32>
    %83 = arith.truncf %82 : vector<80x128xf32> to vector<80x128xbf16>
    %cst_55 = arith.constant 0.000000e+00 : bf16
    %84 = vector.broadcast %cst_55 : bf16 to vector<11x128xbf16>
    %c0_56 = arith.constant 0 : index
    %c0_57 = arith.constant 0 : index
    %85 = vector.load %arg7[%c0_56, %c0_57] : memref<104x128xbf16, #tpu.memory_space<vmem>>, vector<11x128xbf16>
    tpu.vector_store %arg7[%c0_56, %c0_57], %84 {strides = array<i32>} : memref<104x128xbf16, #tpu.memory_space<vmem>>, vector<11x128xbf16>,
    %cst_58 = arith.constant 0.000000e+00 : bf16
    %86 = vector.broadcast %cst_58 : bf16 to vector<13x128xbf16>
    %c91 = arith.constant 91 : index
    %c0_59 = arith.constant 0 : index
    %87 = vector.load %arg7[%c91, %c0_59] : memref<104x128xbf16, #tpu.memory_space<vmem>>, vector<13x128xbf16>
    tpu.vector_store %arg7[%c91, %c0_59], %86 {strides = array<i32>} : memref<104x128xbf16, #tpu.memory_space<vmem>>, vector<13x128xbf16>,
    %c11_60 = arith.constant 11 : index
    %c0_61 = arith.constant 0 : index
    %88 = vector.load %arg7[%c11_60, %c0_61] : memref<104x128xbf16, #tpu.memory_space<vmem>>, vector<80x128xbf16>
    tpu.vector_store %arg7[%c11_60, %c0_61], %83 {strides = array<i32>} : memref<104x128xbf16, #tpu.memory_space<vmem>>, vector<80x128xbf16>,
    %cst_62 = arith.constant 0.000000e+00 : f32
    %89 = vector.broadcast %cst_62 : f32 to vector<80x128xf32>
    %c0_63 = arith.constant 0 : index
    %c0_64 = arith.constant 0 : index
    %90 = vector.load %arg7[%c0_63, %c0_64] : memref<104x128xbf16, #tpu.memory_space<vmem>>, vector<80x128xbf16>
    %c0_65 = arith.constant 0 : index
    %c0_66 = arith.constant 0 : index
    %c0_67 = arith.constant 0 : index
    %91 = vector.load %arg4[%c0_65, %c0_66, %c0_67] : memref<9x128x128xbf16, #tpu.memory_space<vmem>>, vector<1x128x128xbf16>
    %92 = vector.shape_cast %91 : vector<1x128x128xbf16> to vector<128x128xbf16>
    %cst_68 = arith.constant dense<0.000000e+00> : vector<80x128xf32>
    %93 = tpu.matmul %90, %92, %cst_68 {dimension_numbers = #tpu.dot_dimension_numbers<[1], [0], [0], [1], [0, 0, 1, 1], [], []>} : vector<80x128xbf16>, vector<128x128xbf16>, vector<80x128xf32> -> vector<80x128xf32>
    %94 = arith.addf %89, %93 : vector<80x128xf32>
    %c1_69 = arith.constant 1 : index
    %c0_70 = arith.constant 0 : index
    %95 = vector.load %arg7[%c1_69, %c0_70] : memref<104x128xbf16, #tpu.memory_space<vmem>>, vector<80x128xbf16>
    %c1_71 = arith.constant 1 : index
    %c0_72 = arith.constant 0 : index
    %c0_73 = arith.constant 0 : index
    %96 = vector.load %arg4[%c1_71, %c0_72, %c0_73] : memref<9x128x128xbf16, #tpu.memory_space<vmem>>, vector<1x128x128xbf16>
    %97 = vector.shape_cast %96 : vector<1x128x128xbf16> to vector<128x128xbf16>
    %cst_74 = arith.constant dense<0.000000e+00> : vector<80x128xf32>
    %98 = tpu.matmul %95, %97, %cst_74 {dimension_numbers = #tpu.dot_dimension_numbers<[1], [0], [0], [1], [0, 0, 1, 1], [], []>} : vector<80x128xbf16>, vector<128x128xbf16>, vector<80x128xf32> -> vector<80x128xf32>
    %99 = arith.addf %94, %98 : vector<80x128xf32>
    %c2_75 = arith.constant 2 : index
    %c0_76 = arith.constant 0 : index
    %100 = vector.load %arg7[%c2_75, %c0_76] : memref<104x128xbf16, #tpu.memory_space<vmem>>, vector<80x128xbf16>
    %c2_77 = arith.constant 2 : index
    %c0_78 = arith.constant 0 : index
    %c0_79 = arith.constant 0 : index
    %101 = vector.load %arg4[%c2_77, %c0_78, %c0_79] : memref<9x128x128xbf16, #tpu.memory_space<vmem>>, vector<1x128x128xbf16>
    %102 = vector.shape_cast %101 : vector<1x128x128xbf16> to vector<128x128xbf16>
    %cst_80 = arith.constant dense<0.000000e+00> : vector<80x128xf32>
    %103 = tpu.matmul %100, %102, %cst_80 {dimension_numbers = #tpu.dot_dimension_numbers<[1], [0], [0], [1], [0, 0, 1, 1], [], []>} : vector<80x128xbf16>, vector<128x128xbf16>, vector<80x128xf32> -> vector<80x128xf32>
    %104 = arith.addf %99, %103 : vector<80x128xf32>
    %c10_81 = arith.constant 10 : index
    %c0_82 = arith.constant 0 : index
    %105 = vector.load %arg7[%c10_81, %c0_82] : memref<104x128xbf16, #tpu.memory_space<vmem>>, vector<80x128xbf16>
    %c3_83 = arith.constant 3 : index
    %c0_84 = arith.constant 0 : index
    %c0_85 = arith.constant 0 : index
    %106 = vector.load %arg4[%c3_83, %c0_84, %c0_85] : memref<9x128x128xbf16, #tpu.memory_space<vmem>>, vector<1x128x128xbf16>
    %107 = vector.shape_cast %106 : vector<1x128x128xbf16> to vector<128x128xbf16>
    %cst_86 = arith.constant dense<0.000000e+00> : vector<80x128xf32>
    %108 = tpu.matmul %105, %107, %cst_86 {dimension_numbers = #tpu.dot_dimension_numbers<[1], [0], [0], [1], [0, 0, 1, 1], [], []>} : vector<80x128xbf16>, vector<128x128xbf16>, vector<80x128xf32> -> vector<80x128xf32>
    %109 = arith.addf %104, %108 : vector<80x128xf32>
    %c11_87 = arith.constant 11 : index
    %c0_88 = arith.constant 0 : index
    %110 = vector.load %arg7[%c11_87, %c0_88] : memref<104x128xbf16, #tpu.memory_space<vmem>>, vector<80x128xbf16>
    %c4_89 = arith.constant 4 : index
    %c0_90 = arith.constant 0 : index
    %c0_91 = arith.constant 0 : index
    %111 = vector.load %arg4[%c4_89, %c0_90, %c0_91] : memref<9x128x128xbf16, #tpu.memory_space<vmem>>, vector<1x128x128xbf16>
    %112 = vector.shape_cast %111 : vector<1x128x128xbf16> to vector<128x128xbf16>
    %cst_92 = arith.constant dense<0.000000e+00> : vector<80x128xf32>
    %113 = tpu.matmul %110, %112, %cst_92 {dimension_numbers = #tpu.dot_dimension_numbers<[1], [0], [0], [1], [0, 0, 1, 1], [], []>} : vector<80x128xbf16>, vector<128x128xbf16>, vector<80x128xf32> -> vector<80x128xf32>
    %114 = arith.addf %109, %113 : vector<80x128xf32>
    %c12_93 = arith.constant 12 : index
    %c0_94 = arith.constant 0 : index
    %115 = vector.load %arg7[%c12_93, %c0_94] : memref<104x128xbf16, #tpu.memory_space<vmem>>, vector<80x128xbf16>
    %c5_95 = arith.constant 5 : index
    %c0_96 = arith.constant 0 : index
    %c0_97 = arith.constant 0 : index
    %116 = vector.load %arg4[%c5_95, %c0_96, %c0_97] : memref<9x128x128xbf16, #tpu.memory_space<vmem>>, vector<1x128x128xbf16>
    %117 = vector.shape_cast %116 : vector<1x128x128xbf16> to vector<128x128xbf16>
    %cst_98 = arith.constant dense<0.000000e+00> : vector<80x128xf32>
    %118 = tpu.matmul %115, %117, %cst_98 {dimension_numbers = #tpu.dot_dimension_numbers<[1], [0], [0], [1], [0, 0, 1, 1], [], []>} : vector<80x128xbf16>, vector<128x128xbf16>, vector<80x128xf32> -> vector<80x128xf32>
    %119 = arith.addf %114, %118 : vector<80x128xf32>
    %c20_99 = arith.constant 20 : index
    %c0_100 = arith.constant 0 : index
    %120 = vector.load %arg7[%c20_99, %c0_100] : memref<104x128xbf16, #tpu.memory_space<vmem>>, vector<80x128xbf16>
    %c6_101 = arith.constant 6 : index
    %c0_102 = arith.constant 0 : index
    %c0_103 = arith.constant 0 : index
    %121 = vector.load %arg4[%c6_101, %c0_102, %c0_103] : memref<9x128x128xbf16, #tpu.memory_space<vmem>>, vector<1x128x128xbf16>
    %122 = vector.shape_cast %121 : vector<1x128x128xbf16> to vector<128x128xbf16>
    %cst_104 = arith.constant dense<0.000000e+00> : vector<80x128xf32>
    %123 = tpu.matmul %120, %122, %cst_104 {dimension_numbers = #tpu.dot_dimension_numbers<[1], [0], [0], [1], [0, 0, 1, 1], [], []>} : vector<80x128xbf16>, vector<128x128xbf16>, vector<80x128xf32> -> vector<80x128xf32>
    %124 = arith.addf %119, %123 : vector<80x128xf32>
    %c21_105 = arith.constant 21 : index
    %c0_106 = arith.constant 0 : index
    %125 = vector.load %arg7[%c21_105, %c0_106] : memref<104x128xbf16, #tpu.memory_space<vmem>>, vector<80x128xbf16>
    %c7_107 = arith.constant 7 : index
    %c0_108 = arith.constant 0 : index
    %c0_109 = arith.constant 0 : index
    %126 = vector.load %arg4[%c7_107, %c0_108, %c0_109] : memref<9x128x128xbf16, #tpu.memory_space<vmem>>, vector<1x128x128xbf16>
    %127 = vector.shape_cast %126 : vector<1x128x128xbf16> to vector<128x128xbf16>
    %cst_110 = arith.constant dense<0.000000e+00> : vector<80x128xf32>
    %128 = tpu.matmul %125, %127, %cst_110 {dimension_numbers = #tpu.dot_dimension_numbers<[1], [0], [0], [1], [0, 0, 1, 1], [], []>} : vector<80x128xbf16>, vector<128x128xbf16>, vector<80x128xf32> -> vector<80x128xf32>
    %129 = arith.addf %124, %128 : vector<80x128xf32>
    %c22_111 = arith.constant 22 : index
    %c0_112 = arith.constant 0 : index
    %130 = vector.load %arg7[%c22_111, %c0_112] : memref<104x128xbf16, #tpu.memory_space<vmem>>, vector<80x128xbf16>
    %c8_113 = arith.constant 8 : index
    %c0_114 = arith.constant 0 : index
    %c0_115 = arith.constant 0 : index
    %131 = vector.load %arg4[%c8_113, %c0_114, %c0_115] : memref<9x128x128xbf16, #tpu.memory_space<vmem>>, vector<1x128x128xbf16>
    %132 = vector.shape_cast %131 : vector<1x128x128xbf16> to vector<128x128xbf16>
    %cst_116 = arith.constant dense<0.000000e+00> : vector<80x128xf32>
    %133 = tpu.matmul %130, %132, %cst_116 {dimension_numbers = #tpu.dot_dimension_numbers<[1], [0], [0], [1], [0, 0, 1, 1], [], []>} : vector<80x128xbf16>, vector<128x128xbf16>, vector<80x128xf32> -> vector<80x128xf32>
    %134 = arith.addf %129, %133 : vector<80x128xf32>
    %c0_117 = arith.constant 0 : index
    %c0_118 = arith.constant 0 : index
    %135 = vector.load %arg5[%c0_117, %c0_118] : memref<1x128xf32, #tpu.memory_space<vmem>>, vector<1x128xf32>
    %136 = vector.broadcast %135 : vector<1x128xf32> to vector<80x128xf32>
    %137 = arith.addf %134, %136 : vector<80x128xf32>
    %cst_119 = arith.constant 0.000000e+00 : f32
    %138 = vector.broadcast %cst_119 : f32 to vector<80x128xf32>
    %139 = arith.maximumf %137, %138 : vector<80x128xf32>
    %140 = vector.shape_cast %139 : vector<80x128xf32> to vector<1x80x128xf32>
    %141 = arith.truncf %140 : vector<1x80x128xf32> to vector<1x80x128xbf16>
    %c0_120 = arith.constant 0 : index
    %c0_121 = arith.constant 0 : index
    %c0_122 = arith.constant 0 : index
    %142 = vector.load %arg6[%c0_120, %c0_121, %c0_122] : memref<1x80x128xbf16, #tpu.memory_space<vmem>>, vector<1x80x128xbf16>
    tpu.vector_store %arg6[%c0_120, %c0_121, %c0_122], %141 {strides = array<i32>} : memref<1x80x128xbf16, #tpu.memory_space<vmem>>, vector<1x80x128xbf16>,
    return
  }
  func.func @transform_0(%arg0: i32) -> (i32, i32, i32) {
    %c0_i32 = arith.constant 0 : i32
    %c0_i32_0 = arith.constant 0 : i32
    %c0_i32_1 = arith.constant 0 : i32
    return %arg0, %c0_i32, %c0_i32_0 : i32, i32, i32
  }
  func.func @transform_1(%arg0: i32) -> (i32, i32, i32) {
    %c0_i32 = arith.constant 0 : i32
    %c0_i32_0 = arith.constant 0 : i32
    %c0_i32_1 = arith.constant 0 : i32
    %c0_i32_2 = arith.constant 0 : i32
    return %c0_i32, %c0_i32_0, %c0_i32_1 : i32, i32, i32
  }
  func.func @transform_2(%arg0: i32) -> (i32, i32) {
    %c0_i32 = arith.constant 0 : i32
    %c0_i32_0 = arith.constant 0 : i32
    %c0_i32_1 = arith.constant 0 : i32
    return %c0_i32, %c0_i32_0 : i32, i32
  }
  func.func @transform_3(%arg0: i32) -> (i32, i32, i32) {
    %c0_i32 = arith.constant 0 : i32
    %c0_i32_0 = arith.constant 0 : i32
    %c0_i32_1 = arith.constant 0 : i32
    %c0_i32_2 = arith.constant 0 : i32
    return %c0_i32, %c0_i32_0, %c0_i32_1 : i32, i32, i32
  }
  func.func @transform_4(%arg0: i32) -> (i32, i32) {
    %c0_i32 = arith.constant 0 : i32
    %c0_i32_0 = arith.constant 0 : i32
    %c0_i32_1 = arith.constant 0 : i32
    return %c0_i32, %c0_i32_0 : i32, i32
  }
  func.func @transform_5(%arg0: i32) -> (i32, i32, i32) {
    %c0_i32 = arith.constant 0 : i32
    %c0_i32_0 = arith.constant 0 : i32
    %c0_i32_1 = arith.constant 0 : i32
    return %arg0, %c0_i32, %c0_i32_0 : i32, i32, i32
  }
}

</mosaic_0001>

<bundles_post_ra>
// kernel: tpu_custom_call.1
= control target key start
LH: loop header
LB: loop body
LE: loop exit
PB: predicated region body
PF: predicated region fallthrough
CT: control target
= control target key end

     0   :  { %s6016_s0 = inlined_call_operand.hbm [shape: bf16[2,104,128], index: 0, kind: input, shape index: {}]   ;;  %s6017_s1 = inlined_call_operand.hbm [shape: bf16[9,128,128], index: 1, kind: input, shape index: {}]   ;;  %s6018_s2 = inlined_call_operand.vmem [shape: f32[1,128], index: 2, kind: input, shape index: {}]   ;;  %s6019_s3 = inlined_call_operand.hbm [shape: bf16[9,128,128], index: 3, kind: input, shape index: {}]   ;;  %s6020_s4 = inlined_call_operand.vmem [shape: f32[1,128], index: 4, kind: input, shape index: {}]   ;;  %s6021_s5 = inlined_call_operand.hbm [shape: bf16[2,80,128], index: 5, kind: output, shape index: {}]  }
   0x1   :  { %6024 = sst [smem:[#allocation13_spill]] %s6017_s1 }
   0x2   :  { %10 = vsyncpa [#allocation4], 0 }
   0x3   :  { %12 = vsyncpa [#allocation4 + $0x1], 0 }
   0x4   :  { %13 = vsyncpa [#allocation7], 0 }
   0x5   :  { %14 = vsyncpa [#allocation5], 0 }
   0x6   :  { %16 = vsyncpa [#allocation5 + $0x1], 0  ;;  %s4886_s18 = smov 0   ;;  %s4888_s19 = smov 0  }
   0x7   :  { %s4890_s20 = smov 0   ;;  %s4892_s21 = smov 0  }
   0x8 LB: > { %s4907_s22 = sadd.s32 4294967295, %s4847_s21   ;;  %s3697_s23 = sadd.s32 4294967294, %s4847_s21   ;;  %s4847_s21 = sphi %s4892_s21, %s6085_s21   ;;  %s4843_s20 = sphi %s4890_s20, %s6084_s20   ;;  %s4839_s19 = sphi %s4888_s19, %s6083_s19   ;;  %s4835_s18 = sphi %s4886_s18, %s6082_s18  }
   0x9   : > { %p42_p0 = scmp.ne.s32.totalorder %s4839_s19, %s4835_s18  ;;  %p43_p1 = scmp.eq.s32.totalorder %s4907_s22, 0 }
   0xa   : > { %p150_p2 = scmp.eq.s32.totalorder %s4907_s22, 1  ;;  %p156_p3 = scmp.eq.s32.totalorder %s3697_s23, 1 }
   0xb   : > { %p4916_p4 = por %p43_p1, %p42_p0  ;;  %p3698_p5 = scmp.ge.s32.totalorder %s4847_s21, 1 }
   0xc   : > { %p4921_p6 = por %p156_p3, %p42_p0  ;;  %p163_p7 = scmp.lt.s32.totalorder %s4847_s21, 3 }
   0xd   : > { %s6027_s1 = sld [smem:[#allocation13_spill]]  ;;  %s4849_s30 = smov [#allocation6]  }
   0xe   : > { %p4929_p8 = pnand %p3698_p5, %p163_p7  ;;  %s176_s6 = sshll.u32 %s4849_s30, 4  ;;  %s177_s6 = int_to_ptr.vmem [resolvable:$true] %s176_s6 }
   0xf   : > { %s191_s9 = sshll.u32 %s6019_s3, 4  ;;  %s6022_s10 = smov 64   ;;  %s192_s9 = int_to_ptr.hbm [resolvable:$true] %s191_s9 }
  0x10   : > { %p4625_p9 = pneg %p4929_p8  ;;  %s6023_s11 = smov 4  }
  0x11   : > { %s4852_s12 = smov [#allocation8]   ;;  %s4948_s14 = sadd.s32 1, %s4847_s21  }
  0x12   : > { %p4626_p10 = pnand %p4625_p9, %p43_p1  ;;  %s193_s13 = sshll.u32 %s4852_s12, 4  ;;  %s194_s13 = int_to_ptr.vmem [resolvable:$true] %s193_s13 }
  0x13   : > { %s174_s28 = sshll.u32 %s6027_s1, 4  ;;  %s29_s15 = sadd.s32 1, %s4843_s20  ;;  %s175_s28 = int_to_ptr.hbm [resolvable:$true] %s174_s28 }
  0x14   : > { %4628 = dma.hbm_to_vmem [thread:$0]  (!%p4626_p10), %s175_s28, 9216, %s177_s6, [#allocation7], %s6022_s10, %s6022_s10, %s6023_s11  }
  0x15   : > { %4631 = dma.hbm_to_vmem [thread:$0]  (!%p4626_p10), %s192_s9, 9216, %s194_s13, [#allocation7], %s6022_s10, %s6022_s10, %s6023_s11  }
  0x16   : > { %s26_s16 = ssub.s32 %s4847_s21, %s4948_s14  ;;  %p36_p12 = scmp.ne.s32.totalorder %s4843_s20, %s4839_s19 }
  0x17   : > { %p27_p13 = scmp.eq.s32.totalorder %s26_s16, 0  ;;  %p37_p0 = scmp.eq.s32.totalorder %s4847_s21, 0 }
  0x18   : > { %p4958_p3 = por %p150_p2, %p36_p12  ;;  %p4642_p5 = scmp.lt.s32.totalorder %s4847_s21, 2 }
  0x19   : > { %s4964_s23 = scalar_select %p27_p13, %s4843_s20, %s29_s15  }
  0x1a   : > { %p38_p7 = por %p37_p0, %p36_p12  ;;  %s210_s26 = sand.u32 1, %s4843_s20  }
  0x1b   : > { %s4608_s27 = smul.u32 52, %s210_s26  ;;  %s211_s15 = scalar_lea.sflag [#allocation4], %s210_s26 }
  0x1c   : > { %s4609_s28 = smul.u32 52, %s4847_s21  ;;  %p4968_p9 = pnand %p4642_p5, %p38_p7 }
  0x1d   : > { %s214_s9 = scalar_lea.vmem [#allocation3], %s4608_s27  ;;  %s4754_s6 = scalar_lea.hbm %s6016_s0, 104 }
  0x1e   : > { %s219_s8 = scalar_lea.hbm %s6016_s0, %s4609_s28  ;;  %s222_s12 = sshll.u32 %s214_s9, 4  ;;  %s223_s12 = int_to_ptr.vmem [resolvable:$true] %s222_s12 }
  0x1f   : > { %s220_s13 = sshll.u32 %s219_s8, 4  ;;  %p4751_p10 = pneg %p4968_p9  ;;  %s221_s13 = int_to_ptr.hbm [resolvable:$true] %s220_s13 }
  0x20   : > { %s4747_s16 = sshra.s32 %s221_s13, 4  ;;  %s4748_s16 = int_to_ptr.hbm [resolvable:$true] %s4747_s16 }
  0x21   : > { %s4749_s10 = scalar_lea.hbm %s4748_s16, 52  ;;  %p4755_p0 = scmp.lt.s32.totalorder %s4748_s16, %s6016_s0 }
  0x22   : > { %p4750_p2 = scmp.ne.s32.totalorder %s4748_s16, %s4749_s10  ;;  %p4756_p5 = scmp.lt.s32.totalorder %s4754_s6, %s4749_s10 }
  0x24   : > { %p4752_p12 = pnand %p4751_p10, %p4750_p2  ;;  %p4757_p7 = por %p4756_p5, %p4755_p0 }
  0x26   : > { %p4753_p13 = pneg %p4752_p12 }
  0x28   : > { %p4758_p11 = pnand %p4757_p7, %p4753_p13 }
  0x2a   : > { %4761 = shalt.err (!%p4758_p11)
}
  0x2b   : > { %s6031_s26 = smov 4   ;;  %s6032_s27 = smov 64  }
  0x2c   : > { %4635 = dma.hbm_to_vmem [thread:$0]  (!%p4968_p9), %s221_s13, 832, %s223_s12, %s211_s15, %s6032_s27, %s6032_s27, %s6031_s26  }
  0x2d   : > { %234 = sbr.rel (%p4929_p8) target bundleno = 764 (0x2fc), region = 40  ;;  %s4991_s1 = sand.u32 (!%p4929_p8), 1, %s4839_s19  }
  0x2e   : > { %s4610_s11 = smul.u32 (!%p4929_p8), 52, %s4991_s1  ;;  %s237_s10 = scalar_lea.sflag (!%p4929_p8), [#allocation4], %s4991_s1 }
  0x30   : > { %s4995_s8 = scalar_lea.vmem (!%p4929_p8), [#allocation3], %s4610_s11 }
  0x32   : > { %4822 = dma.done.wait (%p4916_p4), %s237_s10, 832  }
  0x33   : > { %4824 = vsyncadd (%p4916_p4), %s237_s10, 4294966464 }
  0x34   : > { %4826 = dma.done.wait (%p43_p1), [#allocation7], 18432  }
  0x35   : > { %4828 = vsyncadd (%p43_p1), [#allocation7], 4294948864  ;;  %v4400_v0 = vld [vmem:[#allocation6 + $0x78] sm:$0xff]  ;;  %v4399_v2 = vld [vmem:[#allocation6 + $0x70] sm:$0xff]  ;;  %vm351_vm0 = vsmask.f32 7424 }
  0x36   : > { %v4392_v1 = vld [vmem:[#allocation6 + $0x38] sm:$0xff]  ;;  %4592 = vmatpush.bf16.msra.mxu2 %v4400_v0  ;;  %v4391_v3 = vld [vmem:[#allocation6 + $0x30] sm:$0xff]  ;;  %449 = vmatpush.bf16.msra.mxu0 %v4400_v0  ;;  %v4398_v4 = vld [vmem:[#allocation6 + $0x68] sm:$0xff]  ;;  %vm885_vm1 = vsmask.f32 6400  ;;  %vm1057_vm2 = vcmask 1045504  }
  0x37   : > { %4600 = vmatpush.bf16.msra.mxu3 %v4392_v1  ;;  %536 = vmatpush.bf16.msra.mxu1 %v4392_v1  ;;  %v4390_v5 = vld [vmem:[#allocation6 + $0x28] sm:$0xff]  ;;  %v4397_v6 = vld [vmem:[#allocation6 + $0x60] sm:$0xff]  ;;  %v4396_v8 = vld [vmem:[#allocation6 + $0x58] sm:$0xff]  ;;  %vm591_vm3 = vcmask 1046528   ;;  %vm1523_vm4 = vcmask 1044480   ;;  %vm2058_vm10 = vcmask 1041408  }
  0x38   : > { %v4389_v7 = vld [vmem:[#allocation6 + $0x20] sm:$0xff]  ;;  %v4388_v9 = vld [vmem:[#allocation6 + $0x18] sm:$0xff]  ;;  %v4395_v11 = vld [vmem:[#allocation6 + $0x50] sm:$0xff]  ;;  %vm1351_vm5 = vsmask.f32 5376  ;;  %vm2064_vm14 = vcmask 1043457  }
  0x39   : > { %v5006_v10 = vld [vmem:[%s4995_s8 + $0x10] sm:$0xff]  ;;  %v4387_v12 = vld [vmem:[#allocation6 + $0x10] sm:$0xff]  ;;  %vm2059_vm11 = vsmask.f32 1280  ;;  %vm2065_vm15 = vsmask.f32 7942 }
  0x3a   : > { %4593 = vmatpush.bf16.msra.mxu2 %v4399_v2  ;;  %450 = vmatpush.bf16.msra.mxu0 %v4399_v2  ;;  %v5009_v13 = vld [vmem:[%s4995_s8 + $0x18] sm:$0xff]  ;;  %v368_v14 = vshll.u32 %v5006_v10, 16  ;;  %v4550_v15 = vld [vmem:[%s4995_s8] sm:$0xff]   ;;  %v5014_v16 = vld [vmem:[%s4995_s8 + $0x8] sm:$0xff]  ;;  %v372_v21 = vshrl.u32 %v5006_v10, 16  ;;  %s4611_s12 = smul.u32 40, %s4991_s1 }
  0x3b   : > { %4601 = vmatpush.bf16.msra.mxu3 %v4391_v3  ;;  %537 = vmatpush.bf16.msra.mxu1 %v4391_v3  ;;  %v355_v17 = vshll.u32 %v4550_v15, 16  ;;  %v4394_v18 = vld [vmem:[#allocation6 + $0x48] sm:$0xff]  ;;  %v376_v22 = vshll.u32 %v5009_v13, 16  ;;  %v353_v23 = vshrl.u32 %v4550_v15, 16  ;;  %v360_v25 = vshll.u32 %v5014_v16, 16  ;;  %v4393_v26 = vld [vmem:[#allocation6 + $0x40] sm:$0xff]  ;;  %vm5267_vm13 = vmand %vm2058_vm10, %vm2059_vm11 }
  0x3c   : > { %v4386_v19 = vld [vmem:[#allocation6 + $0x8] sm:$0xff]  ;;  %v5016_v20 = vrot.slane %v368_v14, 1  ;;  %v4385_v27 = vld [vmem:[#allocation6] sm:$0xff]  ;;  %v4408_v30 = vld [vmem:[#allocation6 + $0xb8] sm:$0xff]  ;;  %v380_v45 = vshrl.u32 %v5009_v13, 16  ;;  %v364_v51 = vshrl.u32 %v5014_v16, 16 }
  0x3d   : > { %v357_v24 = vrot.slane %v355_v17, 1  ;;  %v378_v29 = vrot.slane %v376_v22, 1  ;;  %v4420_v31 = vld [vmem:[#allocation6 + $0xf8] sm:$0xff]  ;;  %v362_v33 = vrot.slane %v360_v25, 1  ;;  %v4407_v37 = vld [vmem:[#allocation6 + $0xb0] sm:$0xff]  ;;  %v4406_v43 = vld [vmem:[#allocation6 + $0xa8] sm:$0xff] }
  0x3e   : > { %4594 = vmatpush.bf16.msra.mxu2 %v4398_v4  ;;  %451 = vmatpush.bf16.msra.mxu0 %v4398_v4  ;;  %v374_v28 = vor.u32 %v372_v21, %v5016_v20  ;;  %v4428_v35 = vld [vmem:[#allocation6 + $0x138] sm:$0xff]  ;;  %v4419_v38 = vld [vmem:[#allocation6 + $0xf0] sm:$0xff]  ;;  %v4418_v44 = vld [vmem:[#allocation6 + $0xe8] sm:$0xff]  ;;  %s5963_s13 = scalar_lea.vmem [#allocation9], %s4611_s12  ;;  %s4612_s15 = smul.u32 40, %s4907_s22 }
  0x3f   : > { %4602 = vmatpush.bf16.msra.mxu3 %v4390_v5  ;;  %538 = vmatpush.bf16.msra.mxu1 %v4390_v5  ;;  %v358_v32 = vor.u32 %v357_v24, %v353_v23  ;;  %v4436_v36 = vld [vmem:[#allocation6 + $0x178] sm:$0xff]  ;;  %v4427_v41 = vld [vmem:[#allocation6 + $0x130] sm:$0xff]  ;;  %v4426_v47 = vld [vmem:[#allocation6 + $0x128] sm:$0xff]  ;;  %v382_v54 = vor.u32 %v380_v45, %v378_v29  ;;  %v366_v63 = vor.u32 %v364_v51, %v362_v33  ;;  %s3602_s28 = sshll.u32 %s5963_s13, 4  ;;  %s3590_s27 = scalar_lea.sflag [#allocation5], %s4991_s1  ;;  %s3603_s28 = int_to_ptr.vmem [resolvable:$true] %s3602_s28 }
  0x40   : > { %v379_v34 = vsel %vm351_vm0, %v374_v28, %v378_v29  ;;  %v5026_v40 = vld [vmem:[%s4995_s8 + $0x20] sm:$0xff]  ;;  %v4405_v49 = vld [vmem:[#allocation6 + $0xa0] sm:$0xff]  ;;  %s3601_s7 = scalar_lea.hbm %s6021_s5, %s4612_s15  ;;  %s4797_s24 = scalar_lea.hbm %s6021_s5, 80 }
  0x41   : > { %v363_v39 = vsel %vm351_vm0, %v358_v32, %v362_v33  ;;  %v4435_v42 = vld [vmem:[#allocation6 + $0x170] sm:$0xff]  ;;  %v384_v46 = vshll.u32 %v5026_v40, 16  ;;  %v4434_v48 = vld [vmem:[#allocation6 + $0x168] sm:$0xff]  ;;  %v4417_v50 = vld [vmem:[#allocation6 + $0xe0] sm:$0xff]  ;;  %v388_v23 = vshrl.u32 %v5026_v40, 16  ;;  %s3604_s26 = sshll.u32 %s3601_s7, 4  ;;  %s3605_s26 = int_to_ptr.hbm [resolvable:$true] %s3604_s26 }
  0x42   : > { %4595 = vmatpush.bf16.msra.mxu2 %v4397_v6  ;;  %452 = vmatpush.bf16.msra.mxu0 %v4397_v6  ;;  %v700_v52 = vld [vmem:[%s4995_s8 + $0x4] sm:$0xe]  ;;  %v5033_v53 = vld [vmem:[%s4995_s8 + $0x8] sm:$0xff]   ;;  %v4402_v14 = vld [vmem:[#allocation6 + $0x88] sm:$0xff]  ;;  %s4791_s22 = sshra.s32 %s3605_s26, 4  ;;  %s4792_s22 = int_to_ptr.hbm [resolvable:$true] %s4791_s22 }
  0x43   : > { %4603 = vmatpush.bf16.msra.mxu3 %v4389_v7  ;;  %539 = vmatpush.bf16.msra.mxu1 %v4389_v7  ;;  %v386_v55 = vrot.slane %v384_v46, 1  ;;  %v4425_v56 = vld [vmem:[#allocation6 + $0x120] sm:$0xff]  ;;  %v4404_v58 = vld [vmem:[#allocation6 + $0x98] sm:$0xff]  ;;  %v739_v61 = vunpack.c.l.b16 %v700_v52  ;;  %v740_v62 = vunpack.c.l.b16 %v5033_v53  ;;  %v4403_v4 = vld [vmem:[#allocation6 + $0x90] sm:$0xff]  ;;  %v371_v7 = vsel %vm351_vm0, %v366_v63, %v5016_v20  ;;  %s4793_s11 = scalar_lea.hbm %s4792_s22, 40  ;;  %p4798_p11 = scmp.lt.s32.totalorder %s4792_s22, %s6021_s5 }
  0x44   : > { %v4433_v57 = vld [vmem:[#allocation6 + $0x160] sm:$0xff]  ;;  %v4416_v59 = vld [vmem:[#allocation6 + $0xd8] sm:$0xff]  ;;  %v4415_v5 = vld [vmem:[#allocation6 + $0xd0] sm:$0xff]  ;;  %v595_v52 = vrot.slane %v5006_v10, 1  ;;  %p4794_p1 = scmp.ne.s32.totalorder %s4792_s22, %s4793_s11  ;;  %p4799_p9 = scmp.lt.s32.totalorder %s4797_s24, %s4793_s11 }
  0x45   : > { %v305_v60 = vld [vmem:[%s4995_s8 + $0x28] sm:$0x1]  ;;  %v387_v0 = vsel %vm351_vm0, %v382_v54, %v386_v55  ;;  %v4424_v2 = vld [vmem:[#allocation6 + $0x118] sm:$0xff]  ;;  %v5038_v6 = vpack.c.b16 %v740_v62, %v739_v61  ;;  %v4422_v25 = vld [vmem:[#allocation6 + $0x108] sm:$0xff] }
  0x46   : > { %4596 = vmatpush.bf16.msra.mxu2 %v4396_v8  ;;  %453 = vmatpush.bf16.msra.mxu0 %v4396_v8  ;;  %v344_v1 = vunpack.c.l.b16 %v305_v60  ;;  %v4432_v3 = vld [vmem:[#allocation6 + $0x158] sm:$0xff]  ;;  %v4413_v28 = vld [vmem:[#allocation6 + $0xc0] sm:$0xff]  ;;  %v4446_v54 = vld [vmem:[#allocation6 + $0x1a8] sm:$0xff]  ;;  %p4795_p4 = pnand %p4794_p1, %p4958_p3  ;;  %p4800_p2 = por %p4799_p9, %p4798_p11 }
  0x47   : > { %4604 = vmatpush.bf16.msra.mxu3 %v4388_v9  ;;  %540 = vmatpush.bf16.msra.mxu1 %v4388_v9  ;;  %v5044_v8 = vld [vmem:[%s4995_s8 + $0xc] sm:$0xff]  ;;  %v1036_v17 = vld [vmem:[%s4995_s8 + $0x4] sm:$0xc] }
  0x48   : > { %v5046_v9 = vpack.c.b16 %v344_v1, %v344_v1  ;;  %v895_v20 = vshrl.u32 %v5044_v8, 16  ;;  %v898_v21 = vshll.u32 %v5044_v8, 16  ;;  %v1055_v22 = vunpack.c.l.b16 %v1036_v17  ;;  %v4448_v29 = vld [vmem:[#allocation6 + $0x1b8] sm:$0xff]  ;;  %v4462_v60 = vld [vmem:[#allocation6 + $0x228] sm:$0xff]  ;;  %v4445_v63 = vld [vmem:[#allocation6 + $0x1a0] sm:$0xff]  ;;  %p4796_p8 = pneg %p4795_p4 }
  0x49   : > { %v5082_v17 = vld [vmem:[%s4995_s8 + $0x1c] sm:$0xff] }
  0x4a   : > { %4597 = vmatpush.bf16.msra.mxu2 %v4395_v11  ;;  %454 = vmatpush.bf16.msra.mxu0 %v4395_v11  ;;  %v4423_v11 = vld [vmem:[#allocation6 + $0x110] sm:$0xff]  ;;  %v392_v24 = vshll.u32 %v5046_v9, 16  ;;  %v897_v33 = vrot.slane %v895_v20, 1  ;;  %v4444_v20 = vld [vmem:[#allocation6 + $0x198] sm:$0xff]  ;;  %p4801_p10 = pnand %p4800_p2, %p4796_p8 }
  0x4b   : > { %4605 = vmatpush.bf16.msra.mxu3 %v4387_v12  ;;  %541 = vmatpush.bf16.msra.mxu1 %v4387_v12  ;;  %v4431_v12 = vld [vmem:[#allocation6 + $0x150] sm:$0xff] }
  0x4e   : > { %4598 = vmatpush.bf16.msra.mxu2 %v4394_v18  ;;  %455 = vmatpush.bf16.msra.mxu0 %v4394_v18  ;;  %v887_v18 = vshrl.u32 %v5038_v6, 16 }
  0x4f   : > { %4606 = vmatpush.bf16.msra.mxu3 %v4386_v19  ;;  %542 = vmatpush.bf16.msra.mxu1 %v4386_v19  ;;  %v890_v19 = vshll.u32 %v5038_v6, 16 }
  0x51   : > { %v892_v32 = vrot.slane %v890_v19, 2 }
  0x52   : > { %4599 = vmatpush.bf16.msra.mxu2 %v4393_v26  ;;  %456 = vmatpush.bf16.msra.mxu0 %v4393_v26  ;;  %v4430_v26 = vld [vmem:[#allocation6 + $0x148] sm:$0xff] }
  0x53   : > { %4607 = vmatpush.bf16.msra.mxu3 %v4385_v27  ;;  %543 = vmatpush.bf16.msra.mxu1 %v4385_v27  ;;  %v4401_v27 = vld [vmem:[#allocation6 + $0x80] sm:$0xff] }
  0x55   : > { %467 = vmatmul.bf16.vlgmr.msra.gmra.mxu2 %v379_v34  ;;  %457 = vmatmul.bf16.vlgmr.msra.gmra.mxu0 %v363_v39  ;;  %v900_v34 = vrot.slane %v898_v21, 2  ;;  %v4429_v39 = vld [vmem:[#allocation6 + $0x140] sm:$0xff]  ;;  %v913_v21 = vshrl.u32 %v5082_v17, 16 }
  0x56   : > { %656 = vmatpush.bf16.msrb.mxu2 %v4408_v30  ;;  %554 = vmatmul.bf16.vlgmr.msra.gmra.mxu3 %v5006_v10  ;;  %v889_v30 = vrot.slane %v887_v18, 1 }
  0x57   : > { %820 = vmatpush.bf16.msrb.mxu3 %v4420_v31  ;;  %992 = vmatpush.bf16.msrb.mxu0 %v4428_v35  ;;  %v4456_v31 = vld [vmem:[#allocation6 + $0x1f8] sm:$0xff]  ;;  %v1056_v35 = vpack.c.b16 %v740_v62, %v1055_v22  ;;  %v901_v45 = vor.u32 %v900_v34, %v897_v33  ;;  %v916_v22 = vshll.u32 %v5082_v17, 16  ;;  %v4443_v33 = vld [vmem:[#allocation6 + $0x190] sm:$0xff] }
  0x58   : > { %1122 = vmatpush.bf16.msrb.mxu1 %v4436_v36  ;;  %v390_v36 = vor.u32 %v388_v23, %v386_v55  ;;  %v4463_v55 = vld [vmem:[#allocation6 + $0x230] sm:$0xff]  ;;  %v915_v23 = vrot.slane %v913_v21, 1  ;;  %v4460_v34 = vld [vmem:[#allocation6 + $0x218] sm:$0xff] }
  0x59   : > { %544 = vmatmul.bf16.vlgmr.msra.gmra.mxu1 %v4550_v15  ;;  %v4414_v15 = vld [vmem:[#allocation6 + $0xc8] sm:$0xff]  ;;  %v1058_v46 = vrot.slane %v1056_v35, 2  ;;  %v4451_v35 = vld [vmem:[#allocation6 + $0x1d0] sm:$0xff] }
  0x5a   : > { %657 = vmatpush.bf16.msrb.mxu2 %v4407_v37  ;;  %v394_v37 = vrot.slane %v392_v24, 1  ;;  %v918_v24 = vrot.slane %v916_v22, 2 }
  0x5b   : > { %821 = vmatpush.bf16.msrb.mxu3 %v4419_v38  ;;  %993 = vmatpush.bf16.msrb.mxu0 %v4427_v41  ;;  %v4421_v38 = vld [vmem:[#allocation6 + $0x100] sm:$0xff]  ;;  %v4464_v41 = vld [vmem:[#allocation6 + $0x238] sm:$0xff] }
  0x5c   : > { %1123 = vmatpush.bf16.msrb.mxu1 %v4435_v42  ;;  %v4447_v42 = vld [vmem:[#allocation6 + $0x1b0] sm:$0xff] }
  0x5e   : > { %658 = vmatpush.bf16.msrb.mxu2 %v4406_v43  ;;  %v4455_v43 = vld [vmem:[#allocation6 + $0x1f0] sm:$0xff] }
  0x5f   : > { %822 = vmatpush.bf16.msrb.mxu3 %v4418_v44  ;;  %994 = vmatpush.bf16.msrb.mxu0 %v4426_v47  ;;  %v893_v44 = vor.u32 %v892_v32, %v889_v30  ;;  %v1059_v47 = vrot.slane %v5044_v8, 2  ;;  %v5093_v30 = vld [vmem:[%s4995_s8 + $0x24] sm:$0xff] }
  0x60   : > { %1124 = vmatpush.bf16.msrb.mxu1 %v4434_v48  ;;  %v395_v48 = vsel %vm351_vm0, %v390_v36, %v394_v37  ;;  %v4442_v36 = vld [vmem:[#allocation6 + $0x188] sm:$0xff]  ;;  %v4459_v37 = vld [vmem:[#allocation6 + $0x210] sm:$0xff] }
  0x61   : > { %v1060_v51 = vsel %vm1057_vm2, %v1058_v46, %v1059_v47 }
  0x62   : > { %659 = vmatpush.bf16.msrb.mxu2 %v4405_v49  ;;  %v5059_v49 = vld [vmem:[%s4995_s8 + $0x14] sm:$0xff] }
  0x63   : > { %823 = vmatpush.bf16.msrb.mxu3 %v4417_v50  ;;  %995 = vmatpush.bf16.msrb.mxu0 %v4425_v56  ;;  %v902_v50 = vsel %vm885_vm1, %v893_v44, %v901_v45  ;;  %v4454_v56 = vld [vmem:[#allocation6 + $0x1e8] sm:$0xff]  ;;  %v904_v62 = vshrl.u32 %v5059_v49, 16  ;;  %v907_v10 = vshll.u32 %v5059_v49, 16  ;;  %v761_v44 = vrot.slane %v5082_v17, 1 }
  0x64   : > { %1125 = vmatpush.bf16.msrb.mxu1 %v4433_v57  ;;  %v597_v57 = vrot.slane %v5009_v13, 1 }
  0x65   : > { %472 = vmatmul.bf16.gmra.mxu2 %v387_v0  ;;  %462 = vmatmul.bf16.gmra.mxu0 %v371_v7  ;;  %v906_v1 = vrot.slane %v904_v62, 1  ;;  %v757_v7 = vrot.slane %v5044_v8, 1  ;;  %v4452_v8 = vld [vmem:[#allocation6 + $0x1d8] sm:$0xff] }
  0x66   : > { %660 = vmatpush.bf16.msrb.mxu2 %v4404_v58  ;;  %559 = vmatmul.bf16.gmra.mxu3 %v5009_v13  ;;  %v4582_v58 = vld [vmem:[%s4995_s8] sm:$0xf0]  ;;  %v5071_v61 = vsel %vm591_vm3, %v595_v52, %v597_v57  ;;  %v1206_v13 = vunpack.c.h.b16 %v5033_v53 }
  0x67   : > { %824 = vmatpush.bf16.msrb.mxu3 %v4416_v59  ;;  %996 = vmatpush.bf16.msrb.mxu0 %v4424_v2  ;;  %v4583_v59 = vld [vmem:[%s4995_s8] sm:$0xe]  ;;  %v909_v2 = vrot.slane %v907_v10, 2  ;;  %v599_v10 = vrot.slane %v5026_v40, 1 }
  0x68   : > { %1126 = vmatpush.bf16.msrb.mxu1 %v4432_v3  ;;  %v4584_v0 = vor.u32 %v4583_v59, %v4582_v58  ;;  %v4457_v58 = vld [vmem:[#allocation6 + $0x200] sm:$0xff] }
  0x69   : > { %549 = vmatmul.bf16.gmra.mxu1 %v5014_v16 }
  0x6a   : > { %661 = vmatpush.bf16.msrb.mxu2 %v4403_v4  ;;  %v592_v3 = vrot.slane %v4584_v0, 1  ;;  %v593_v4 = vrot.slane %v5014_v16, 1  ;;  %v4453_v16 = vld [vmem:[#allocation6 + $0x1e0] sm:$0xff] }
  0x6b   : > { %825 = vmatpush.bf16.msrb.mxu3 %v4415_v5  ;;  %997 = vmatpush.bf16.msrb.mxu0 %v4423_v11  ;;  %v756_v5 = vrot.slane %v5038_v6, 1  ;;  %v910_v11 = vor.u32 %v909_v2, %v906_v1  ;;  %v4461_v6 = vld [vmem:[#allocation6 + $0x220] sm:$0xff]  ;;  %v600_v2 = vsel %vm591_vm3, %v597_v57, %v599_v10 }
  0x6c   : > { %1127 = vmatpush.bf16.msrb.mxu1 %v4431_v12  ;;  %v1061_v12 = vrot.slane %v5059_v49, 2 }
  0x6d   : > { %v911_v18 = vsel %vm885_vm1, %v901_v45, %v910_v11  ;;  %v864_v45 = vld [vmem:[%s4995_s8 + $0x2c] sm:$0x3] }
  0x6e   : > { %662 = vmatpush.bf16.msrb.mxu2 %v4402_v14  ;;  %v594_v14 = vsel %vm591_vm3, %v592_v3, %v593_v4  ;;  %v1062_v19 = vsel %vm1057_vm2, %v1059_v47, %v1061_v12  ;;  %v1065_v47 = vrot.slane %v5093_v30, 2 }
  0x6f   : > { %826 = vmatpush.bf16.msrb.mxu3 %v4414_v15  ;;  %998 = vmatpush.bf16.msrb.mxu0 %v4422_v25  ;;  %v758_v15 = vsel %vm591_vm3, %v756_v5, %v757_v7  ;;  %v759_v25 = vrot.slane %v5059_v49, 1 }
  0x70   : > { %1128 = vmatpush.bf16.msrb.mxu1 %v4430_v26  ;;  %v919_v26 = vor.u32 %v918_v24, %v915_v23 }
  0x71   : > { %v762_v49 = vsel %vm591_vm3, %v759_v25, %v761_v44 }
  0x72   : > { %663 = vmatpush.bf16.msrb.mxu2 %v4401_v27  ;;  %v1063_v27 = vrot.slane %v5082_v17, 2  ;;  %v601_v17 = vrot.slane %v5046_v9, 1 }
  0x73   : > { %827 = vmatpush.bf16.msrb.mxu3 %v4413_v28  ;;  %999 = vmatpush.bf16.msrb.mxu0 %v4421_v38  ;;  %v596_v28 = vsel %vm591_vm3, %v593_v4, %v595_v52  ;;  %v922_v38 = vshrl.u32 %v5093_v30, 16  ;;  %v710_v4 = vld [vmem:[%s4995_s8 + $0x2c] sm:$0x1] }
  0x74   : > { %1129 = vmatpush.bf16.msrb.mxu1 %v4429_v39  ;;  %v1064_v32 = vsel %vm1057_vm2, %v1061_v12, %v1063_v27  ;;  %v925_v39 = vshll.u32 %v5093_v30, 16 }
  0x75   : > { %477 = vmatmul.bf16.gmra.mxu2 %v395_v48  ;;  %v883_v48 = vunpack.c.l.b16 %v864_v45 }
  0x76   : > { %1286 = vmatpush.bf16.msra.mxu2 %v4448_v29  ;;  %564 = vmatmul.bf16.gmra.mxu3 %v5026_v40  ;;  %v760_v29 = vsel %vm591_vm3, %v757_v7, %v759_v25  ;;  %v749_v40 = vunpack.c.l.b16 %v710_v4 }
  0x77   : > { %1458 = vmatpush.bf16.msra.mxu3 %v4456_v31  ;;  %1588 = vmatpush.bf16.msra.mxu0 %v4464_v41  ;;  %v920_v31 = vsel %vm885_vm1, %v910_v11, %v919_v26  ;;  %v4450_v41 = vld [vmem:[#allocation6 + $0x1c8] sm:$0xff]  ;;  %v884_v52 = vpack.c.b16 %v883_v48, %v883_v48  ;;  %v1502_v11 = vld [vmem:[%s4995_s8 + $0x8] sm:$0x8] }
  0x78   : > { %1000 = vmatmul.bf16.vlgmr.msrb.gmra.mxu0 %v902_v50  ;;  %v1521_v12 = vunpack.c.l.b16 %v1502_v11 }
  0x79   : > { %1130 = vmatmul.bf16.vlgmr.msrb.gmra.mxu1 %v1060_v51  ;;  %v1066_v51 = vsel %vm1057_vm2, %v1063_v27, %v1065_v47  ;;  %v931_v59 = vshrl.u32 %v884_v52, 16  ;;  %v1067_v1 = vrot.slane %v884_v52, 2 }
  0x7a   : > { %1287 = vmatpush.bf16.msra.mxu2 %v4447_v42  ;;  %v924_v42 = vrot.slane %v922_v38, 1  ;;  %v1522_v57 = vpack.c.b16 %v1206_v13, %v1521_v12  ;;  %v4440_v12 = vld [vmem:[%s4995_s8 + $0x28] sm:$0xff] }
  0x7b   : > { %1459 = vmatpush.bf16.msra.mxu3 %v4455_v43  ;;  %1589 = vmatpush.bf16.msra.mxu0 %v4463_v55  ;;  %v927_v43 = vrot.slane %v925_v39, 2  ;;  %v4458_v55 = vld [vmem:[#allocation6 + $0x208] sm:$0xff]  ;;  %v1068_v7 = vsel %vm1057_vm2, %v1065_v47, %v1067_v1 }
  0x7d   : > { %v928_v46 = vor.u32 %v927_v43, %v924_v42 }
  0x7e   : > { %1288 = vmatpush.bf16.msra.mxu2 %v4446_v54  ;;  %v4441_v54 = vld [vmem:[#allocation6 + $0x180] sm:$0xff] }
  0x7f   : > { %1460 = vmatpush.bf16.msra.mxu3 %v4454_v56  ;;  %1590 = vmatpush.bf16.msra.mxu0 %v4462_v60  ;;  %v929_v50 = vsel %vm885_vm1, %v919_v26, %v928_v46  ;;  %v4449_v56 = vld [vmem:[#allocation6 + $0x1c0] sm:$0xff]  ;;  %v934_v60 = vshll.u32 %v884_v52, 16 }
  0x81   : > { %v936_v62 = vrot.slane %v934_v60, 2 }
  0x82   : > { %1289 = vmatpush.bf16.msra.mxu2 %v4445_v63  ;;  %v763_v63 = vrot.slane %v5093_v30, 1 }
  0x83   : > { %1461 = vmatpush.bf16.msra.mxu3 %v4453_v16  ;;  %1591 = vmatpush.bf16.msra.mxu0 %v4461_v6  ;;  %v4437_v16 = vld [vmem:[%s4995_s8 + $0x10] sm:$0xff] }
  0x84   : > { %v764_v3 = vsel %vm591_vm3, %v761_v44, %v763_v63  ;;  %v1525_v6 = vrot.slane %v4437_v16, 3  ;;  %v1361_v25 = vshrl.u32 %v4437_v16, 16  ;;  %v1364_v9 = vshll.u32 %v4437_v16, 16 }
  0x85   : > { %664 = vmatmul.bf16.vlgmr.msrb.gmra.mxu2 %v594_v14  ;;  %v755_v14 = vpack.c.b16 %v749_v40, %v749_v40 }
  0x86   : > { %828 = vmatmul.bf16.vlgmr.msrb.gmra.mxu3 %v758_v15  ;;  %1290 = vmatpush.bf16.msra.mxu2 %v4444_v20  ;;  %v1166_v15 = vld [vmem:[%s4995_s8 + $0x8] sm:$0xc]  ;;  %v1524_v20 = vrot.slane %v1522_v57, 3 }
  0x87   : > { %1462 = vmatpush.bf16.msra.mxu3 %v4452_v8  ;;  %1592 = vmatpush.bf16.msra.mxu0 %v4460_v34  ;;  %v602_v8 = vsel %vm591_vm3, %v599_v10, %v601_v17  ;;  %v4438_v34 = vld [vmem:[%s4995_s8 + $0x18] sm:$0xff] }
  0x88   : > { %1005 = vmatmul.bf16.gmra.mxu0 %v911_v18  ;;  %v765_v18 = vrot.slane %v755_v14, 1  ;;  %v1526_v23 = vsel %vm1523_vm4, %v1524_v20, %v1525_v6  ;;  %v1373_v42 = vshll.u32 %v4438_v34, 16  ;;  %v1391_v20 = vshll.u32 %v4440_v12, 16 }
  0x89   : > { %1135 = vmatmul.bf16.gmra.mxu1 %v1062_v19  ;;  %v1205_v19 = vunpack.c.l.b16 %v1166_v15 }
  0x8a   : > { %1291 = vmatpush.bf16.msra.mxu2 %v4443_v33  ;;  %v766_v21 = vsel %vm591_vm3, %v763_v63, %v765_v18  ;;  %v1375_v47 = vrot.slane %v1373_v42, 3 }
  0x8b   : > { %1463 = vmatpush.bf16.msra.mxu3 %v4451_v35  ;;  %1593 = vmatpush.bf16.msra.mxu0 %v4459_v37  ;;  %v1216_v22 = vpack.c.b16 %v1206_v13, %v1205_v19  ;;  %v1527_v35 = vrot.slane %v4438_v34, 3  ;;  %v1531_v13 = vrot.slane %v4440_v12, 3 }
  0x8d   : > { %v1353_v53 = vshrl.u32 %v1216_v22, 16  ;;  %v1356_v24 = vshll.u32 %v1216_v22, 16  ;;  %v1222_v30 = vrot.slane %v1216_v22, 2  ;;  %v1528_v39 = vsel %vm1523_vm4, %v1525_v6, %v1527_v35 }
  0x8e   : > { %1292 = vmatpush.bf16.msra.mxu2 %v4442_v36 }
  0x8f   : > { %1464 = vmatpush.bf16.msra.mxu3 %v4450_v41  ;;  %1594 = vmatpush.bf16.msra.mxu0 %v4458_v55  ;;  %v1355_v26 = vrot.slane %v1353_v53, 2  ;;  %v1358_v27 = vrot.slane %v1356_v24, 3  ;;  %v1370_v41 = vshrl.u32 %v4438_v34, 16  ;;  %v1393_v24 = vrot.slane %v1391_v20, 3 }
  0x92   : > { %1293 = vmatpush.bf16.msra.mxu2 %v4441_v54 }
  0x93   : > { %1465 = vmatpush.bf16.msra.mxu3 %v4449_v56  ;;  %1595 = vmatpush.bf16.msra.mxu0 %v4457_v58 }
  0x95   : > { %669 = vmatmul.bf16.gmra.mxu2 %v596_v28  ;;  %v1363_v28 = vrot.slane %v1361_v25, 2 }
  0x96   : > { %833 = vmatmul.bf16.gmra.mxu3 %v760_v29  ;;  %v1366_v29 = vrot.slane %v1364_v9, 3 }
  0x98   : > { %1010 = vmatmul.bf16.gmra.mxu0 %v920_v31  ;;  %v1223_v31 = vrot.slane %v4437_v16, 2  ;;  %v1367_v33 = vor.u32 %v1366_v29, %v1363_v28  ;;  %v1388_v16 = vshrl.u32 %v4440_v12, 16 }
  0x99   : > { %1140 = vmatmul.bf16.gmra.mxu1 %v1064_v32  ;;  %v1359_v32 = vor.u32 %v1358_v27, %v1355_v26  ;;  %v1229_v26 = vrot.slane %v4440_v12, 2 }
  0x9a   : > { %v1224_v36 = vsel %vm1057_vm2, %v1222_v30, %v1223_v31  ;;  %v1390_v53 = vrot.slane %v1388_v16, 2 }
  0x9b   : > { %v1368_v37 = vsel %vm1351_vm5, %v1359_v32, %v1367_v33 }
  0x9c   : > { %v1394_v27 = vor.u32 %v1393_v24, %v1390_v53 }
  0xa5   : > { %674 = vmatmul.bf16.gmra.mxu2 %v5071_v61  ;;  %v933_v61 = vrot.slane %v931_v59, 1 }
  0xa6   : > { %838 = vmatmul.bf16.gmra.mxu3 %v762_v49  ;;  %v1225_v49 = vrot.slane %v4438_v34, 2 }
  0xa7   : > { %v937_v0 = vor.u32 %v936_v62, %v933_v61 }
  0xa8   : > { %1015 = vmatmul.bf16.gmra.mxu0 %v929_v50  ;;  %v1226_v58 = vsel %vm1057_vm2, %v1223_v31, %v1225_v49 }
  0xa9   : > { %1145 = vmatmul.bf16.gmra.mxu1 %v1066_v51  ;;  %v938_v5 = vsel %vm885_vm1, %v928_v46, %v937_v0  ;;  %v1372_v46 = vrot.slane %v1370_v41, 2  ;;  %v4439_v51 = vld [vmem:[%s4995_s8 + $0x20] sm:$0xff] }
  0xaa   : > { %v1529_v56 = vrot.slane %v4439_v51, 3  ;;  %v1379_v10 = vshrl.u32 %v4439_v51, 16  ;;  %v1382_v63 = vshll.u32 %v4439_v51, 16 }
  0xab   : > { %v1376_v50 = vor.u32 %v1375_v47, %v1372_v46 }
  0xac   : > { %v1530_v62 = vsel %vm1523_vm4, %v1527_v35, %v1529_v56  ;;  %v1384_v4 = vrot.slane %v1382_v63, 3  ;;  %v1532_v19 = vsel %vm1523_vm4, %v1529_v56, %v1531_v13  ;;  %v1176_v35 = vld [vmem:[%s4995_s8 + $0x30] sm:$0x3] }
  0xad   : > { %v1377_v59 = vsel %vm1351_vm5, %v1367_v33, %v1376_v50 }
  0xb5   : > { %679 = vmatmul.bf16.gmra.mxu2 %v600_v2 }
  0xb6   : > { %843 = vmatmul.bf16.gmra.mxu3 %v764_v3  ;;  %v1381_v3 = vrot.slane %v1379_v10, 2 }
  0xb8   : > { %1020 = vmatmul.bf16.gmra.mxu0 %v938_v5  ;;  %v1385_v40 = vor.u32 %v1384_v4, %v1381_v3 }
  0xb9   : > { %1150 = vmatmul.bf16.gmra.mxu1 %v1068_v7  ;;  %v1227_v7 = vrot.slane %v4439_v51, 2 }
  0xba   : > { %v1386_v17 = vsel %vm1351_vm5, %v1376_v50, %v1385_v40  ;;  %v1395_v33 = vsel %vm1351_vm5, %v1385_v40, %v1394_v27 }
  0xbb   : > { %v1228_v57 = vsel %vm1057_vm2, %v1225_v49, %v1227_v7  ;;  %v1230_v32 = vsel %vm1057_vm2, %v1227_v7, %v1229_v26 }
  0xc5   : > { %684 = vmatmul.bf16.gmra.mxu2 %v602_v8 }
  0xc6   : > { %848 = vmatmul.bf16.gmra.mxu3 %v766_v21  ;;  %v1330_v21 = vld [vmem:[%s4995_s8 + $0x30] sm:$0x7] }
  0xc7   : > { %v1349_v25 = vunpack.c.l.b16 %v1330_v21 }
  0xc8   : > { %1596 = vmatmul.bf16.vlgmr.msra.gmra.mxu0 %v1526_v23 }
  0xc9   : > { %v1350_v28 = vpack.c.b16 %v1349_v25, %v1349_v25 }
  0xcb   : > { %v1533_v31 = vrot.slane %v1350_v28, 3  ;;  %v1397_v41 = vshrl.u32 %v1350_v28, 16  ;;  %v1400_v42 = vshll.u32 %v1350_v28, 16 }
  0xcd   : > { %v1399_v50 = vrot.slane %v1397_v41, 2  ;;  %v1402_v51 = vrot.slane %v1400_v42, 3 }
  0xd2   : > { %v5126_v38 = vpop.f32.mrf.mxu0 }
  0xd5   : > { %1294 = vmatmul.bf16.vlgmr.msra.gmra.mxu2 %v1224_v36 }
  0xd6   : > { %1466 = vmatmul.bf16.vlgmr.msra.gmra.mxu3 %v1368_v37  ;;  %v545_v60 = vpop.f32.mrf.mxu1  ;;  %v1534_v37 = vsel %vm1523_vm4, %v1531_v13, %v1533_v31  ;;  %v4484_v13 = vld [vmem:[#allocation8 + $0x78] sm:$0xff] }
  0xd7   : > { %2367 = vmatpush.bf16.msra.mxu1 %v4484_v13 }
  0xd8   : > { %v468_v43 = vpop.f32.mrf.mxu2  ;;  %1601 = vmatmul.bf16.gmra.mxu0 %v1528_v39  ;;  %v1215_v39 = vunpack.c.l.b16 %v1176_v35 }
  0xd9   : > { %v555_v44 = vpop.f32.mrf.mxu3 }
  0xda   : > { %v5129_v45 = vadd.f32 %v555_v44, %v468_v43  ;;  %v5131_v48 = vpop.f32.mrf.mxu0  ;;  %v546_v43 = vadd.f32 %v545_v60, %v5126_v38  ;;  %v1221_v49 = vpack.c.b16 %v1215_v39, %v1215_v39 }
  0xde   : > { %v5145_v11 = vpop.f32.mrf.mxu1 }
  0xe0   : > { %v470_v52 = vpop.f32.mrf.mxu2 }
  0xe1   : > { %v557_v54 = vpop.f32.mrf.mxu3 }
  0xe2   : > { %v5134_v55 = vadd.f32 %v557_v54, %v470_v52  ;;  %v5138_v61 = vpop.f32.mrf.mxu0 }
  0xe5   : > { %1299 = vmatmul.bf16.gmra.mxu2 %v1226_v58 }
  0xe6   : > { %1471 = vmatmul.bf16.gmra.mxu3 %v1377_v59  ;;  %v550_v22 = vpop.f32.mrf.mxu1  ;;  %v1231_v59 = vrot.slane %v1221_v49, 2 }
  0xe7   : > { %v551_v3 = vadd.f32 %v550_v22, %v5138_v61  ;;  %v4483_v61 = vld [vmem:[#allocation8 + $0x70] sm:$0xff] }
  0xe8   : > { %v473_v0 = vpop.f32.mrf.mxu2  ;;  %1606 = vmatmul.bf16.gmra.mxu0 %v1530_v62  ;;  %v1403_v62 = vor.u32 %v1402_v51, %v1399_v50  ;;  %v1232_v38 = vsel %vm1057_vm2, %v1229_v26, %v1231_v59  ;;  %2368 = vmatpush.bf16.msra.mxu1 %v4483_v61  ;;  %v4482_v51 = vld [vmem:[#allocation8 + $0x68] sm:$0xff] }
  0xe9   : > { %v560_v1 = vpop.f32.mrf.mxu3 }
  0xea   : > { %v5141_v2 = vadd.f32 %v560_v1, %v473_v0  ;;  %v5143_v5 = vpop.f32.mrf.mxu0  ;;  %v1404_v60 = vsel %vm1351_vm5, %v1394_v27, %v1403_v62 }
  0xec   : > { %2369 = vmatpush.bf16.msra.mxu1 %v4482_v51 }
  0xee   : > { %v5166_v34 = vpop.f32.mrf.mxu1 }
  0xf0   : > { %v5148_v14 = vpop.f32.mrf.mxu2 }
  0xf1   : > { %v5150_v15 = vpop.f32.mrf.mxu3 }
  0xf5   : > { %1304 = vmatmul.bf16.gmra.mxu2 %v1228_v57  ;;  %v1001_v18 = vpop.f32.mrf.mxu0 }
  0xf6   : > { %1476 = vmatmul.bf16.gmra.mxu3 %v1386_v17  ;;  %v5171_v54 = vpop.f32.mrf.mxu1 }
  0xf8   : > { %v478_v6 = vpop.f32.mrf.mxu2  ;;  %1611 = vmatmul.bf16.gmra.mxu0 %v1532_v19 }
  0xf9   : > { %v565_v8 = vpop.f32.mrf.mxu3 }
  0xfa   : > { %v5156_v23 = vadd.f32 %v565_v8, %v478_v6  ;;  %v1656_v6 = vlaneseq }
  0xfc   : > { %v5198_v8 = vshrl.u32 %v1656_v6, 7 }
  0xfd   : > { %v5158_v9 = vpop.f32.mrf.mxu0 }
  0xfe   : > { %v5183_v0 = vpop.f32.mrf.mxu1  ;;  %v1670_v25 = vand.u32 65535, %v5198_v8  ;;  %v1671_v27 = vshrl.u32 %v5198_v8, 16 }
 0x100   : > { %v5160_v29 = vpop.f32.mrf.mxu2  ;;  %v1674_v28 = vmul.u32 52428, %v1670_v25  ;;  %v1675_v35 = vmul.u32 52429, %v1671_v27 }
 0x101   : > { %v5162_v30 = vpop.f32.mrf.mxu3 }
 0x102   : > { %v1679_v39 = vshll.u32 %v1675_v35, 16 }
 0x105   : > { %1309 = vmatmul.bf16.gmra.mxu2 %v1230_v32  ;;  %v1006_v36 = vpop.f32.mrf.mxu0 }
 0x106   : > { %1481 = vmatmul.bf16.gmra.mxu3 %v1395_v33  ;;  %v1673_v33 = vmul.u32 52429, %v1670_v25 }
 0x108   : > { %v665_v44 = vpop.f32.mrf.mxu2  ;;  %1616 = vmatmul.bf16.gmra.mxu0 %v1534_v37  ;;  %v1676_v37 = vmul.u32 52428, %v1671_v27  ;;  %v4475_v27 = vld [vmem:[#allocation8 + $0x30] sm:$0xff] }
 0x109   : > { %v829_v46 = vpop.f32.mrf.mxu3  ;;  %v690_v47 = vadd.f32 %v665_v44, %v546_v43  ;;  %v5214_v43 = vadd.s32 8, %v5198_v8  ;;  %v4853_v44 = vmov 0  }
 0x10a   : > { %2057 = vst [vmem:[#allocation2] sm:$0xf] %v4853_v44 }
 0x10b   : > { %v854_v52 = vadd.f32 %v829_v46, %v690_v47  ;;  %2070 = vst [vmem:[#allocation2 + $0x30] sm:$0xf] %v4853_v44  ;;  %v1699_v49 = vand.u32 65535, %v5214_v43  ;;  %v1700_v62 = vshrl.u32 %v5214_v43, 16 }
 0x10d   : > { %v5173_v56 = vadd.f32 %v1001_v18, %v854_v52  ;;  %v5175_v58 = vpop.f32.mrf.mxu0  ;;  %v5190_v18 = vpop.f32.mrf.mxu1  ;;  %v1678_v52 = vshrl.u32 %v1674_v28, 16 }
 0x110   : > { %v5177_v10 = vpop.f32.mrf.mxu2 }
 0x111   : > { %v5179_v63 = vpop.f32.mrf.mxu3 }
 0x115   : > { %1314 = vmatmul.bf16.gmra.mxu2 %v1232_v38  ;;  %v1011_v1 = vpop.f32.mrf.mxu0  ;;  %v5200_v53 = vpop.f32.mrf.mxu1  ;;  %v548_v38 = vadd.f32 %v5145_v11, %v5131_v48  ;;  %v553_v48 = vadd.f32 %v5166_v34, %v5143_v5 }
 0x116   : > { %1486 = vmatmul.bf16.gmra.mxu3 %v1404_v60  ;;  %v4476_v60 = vld [vmem:[#allocation8 + $0x38] sm:$0xff] }
 0x117   : > { %v691_v13 = vadd.f32 %v5177_v10, %v548_v38  ;;  %2454 = vmatpush.bf16.msrb.mxu2 %v4476_v60 }
 0x118   : > { %v670_v4 = vpop.f32.mrf.mxu2 }
 0x119   : > { %v834_v7 = vpop.f32.mrf.mxu3  ;;  %v692_v40 = vadd.f32 %v670_v4, %v551_v3  ;;  %v1703_v3 = vmul.u32 52428, %v1699_v49 }
 0x11b   : > { %v856_v12 = vadd.f32 %v834_v7, %v692_v40  ;;  %v1680_v7 = vshrl.u32 %v1675_v35, 16  ;;  %v1702_v40 = vmul.u32 52429, %v1699_v49  ;;  %v1706_v61 = vshll.u32 %v1703_v3, 16  ;;  %2455 = vmatpush.bf16.msrb.mxu2 %v4475_v27  ;;  %v4474_v49 = vld [vmem:[#allocation8 + $0x28] sm:$0xff] }
 0x11c   : > { %v1707_v34 = vshrl.u32 %v1703_v3, 16 }
 0x11d   : > { %v5186_v57 = vadd.f32 %v1006_v36, %v856_v12  ;;  %v5188_v17 = vpop.f32.mrf.mxu0  ;;  %v1677_v36 = vshll.u32 %v1674_v28, 16  ;;  %v5220_v50 = vpop.f32.mrf.mxu1  ;;  %v1704_v12 = vmul.u32 52429, %v1700_v62  ;;  %vm1710_vm8 = vc.u32 %v1702_v40, %v1706_v61 }
 0x11e   : > { %v1712_v28 = vadd.s32 %v1706_v61, %v1702_v40  ;;  %v1711_v10 = vsel %vm1710_vm8, 1, %v4853_v44 }
 0x11f   : > { %vm1681_vm6 = vc.u32 %v1673_v33, %v1677_v36  ;;  %v1683_v42 = vadd.s32 %v1677_v36, %v1673_v33  ;;  %v855_v36 = vadd.f32 %v5179_v63, %v691_v13  ;;  %2456 = vmatpush.bf16.msrb.mxu2 %v4474_v49 }
 0x120   : > { %v5192_v19 = vpop.f32.mrf.mxu2  ;;  %v1682_v46 = vsel %vm1681_vm6, 1, %v4853_v44  ;;  %vm5293_vm6 = vmand %vm2064_vm14, %vm2065_vm15 }
 0x121   : > { %v5194_v16 = vpop.f32.mrf.mxu3  ;;  %v1684_v47 = vadd.s32 %v1682_v46, %v1676_v37  ;;  %vm1685_vm7 = vc.u32 %v1683_v42, %v1679_v39  ;;  %v693_v37 = vadd.f32 %v5192_v19, %v553_v48  ;;  %v1027_v3 = vadd.f32 %v5158_v9, %v855_v36  ;;  %v2061_v9 = vld [vmem:[#allocation2 + $0x4] sm:$0x3] }
 0x122   : > { %v1686_v59 = vsel %vm1685_vm7, 1, %v4853_v44 }
 0x123   : > { %v5280_v48 = vadd.f32 %v5183_v0, %v1027_v3  ;;  %v4472_v0 = vld [vmem:[#allocation8 + $0x18] sm:$0xff] }
 0x125   : > { %v5196_v20 = vpop.f32.mrf.mxu0 }
 0x128   : > { %v675_v21 = vpop.f32.mrf.mxu2 }
 0x129   : > { %v839_v22 = vpop.f32.mrf.mxu3  ;;  %v694_v24 = vadd.f32 %v675_v21, %v5129_v45  ;;  %v1705_v21 = vmul.u32 52428, %v1700_v62  ;;  %v1709_v62 = vshrl.u32 %v1704_v12, 16 }
 0x12b   : > { %v858_v26 = vadd.f32 %v839_v22, %v694_v24  ;;  %v1708_v22 = vshll.u32 %v1704_v12, 16  ;;  %v5230_v24 = vadd.s32 16, %v5198_v8  ;;  %v1713_v39 = vadd.s32 %v1711_v10, %v1705_v21  ;;  %v4473_v21 = vld [vmem:[#allocation8 + $0x20] sm:$0xff] }
 0x12c   : > { %2457 = vmatpush.bf16.msrb.mxu2 %v4473_v21  ;;  %v4491_v21 = vld [vmem:[#allocation8 + $0xb0] sm:$0xff] }
 0x12d   : > { %v5205_v31 = vadd.f32 %v1011_v1, %v858_v26  ;;  %v5207_v32 = vpop.f32.mrf.mxu0  ;;  %v1688_v1 = vadd.s32 %v1686_v59, %v1684_v47  ;;  %v1728_v35 = vand.u32 65535, %v5230_v24  ;;  %vm1714_vm9 = vc.u32 %v1712_v28, %v1708_v22 }
 0x12e   : > { %v1715_v42 = vsel %vm1714_vm9, 1, %v4853_v44  ;;  %v1729_v46 = vshrl.u32 %v5230_v24, 16  ;;  %v5288_v28 = vadd.f32 %v5190_v18, %v5186_v57 }
 0x12f   : > { %v1689_v6 = vadd.s32 %v1688_v1, %v1678_v52  ;;  %v5241_v51 = vmul.u32 52428, %v1728_v35  ;;  %v5243_v52 = vpop.f32.mrf.mxu1  ;;  %v1731_v19 = vmul.u32 52429, %v1728_v35  ;;  %v563_v1 = vadd.f32 %v5150_v15, %v5148_v14  ;;  %v4534_v15 = vld [vmem:[#allocation8 + $0x1c8] sm:$0xff] }
 0x130   : > { %v5209_v41 = vpop.f32.mrf.mxu2  ;;  %v5248_v59 = vmul.u32 52429, %v1729_v46  ;;  %v1734_v22 = vmul.u32 52428, %v1729_v46  ;;  %2458 = vmatpush.bf16.msrb.mxu2 %v4472_v0 }
 0x131   : > { %v5211_v45 = vpop.f32.mrf.mxu3  ;;  %v1690_v26 = vadd.s32 %v1689_v6, %v1680_v7  ;;  %v1735_v60 = vshll.u32 %v5241_v51, 16  ;;  %v857_v7 = vadd.f32 %v5194_v16, %v693_v37  ;;  %v695_v13 = vadd.f32 %v5209_v41, %v5134_v55 }
 0x132   : > { %v1737_v14 = vshll.u32 %v5248_v59, 16  ;;  %v5273_v16 = vadd.s32 24, %v5198_v8  ;;  %v5277_v41 = vadd.f32 %v5171_v54, %v5173_v56  ;;  %v1738_v36 = vshrl.u32 %v5248_v59, 16 }
 0x133   : > { %v1691_v47 = vshrl.u32 %v1690_v26, 3  ;;  %vm1739_vm12 = vc.u32 %v1731_v19, %v1735_v60  ;;  %v859_v26 = vadd.f32 %v5211_v45, %v695_v13 }
 0x134   : > { %v1740_v55 = vsel %vm1739_vm12, 1, %v4853_v44  ;;  %v1757_v57 = vand.u32 65535, %v5273_v16 }
 0x135   : > { %v5226_v4 = vpop.f32.mrf.mxu0  ;;  %v1692_v61 = vmul.u32 10, %v1691_v47  ;;  %v1742_v27 = vadd.s32 %v1740_v55, %v1734_v22  ;;  %v1031_v46 = vadd.f32 %v5188_v17, %v859_v26 }
 0x137   : > { %v5291_v54 = vsub.s32 %v5198_v8, %v1692_v61  ;;  %v5302_v18 = vpop.f32.mrf.mxu1  ;;  %v4470_v61 = vld [vmem:[#allocation8 + $0x8] sm:$0xff] }
 0x138   : > { %v680_v11 = vpop.f32.mrf.mxu2 }
 0x139   : > { %v844_v25 = vpop.f32.mrf.mxu3  ;;  %v696_v33 = vadd.f32 %v680_v11, %v5141_v2  ;;  %v1717_v2 = vadd.s32 %v1715_v42, %v1713_v39  ;;  %v1029_v11 = vadd.f32 %v5175_v58, %v857_v7  ;;  %v2067_v58 = vld [vmem:[#allocation2 + $0x2c] sm:$0xe]  ;;  %v1758_v39 = vshrl.u32 %v5273_v16, 16 }
 0x13a   : > { %v2068_v45 = vsel %vm5293_vm6, 0, %v2067_v58  ;;  %v5314_v42 = vadd.f32 %v5220_v50, %v5205_v31  ;;  %vm1957_vm8 = vcmp.ne.s32.totalorder %v5291_v54, 0  ;;  %vm1967_vm9 = vcmp.lt.s32.totalorder %v5291_v54, 0 }
 0x13b   : > { %v860_v5 = vadd.f32 %v844_v25, %v696_v33  ;;  %v1718_v38 = vadd.s32 %v1717_v2, %v1707_v34  ;;  %v2062_v25 = vsel %vm5267_vm13, 0, %v2061_v9  ;;  %v1736_v33 = vshrl.u32 %v5241_v51, 16  ;;  %2069 = vst [vmem:[#allocation2 + $0x2c] sm:$0xe] %v2068_v45  ;;  %v4471_v2 = vld [vmem:[#allocation8 + $0x10] sm:$0xff]  ;;  %v4492_v51 = vld [vmem:[#allocation8 + $0xb8] sm:$0xff]  ;;  %vm5346_vm12 = vmand %vm1967_vm9, %vm1957_vm8 }
 0x13c   : > { %2063 = vst [vmem:[#allocation2 + $0x4] sm:$0x3] %v2062_v25  ;;  %v5310_v34 = vadd.f32 %v5200_v53, %v1029_v11  ;;  %v5322_v53 = vmul.u32 52429, %v1758_v39  ;;  %2573 = vmatpush.bf16.msrb.mxu3 %v4492_v51  ;;  %2459 = vmatpush.bf16.msrb.mxu2 %v4471_v2  ;;  %v1763_v13 = vmul.u32 52428, %v1758_v39  ;;  %v5336_v9 = vadd.s32 10, %v5291_v54 }
 0x13d   : > { %v5246_v63 = vadd.f32 %v5196_v20, %v860_v5  ;;  %v5255_v40 = vpop.f32.mrf.mxu0  ;;  %v5259_v20 = vadd.f32 %v5162_v30, %v5160_v29  ;;  %v1719_v29 = vadd.s32 %v1718_v38, %v1709_v62  ;;  %v1741_v30 = vadd.s32 %v1735_v60, %v1731_v19 }
 0x13e   : > { %v5307_v5 = vadd.s32 32, %v5198_v8  ;;  %v1760_v19 = vmul.u32 52429, %v1757_v57  ;;  %v5320_v60 = vmul.u32 52428, %v1757_v57  ;;  %v1766_v22 = vshll.u32 %v5322_v53, 16  ;;  %v4504_v57 = vld [vmem:[#allocation8 + $0xf8] sm:$0xff] }
 0x13f   : > { %vm1743_vm7 = vc.u32 %v1741_v30, %v1737_v14  ;;  %v1720_v10 = vshrl.u32 %v1719_v29, 3  ;;  %v4481_v29 = vld [vmem:[#allocation8 + $0x60] sm:$0xff]  ;;  %v5359_v39 = vadd.s32 40, %v5198_v8  ;;  %v1148_v51 = vpop.f32.mrf.mxu1  ;;  %2737 = vmatpush.bf16.msrb.mxu0 %v4504_v57 }
 0x140   : > { %v682_v12 = vpop.f32.mrf.mxu2  ;;  %v1744_v35 = vsel %vm1743_vm7, 1, %v4853_v44  ;;  %v1786_v17 = vand.u32 65535, %v5307_v5  ;;  %2574 = vmatpush.bf16.msrb.mxu3 %v4491_v21  ;;  %2370 = vmatpush.bf16.msra.mxu1 %v4481_v29  ;;  %v1765_v0 = vshrl.u32 %v5320_v60, 16 }
 0x141   : > { %v5263_v6 = vpop.f32.mrf.mxu3  ;;  %v1746_v37 = vadd.s32 %v1744_v35, %v1742_v27  ;;  %v697_v3 = vadd.f32 %v682_v12, %v563_v1  ;;  %v1721_v31 = vmul.u32 10, %v1720_v10  ;;  %v1787_v1 = vshrl.u32 %v5307_v5, 16  ;;  %2460 = vmatpush.bf16.msrb.mxu2 %v4470_v61  ;;  %v4490_v35 = vld [vmem:[#allocation8 + $0xa8] sm:$0xff] }
 0x142   : > { %v5330_v12 = vmul.u32 52428, %v1786_v17  ;;  %v1789_v25 = vmul.u32 52429, %v1786_v17  ;;  %v4489_v17 = vld [vmem:[#allocation8 + $0xa0] sm:$0xff]  ;;  %v1816_v21 = vshrl.u32 %v5359_v39, 16 }
 0x143   : > { %v1747_v38 = vadd.s32 %v1746_v37, %v1736_v33  ;;  %v5339_v26 = vmul.u32 52429, %v1787_v1  ;;  %v861_v27 = vadd.f32 %v5263_v6, %v697_v3  ;;  %v5351_v58 = vsub.s32 %v5214_v43, %v1721_v31  ;;  %v4469_v6 = vld [vmem:[#allocation8] sm:$0xff] }
 0x144   : > { %v5362_v43 = vadd.f32 %v5243_v52, %v1031_v46  ;;  %v1792_v2 = vmul.u32 52428, %v1787_v1  ;;  %2575 = vmatpush.bf16.msrb.mxu3 %v4490_v35  ;;  %v1997_v52 = vsel %vm5346_vm12, %v5336_v9, %v5291_v54  ;;  %v1794_v54 = vshrl.u32 %v5330_v12, 16 }
 0x145   : > { %v5318_v62 = vpop.f32.mrf.mxu0  ;;  %v1748_v7 = vadd.s32 %v1747_v38, %v1738_v36  ;;  %v1793_v36 = vshll.u32 %v5330_v12, 16  ;;  %v1795_v37 = vshll.u32 %v5339_v26, 16  ;;  %v1033_v3 = vadd.f32 %v5207_v32, %v861_v27  ;;  %2461 = vmatpush.bf16.msrb.mxu2 %v4469_v6  ;;  %v4502_v27 = vld [vmem:[#allocation8 + $0xe8] sm:$0xff] }
 0x146   : > { %vm1958_vm7 = vcmp.ne.s32.totalorder %v5351_v58, 0  ;;  %vm1968_vm9 = vcmp.lt.s32.totalorder %v5351_v58, 0  ;;  %v5382_v32 = vadd.s32 10, %v5351_v58  ;;  %v1821_v6 = vmul.u32 52428, %v1816_v21 }
 0x147   : > { %v1749_v55 = vshrl.u32 %v1748_v7, 3  ;;  %vm1797_vm15 = vc.u32 %v1789_v25, %v1793_v36  ;;  %v1799_v38 = vadd.s32 %v1793_v36, %v1789_v25  ;;  %v4488_v25 = vld [vmem:[#allocation8 + $0x98] sm:$0xff]  ;;  %vm5411_vm12 = vmand %vm1968_vm9, %vm1958_vm7  ;;  %v5421_v36 = vld [vmem:[%s6018_s2] ss:$0 sm:$0xff] }
 0x148   : > { %v685_v47 = vpop.f32.mrf.mxu2  ;;  %2576 = vmatpush.bf16.msrb.mxu3 %v4489_v17 }
 0x149   : > { %v849_v49 = vpop.f32.mrf.mxu3  ;;  %v698_v59 = vadd.f32 %v685_v47, %v5156_v23  ;;  %v1764_v23 = vshll.u32 %v5320_v60, 16  ;;  %v1767_v47 = vshrl.u32 %v5322_v53, 16  ;;  %v5368_v60 = vadd.f32 %v5302_v18, %v5246_v63  ;;  %v4480_v18 = vld [vmem:[#allocation8 + $0x58] sm:$0xff] }
 0x14a   : > { %v1815_v53 = vand.u32 65535, %v5359_v39  ;;  %v1798_v63 = vsel %vm1797_vm15, 1, %v4853_v44  ;;  %vm1801_vm8 = vc.u32 %v1799_v38, %v1795_v37  ;;  %2371 = vmatpush.bf16.msra.mxu1 %v4480_v18 }
 0x14b   : > { %v862_v50 = vadd.f32 %v849_v49, %v698_v59  ;;  %vm1768_vm10 = vc.u32 %v1760_v19, %v1764_v23  ;;  %v1770_v11 = vadd.s32 %v1764_v23, %v1760_v19  ;;  %v1750_v19 = vmul.u32 10, %v1749_v55 }
 0x14c   : > { %v1769_v30 = vsel %vm1768_vm10, 1, %v4853_v44  ;;  %v1800_v7 = vadd.s32 %v1798_v63, %v1792_v2  ;;  %v1802_v61 = vsel %vm1801_vm8, 1, %v4853_v44  ;;  %v1818_v9 = vmul.u32 52429, %v1815_v53  ;;  %2577 = vmatpush.bf16.msrb.mxu3 %v4488_v25  ;;  %v4487_v2 = vld [vmem:[#allocation8 + $0x90] sm:$0xff] }
 0x14d   : > { %v5333_v14 = vadd.f32 %v5226_v4, %v862_v50  ;;  %v1771_v33 = vadd.s32 %v1769_v30, %v1763_v13  ;;  %vm1772_vm14 = vc.u32 %v1770_v11, %v1766_v22  ;;  %v5375_v46 = vpop.f32.mrf.mxu0  ;;  %v4503_v50 = vld [vmem:[#allocation8 + $0xf0] sm:$0xff]  ;;  %v5386_v13 = vsub.s32 %v5230_v24, %v1750_v19 }
 0x14e   : > { %v1773_v49 = vsel %vm1772_vm14, 1, %v4853_v44  ;;  %2738 = vmatpush.bf16.msrb.mxu0 %v4503_v50  ;;  %v1796_v22 = vshrl.u32 %v5339_v26, 16  ;;  %v1804_v1 = vadd.s32 %v1802_v61, %v1800_v7  ;;  %v5391_v29 = vmul.u32 52428, %v1815_v53  ;;  %v4479_v50 = vld [vmem:[#allocation8 + $0x50] sm:$0xff] }
 0x14f   : > { %v1775_v59 = vadd.s32 %v1773_v49, %v1771_v33  ;;  %vm5394_vm10 = vcmp.lt.s32.totalorder %v1997_v52, 8  ;;  %v5398_v4 = vmul.u32 52429, %v1816_v21  ;;  %vm1959_vm14 = vcmp.ne.s32.totalorder %v5386_v13, 0  ;;  %v1151_v49 = vpop.f32.mrf.mxu1  ;;  %2372 = vmatpush.bf16.msra.mxu1 %v4479_v50 }
 0x150   : > { %v687_v45 = vpop.f32.mrf.mxu2  ;;  %v1805_v33 = vadd.s32 %v1804_v1, %v1794_v54  ;;  %vm1969_vm15 = vcmp.lt.s32.totalorder %v5386_v13, 0  ;;  %v5435_v18 = vadd.s32 10, %v5386_v13  ;;  %2578 = vmatpush.bf16.msrb.mxu3 %v4487_v2  ;;  %v1823_v7 = vshrl.u32 %v5391_v29, 16 }
 0x151   : > { %v5354_v10 = vpop.f32.mrf.mxu3  ;;  %v1776_v31 = vadd.s32 %v1775_v59, %v1765_v0  ;;  %v699_v12 = vadd.f32 %v687_v45, %v5259_v20  ;;  %v5401_v0 = vadd.s32 48, %v5198_v8  ;;  %v1822_v20 = vshll.u32 %v5391_v29, 16  ;;  %vm5446_vm9 = vmand %vm1969_vm15, %vm1959_vm14  ;;  %v4500_v29 = vld [vmem:[#allocation8 + $0xd8] sm:$0xff] }
 0x152   : > { %v5405_v45 = vadd.f32 %v1148_v51, %v1033_v3  ;;  %2739 = vmatpush.bf16.msrb.mxu0 %v4502_v27  ;;  %v4501_v51 = vld [vmem:[#allocation8 + $0xe0] sm:$0xff]  ;;  %v1999_v27 = vsel %vm5446_vm9, %v5435_v18, %v5386_v13 }
 0x153   : > { %v1777_v23 = vadd.s32 %v1776_v31, %v1767_v47  ;;  %v1806_v47 = vadd.s32 %v1805_v33, %v1796_v22  ;;  %vm1826_vm7 = vc.u32 %v1818_v9, %v1822_v20  ;;  %v1828_v59 = vadd.s32 %v1822_v20, %v1818_v9  ;;  %v4486_v9 = vld [vmem:[#allocation8 + $0x88] sm:$0xff] }
 0x154   : > { %v1827_v19 = vsel %vm1826_vm7, 1, %v4853_v44  ;;  %v1844_v38 = vand.u32 65535, %v5401_v0  ;;  %v1845_v3 = vshrl.u32 %v5401_v0, 16  ;;  %v863_v52 = vadd.f32 %v5354_v10, %v699_v12  ;;  %2579 = vmatpush.bf16.msrb.mxu3 %v4486_v9 }
 0x155   : > { %v1778_v11 = vshrl.u32 %v1777_v23, 3  ;;  %v1998_v31 = vsel %vm5411_vm12, %v5382_v32, %v5351_v58  ;;  %v5432_v17 = vpop.f32.mrf.mxu0  ;;  %v1829_v63 = vadd.s32 %v1827_v19, %v1821_v6  ;;  %v1807_v54 = vshrl.u32 %v1806_v47, 3 }
 0x156   : > { %2740 = vmatpush.bf16.msrb.mxu0 %v4501_v51  ;;  %vm5454_vm12 = vcmp.lt.s32.totalorder %v1998_v31, 8  ;;  %v1825_v22 = vshrl.u32 %v5398_v4, 16  ;;  %v5459_v12 = vmul.u32 52428, %v1844_v38  ;;  %v1847_v25 = vmul.u32 52429, %v1844_v38  ;;  %v4477_v38 = vld [vmem:[#allocation8 + $0x40] sm:$0xff] }
 0x157   : > { %v1779_v37 = vmul.u32 10, %v1778_v11  ;;  %vm2071_vm7 = vsmask.f32 5392 }
 0x158   : > { %v1295_v55 = vpop.f32.mrf.mxu2  ;;  %v1851_v6 = vshll.u32 %v5459_v12, 16 }
 0x159   : > { %v1467_v30 = vpop.f32.mrf.mxu3  ;;  %v1320_v26 = vadd.f32 %v1295_v55, %v5277_v41  ;;  %v1824_v41 = vshll.u32 %v5398_v4, 16  ;;  %v5451_v32 = vsub.s32 %v5273_v16, %v1779_v37  ;;  %v5461_v55 = vmul.u32 52429, %v1845_v3 }
 0x15a   : > { %v5464_v16 = vadd.f32 %v5255_v40, %v863_v52  ;;  %v1808_v4 = vmul.u32 10, %v1807_v54  ;;  %2741 = vmatpush.bf16.msrb.mxu0 %v4500_v29  ;;  %v1850_v37 = vmul.u32 52428, %v1845_v3  ;;  %v1857_v24 = vadd.s32 %v1851_v6, %v1847_v25 }
 0x15b   : > { %v1492_v57 = vadd.f32 %v1467_v30, %v1320_v26  ;;  %vm1830_vm8 = vc.u32 %v1828_v59, %v1824_v41  ;;  %v4478_v26 = vld [vmem:[#allocation8 + $0x48] sm:$0xff]  ;;  %vm1960_vm14 = vcmp.ne.s32.totalorder %v5451_v32, 0  ;;  %vm1970_vm15 = vcmp.lt.s32.totalorder %v5451_v32, 0  ;;  %v4485_v41 = vld [vmem:[#allocation8 + $0x80] sm:$0xff] }
 0x15c   : > { %v1831_v23 = vsel %vm1830_vm8, 1, %v4853_v44  ;;  %2373 = vmatpush.bf16.msra.mxu1 %v4478_v26  ;;  %v5482_v19 = vsub.s32 %v5307_v5, %v1808_v4  ;;  %2580 = vmatpush.bf16.msrb.mxu3 %v4485_v41  ;;  %vm5494_vm9 = vmand %vm1970_vm15, %vm1960_vm14 }
 0x15d   : > { %v1622_v53 = vadd.f32 %v5318_v62, %v1492_v57  ;;  %v5439_v62 = vadd.f32 %v1151_v49, %v5333_v14  ;;  %v1833_v1 = vadd.s32 %v1831_v23, %v1829_v63  ;;  %v4499_v57 = vld [vmem:[#allocation8 + $0xd0] sm:$0xff]  ;;  %v5479_v49 = vadd.s32 10, %v5451_v32  ;;  %v5485_v3 = vpop.f32.mrf.mxu0  ;;  %vm5530_vm15 = vmor %vm2059_vm11, %vm2071_vm7 }
 0x15e   : > { %2742 = vmatpush.bf16.msrb.mxu0 %v4499_v57  ;;  %vm1971_vm14 = vcmp.lt.s32.totalorder %v5482_v19, 0 }
 0x15f   : > { %v1636_v10 = vadd.f32 %v5421_v36, %v1622_v53  ;;  %v1834_v33 = vadd.s32 %v1833_v1, %v1823_v7  ;;  %v2183_v7 = vld [vmem:[#allocation2 + $0x4] sm:$0xe] }
 0x160   : > { %v1297_v61 = vpop.f32.mrf.mxu2  ;;  %2374 = vmatpush.bf16.msra.mxu1 %v4477_v38 }
 0x161   : > { %v1469_v21 = vpop.f32.mrf.mxu3  ;;  %v1646_v30 = vmax.f32 %v1636_v10, 0.0  ;;  %v1321_v11 = vadd.f32 %v1297_v61, %v5280_v48  ;;  %v1853_v48 = vshll.u32 %v5461_v55, 16  ;;  %v1835_v13 = vadd.s32 %v1834_v33, %v1825_v22  ;;  %v4497_v33 = vld [vmem:[#allocation8 + $0xc0] sm:$0xff] }
 0x162   : > { %v5500_v22 = vadd.s32 56, %v5198_v8 }
 0x163   : > { %v2037_v40 = vsel %vm5394_vm10, %v1646_v30, 0.0  ;;  %v1493_v20 = vadd.f32 %v1469_v21, %v1321_v11  ;;  %vm1855_vm10 = vc.u32 %v1847_v25, %v1851_v6  ;;  %v1836_v59 = vshrl.u32 %v1835_v13, 3  ;;  %v4498_v21 = vld [vmem:[#allocation8 + $0xc8] sm:$0xff] }
 0x164   : > { %v2047_v35 = vpack.c.bf16 %v2037_v40, %v2037_v40  ;;  %v1856_v53 = vsel %vm1855_vm10, 1, %v4853_v44  ;;  %vm1859_vm8 = vc.u32 %v1857_v24, %v1853_v48  ;;  %vm5502_vm10 = vcmp.lt.s32.totalorder %v1999_v27, 8  ;;  %2743 = vmatpush.bf16.msrb.mxu0 %v4498_v21 }
 0x165   : > { %v1623_v47 = vadd.f32 %v5375_v46, %v1493_v20  ;;  %v1852_v46 = vshrl.u32 %v5459_v12, 16  ;;  %v1837_v54 = vmul.u32 10, %v1836_v59  ;;  %v1858_v5 = vadd.s32 %v1856_v53, %v1850_v37 }
 0x166   : > { %v2074_v2 = vshrl.u32 %v2047_v35, 16  ;;  %v2077_v51 = vshll.u32 %v2047_v35, 16  ;;  %v1860_v61 = vsel %vm1859_vm8, 1, %v4853_v44  ;;  %v1873_v25 = vand.u32 65535, %v5500_v22 }
 0x167   : > { %v1637_v52 = vadd.f32 %v5421_v36, %v1623_v47  ;;  %v1862_v29 = vadd.s32 %v1860_v61, %v1858_v5  ;;  %v5510_v11 = vsub.s32 %v5359_v39, %v1837_v54  ;;  %v1874_v26 = vshrl.u32 %v5500_v22, 16 }
 0x168   : > { %v2076_v31 = vrot.slane %v2074_v2, 6  ;;  %v2079_v50 = vrot.slane %v2077_v51, 7  ;;  %v1300_v63 = vpop.f32.mrf.mxu2  ;;  %v1991_v40 = vadd.s32 10, %v5482_v19  ;;  %v5524_v20 = vmul.u32 52428, %v1873_v25  ;;  %2744 = vmatpush.bf16.msrb.mxu0 %v4497_v33  ;;  %v1607_v2 = vpop.f32.mrf.mxu0 }
 0x169   : > { %v1472_v18 = vpop.f32.mrf.mxu3  ;;  %v1647_v10 = vmax.f32 %v1637_v52, 0.0  ;;  %v1322_v58 = vadd.f32 %v1300_v63, %v5288_v28  ;;  %v1854_v28 = vshrl.u32 %v5461_v55, 16  ;;  %v2000_v55 = vsel %vm5494_vm9, %v5479_v49, %v5451_v32 }
 0x16a   : > { %v2080_v1 = vor.u32 %v2079_v50, %v2076_v31  ;;  %v1863_v39 = vadd.s32 %v1862_v29, %v1852_v46  ;;  %v1876_v35 = vmul.u32 52429, %v1873_v25  ;;  %vm1972_vm8 = vcmp.lt.s32.totalorder %v5510_v11, 0 }
 0x16b   : > { %v2038_v12 = vsel %vm5454_vm12, %v1647_v10, 0.0  ;;  %v1494_v30 = vadd.f32 %v1472_v18, %v1322_v58  ;;  %vm1961_vm12 = vcmp.ne.s32.totalorder %v5482_v19, 0  ;;  %v5535_v47 = vmul.u32 52429, %v1874_v26  ;;  %v4586_v18 = vld [vmem:[#allocation2] sm:$0xe] }
 0x16c   : > { %v2184_v4 = vsel %vm5293_vm6, %v2080_v1, %v2183_v7  ;;  %v2048_v27 = vpack.c.bf16 %v2038_v12, %v2038_v12  ;;  %vm1962_vm6 = vcmp.ne.s32.totalorder %v5510_v11, 0  ;;  %v1864_v32 = vadd.s32 %v1863_v39, %v1854_v28  ;;  %vm5542_vm11 = vmand %vm1971_vm14, %vm1961_vm12 }
 0x16d   : > { %2185 = vst [vmem:[#allocation2 + $0x4] sm:$0xe] %v2184_v4  ;;  %v1624_v14 = vadd.f32 %v5432_v17, %v1494_v30  ;;  %v1880_v38 = vshll.u32 %v5524_v20, 16  ;;  %v2081_v52 = vrot.slane %v2080_v1, 4  ;;  %vm5547_vm7 = vcmp.lt.s32.totalorder %v2000_v55, 8 }
 0x16e   : > { %v2083_v6 = vshrl.u32 %v2048_v27, 16  ;;  %v2086_v56 = vshll.u32 %v2048_v27, 16  ;;  %v1865_v59 = vshrl.u32 %v1864_v32, 3  ;;  %v2001_v58 = vsel %vm5542_vm11, %v1991_v40, %v5482_v19 }
 0x16f   : > { %v1638_v48 = vadd.f32 %v5421_v36, %v1624_v14  ;;  %vm5556_vm9 = vc.u32 %v1876_v35, %v1880_v38  ;;  %v1879_v21 = vmul.u32 52428, %v1874_v26  ;;  %v1882_v19 = vshll.u32 %v5535_v47, 16 }
 0x170   : > { %v2085_v13 = vrot.slane %v2083_v6, 6  ;;  %v2088_v41 = vrot.slane %v2086_v56, 7  ;;  %v1302_v57 = vpop.f32.mrf.mxu2  ;;  %v1866_v63 = vmul.u32 10, %v1865_v59  ;;  %v1885_v30 = vsel %vm5556_vm9, 1, %v4853_v44 }
 0x171   : > { %v1474_v37 = vpop.f32.mrf.mxu3  ;;  %v1648_v49 = vmax.f32 %v1638_v48, 0.0  ;;  %v1323_v24 = vadd.f32 %v1302_v57, %v5310_v34  ;;  %v5552_v34 = vadd.s32 10, %v5510_v11  ;;  %v1886_v25 = vadd.s32 %v1880_v38, %v1876_v35 }
 0x172   : > { %v2089_v46 = vor.u32 %v2088_v41, %v2085_v13  ;;  %v5575_v28 = vsub.s32 %v5401_v0, %v1866_v63  ;;  %v1881_v0 = vshrl.u32 %v5524_v20, 16  ;;  %vm5587_vm12 = vcmp.lt.s32.totalorder %v2001_v58, 8  ;;  %v1609_v41 = vpop.f32.mrf.mxu0 }
 0x173   : > { %v2039_v31 = vsel %vm5502_vm10, %v1648_v49, 0.0  ;;  %v1495_v50 = vadd.f32 %v1474_v37, %v1323_v24  ;;  %vm5569_vm10 = vmand %vm1972_vm8, %vm1962_vm6  ;;  %vm1888_vm8 = vc.u32 %v1886_v25, %v1882_v19  ;;  %v1883_v51 = vshrl.u32 %v5535_v47, 16 }
 0x174   : > { %v2090_v5 = vsel %vm5530_vm15, %v2081_v52, %v2089_v46  ;;  %v2049_v7 = vpack.c.bf16 %v2039_v31, %v2039_v31  ;;  %v4554_v10 = vld [vmem:[#allocation2] sm:$0xff]   ;;  %vm1963_vm14 = vcmp.ne.s32.totalorder %v5575_v28, 0  ;;  %vm1973_vm6 = vcmp.lt.s32.totalorder %v5575_v28, 0 }
 0x175   : > { %v4585_v61 = vld [vmem:[#allocation2] sm:$0xf0]  ;;  %2186 = vst [vmem:[#allocation2 + $0x8] sm:$0xf] %v2090_v5  ;;  %v1625_v1 = vadd.f32 %v5485_v3, %v1495_v50  ;;  %v2273_v9 = vshll.u32 %v4554_v10, 16  ;;  %2462 = vmatmul.bf16.vlgmr.msrb.gmra.mxu2 %v4554_v10  ;;  %v2002_v3 = vsel %vm5569_vm10, %v5552_v34, %v5510_v11  ;;  %v1887_v11 = vadd.s32 %v1885_v30, %v1879_v21  ;;  %vm5604_vm11 = vmand %vm1973_vm6, %vm1963_vm14  ;;  %v4512_v34 = vld [vmem:[#allocation8 + $0x138] sm:$0xff] }
 0x176   : > { %v2093_v29 = vshrl.u32 %v2049_v7, 16  ;;  %v2096_v12 = vshll.u32 %v2049_v7, 16  ;;  %v4587_v27 = vor.u32 %v4586_v18, %v4585_v61  ;;  %v2091_v48 = vrot.slane %v2089_v46, 4  ;;  %v2617_v38 = vld [vmem:[#allocation2 + $0x4] sm:$0xe]  ;;  %2908 = vmatpush.bf16.msrb.mxu1 %v4512_v34 }
 0x177   : > { %v1639_v4 = vadd.f32 %v5421_v36, %v1625_v1  ;;  %v2275_v14 = vrot.slane %v2273_v9, 1  ;;  %v2271_v20 = vshrl.u32 %v4554_v10, 16  ;;  %v5597_v57 = vadd.s32 10, %v5575_v28 }
 0x178   : > { %v2095_v55 = vrot.slane %v2093_v29, 6  ;;  %v2098_v26 = vrot.slane %v2096_v12, 7  ;;  %v1305_v39 = vpop.f32.mrf.mxu2  ;;  %v1889_v37 = vsel %vm1888_vm8, 1, %v4853_v44  ;;  %v2509_v46 = vrot.slane %v4587_v27, 1 }
 0x179   : > { %v1477_v33 = vpop.f32.mrf.mxu3  ;;  %v1649_v56 = vmax.f32 %v1639_v4, 0.0  ;;  %v1324_v40 = vadd.f32 %v1305_v39, %v5314_v42  ;;  %v1891_v59 = vadd.s32 %v1889_v37, %v1887_v11  ;;  %v5609_v53 = vor.u32 %v2275_v14, %v2271_v20 }
 0x17a   : > { %v2099_v32 = vor.u32 %v2098_v26, %v2095_v55  ;;  %v5612_v31 = vadd.s32 64, %v5198_v8  ;;  %v5615_v54 = vadd.s32 72, %v5198_v8  ;;  %v2003_v47 = vsel %vm5604_vm11, %v5597_v57, %v5575_v28  ;;  %v1612_v11 = vpop.f32.mrf.mxu0 }
 0x17b   : > { %v2040_v35 = vsel %vm5547_vm7, %v1649_v56, 0.0  ;;  %v1496_v13 = vadd.f32 %v1477_v33, %v1324_v40  ;;  %v1892_v18 = vadd.s32 %v1891_v59, %v1881_v0  ;;  %vm5624_vm7 = vcmp.lt.s32.totalorder %v2002_v3, 8 }
 0x17c   : > { %v2100_v42 = vsel %vm5530_vm15, %v2091_v48, %v2099_v32  ;;  %v2050_v49 = vpack.c.bf16 %v2040_v35, %v2040_v35  ;;  %v1903_v7 = vshrl.u32 %v5612_v31, 16  ;;  %v2656_v1 = vunpack.c.l.b16 %v2617_v38  ;;  %v4511_v48 = vld [vmem:[#allocation8 + $0x130] sm:$0xff] }
 0x17d   : > { %2187 = vst [vmem:[#allocation2 + $0xc] sm:$0xf] %v2100_v42  ;;  %v1626_v52 = vadd.f32 %v1607_v2, %v1496_v13  ;;  %v1902_v2 = vand.u32 65535, %v5612_v31  ;;  %v1893_v8 = vadd.s32 %v1892_v18, %v1883_v51  ;;  %v2101_v9 = vrot.slane %v2099_v32, 4  ;;  %2909 = vmatpush.bf16.msrb.mxu1 %v4511_v48 }
 0x17e   : > { %v2103_v50 = vshrl.u32 %v2050_v49, 16  ;;  %v2106_v63 = vshll.u32 %v2050_v49, 16  ;;  %v5631_v25 = vmul.u32 52429, %v1903_v7  ;;  %v1931_v4 = vand.u32 65535, %v5615_v54 }
 0x17f   : > { %v1640_v5 = vadd.f32 %v5421_v36, %v1626_v52  ;;  %v5629_v28 = vmul.u32 52428, %v1902_v2  ;;  %v1894_v30 = vshrl.u32 %v1893_v8, 3  ;;  %v1905_v0 = vmul.u32 52429, %v1902_v2 }
 0x180   : > { %v2105_v10 = vrot.slane %v2103_v50, 6  ;;  %v2108_v58 = vrot.slane %v2106_v63, 7  ;;  %v1307_v23 = vpop.f32.mrf.mxu2  ;;  %v1932_v56 = vshrl.u32 %v5615_v54, 16  ;;  %v1908_v32 = vmul.u32 52428, %v1903_v7 }
 0x181   : > { %v1479_v61 = vpop.f32.mrf.mxu3  ;;  %v1650_v19 = vmax.f32 %v1640_v5, 0.0  ;;  %v1325_v29 = vadd.f32 %v1307_v23, %v5362_v43  ;;  %v1909_v55 = vshll.u32 %v5629_v28, 16  ;;  %v1895_v39 = vmul.u32 10, %v1894_v30 }
 0x182   : > { %v2109_v12 = vor.u32 %v2108_v58, %v2105_v10  ;;  %v1911_v20 = vshll.u32 %v5631_v25, 16  ;;  %vm5661_vm10 = vcmp.lt.s32.totalorder %v2003_v47, 8  ;;  %v1910_v21 = vshrl.u32 %v5629_v28, 16 }
 0x183   : > { %v2041_v3 = vsel %vm5587_vm12, %v1650_v19, 0.0  ;;  %v1497_v27 = vadd.f32 %v1479_v61, %v1325_v29  ;;  %v5651_v49 = vsub.s32 %v5500_v22, %v1895_v39  ;;  %vm5657_vm9 = vc.u32 %v1905_v0, %v1909_v55 }
 0x184   : > { %v2110_v26 = vsel %vm5530_vm15, %v2101_v9, %v2109_v12  ;;  %v2051_v14 = vpack.c.bf16 %v2041_v3, %v2041_v3  ;;  %v5639_v43 = vld [vmem:[#allocation2 + $0x8] sm:$0xff]  ;;  %v2111_v5 = vrot.slane %v2109_v12, 4  ;;  %v1915_v58 = vadd.s32 %v1909_v55, %v1905_v0  ;;  %v4520_v0 = vld [vmem:[#allocation8 + $0x178] sm:$0xff] }
 0x185   : > { %v5641_v33 = vld [vmem:[#allocation2 + $0x8] sm:$0xff]   ;;  %2188 = vst [vmem:[#allocation2 + $0x10] sm:$0xf] %v2110_v26  ;;  %v1627_v40 = vadd.f32 %v1609_v41, %v1497_v27  ;;  %2467 = vmatmul.bf16.gmra.mxu2 %v5639_v43  ;;  %v2510_v57 = vrot.slane %v5639_v43, 1  ;;  %v2278_v37 = vshll.u32 %v5639_v43, 16  ;;  %vm1964_vm12 = vcmp.ne.s32.totalorder %v5651_v49, 0 }
 0x186   : > { %v2657_v6 = vunpack.c.l.b16 %v5641_v33  ;;  %v2113_v35 = vshrl.u32 %v2051_v14, 16  ;;  %v2116_v13 = vshll.u32 %v2051_v14, 16  ;;  %vm1974_vm14 = vcmp.lt.s32.totalorder %v5651_v49, 0  ;;  %v1614_v14 = vpop.f32.mrf.mxu0  ;;  %3037 = vmatpush.bf16.msra.mxu2 %v4520_v0 }
 0x187   : > { %v1641_v42 = vadd.f32 %v5421_v36, %v1627_v40  ;;  %v2511_v22 = vsel %vm591_vm3, %v2509_v46, %v2510_v57  ;;  %v2280_v50 = vrot.slane %v2278_v37, 1  ;;  %v1994_v7 = vadd.s32 10, %v5651_v49  ;;  %vm5681_vm6 = vmand %vm1974_vm14, %vm1964_vm12 }
 0x188   : > { %v5655_v41 = vpack.c.b16 %v2657_v6, %v2656_v1  ;;  %v2115_v51 = vrot.slane %v2113_v35, 6  ;;  %v2118_v59 = vrot.slane %v2116_v13, 7  ;;  %v1310_v38 = vpop.f32.mrf.mxu2  ;;  %2581 = vmatmul.bf16.vlgmr.msrb.gmra.mxu3 %v2511_v22  ;;  %v1912_v1 = vshrl.u32 %v5631_v25, 16 }
 0x189   : > { %v1482_v52 = vpop.f32.mrf.mxu3  ;;  %v1651_v63 = vmax.f32 %v1641_v42, 0.0  ;;  %v1326_v18 = vadd.f32 %v1310_v38, %v5368_v60  ;;  %v2281_v47 = vsel %vm351_vm0, %v5609_v53, %v2280_v50  ;;  %v1914_v60 = vsel %vm5657_vm9, 1, %v4853_v44  ;;  %v4519_v38 = vld [vmem:[#allocation8 + $0x170] sm:$0xff] }
 0x18a   : > { %v2119_v2 = vor.u32 %v2118_v59, %v2115_v51  ;;  %2375 = vmatmul.bf16.vlgmr.msra.gmra.mxu1 %v2281_v47  ;;  %v2673_v19 = vrot.slane %v5655_v41, 1  ;;  %v1916_v29 = vadd.s32 %v1914_v60, %v1908_v32  ;;  %vm1917_vm8 = vc.u32 %v1915_v58, %v1911_v20  ;;  %3038 = vmatpush.bf16.msra.mxu2 %v4519_v38 }
 0x18b   : > { %v2042_v10 = vsel %vm5624_vm7, %v1651_v63, 0.0  ;;  %v1498_v46 = vadd.f32 %v1482_v52, %v1326_v18  ;;  %v1918_v27 = vsel %vm1917_vm8, 1, %v4853_v44  ;;  %v2004_v28 = vsel %vm5681_vm6, %v1994_v7, %v5651_v49 }
 0x18c   : > { %v2120_v23 = vsel %vm5530_vm15, %v2111_v5, %v2119_v2  ;;  %v2052_v61 = vpack.c.bf16 %v2042_v10, %v2042_v10  ;;  %v5685_v53 = vld [vmem:[#allocation2 + $0xc] sm:$0xff]  ;;  %v2121_v55 = vrot.slane %v2119_v2, 4  ;;  %v1920_v25 = vadd.s32 %v1918_v27, %v1916_v29 }
 0x18d   : > { %2189 = vst [vmem:[#allocation2 + $0x14] sm:$0xf] %v2120_v23  ;;  %v1628_v9 = vadd.f32 %v1612_v11, %v1498_v46  ;;  %v2674_v3 = vrot.slane %v5685_v53, 1  ;;  %v5701_v20 = vmul.u32 52428, %v1931_v4  ;;  %v1934_v42 = vmul.u32 52429, %v1931_v4 }
 0x18e   : > { %v2123_v12 = vshrl.u32 %v2052_v61, 16  ;;  %v2126_v30 = vshll.u32 %v2052_v61, 16  ;;  %v1921_v37 = vadd.s32 %v1920_v25, %v1910_v21  ;;  %v2282_v24 = vshrl.u32 %v5639_v43, 16  ;;  %v4518_v61 = vld [vmem:[#allocation8 + $0x168] sm:$0xff] }
 0x18f   : > { %v1642_v26 = vadd.f32 %v5421_v36, %v1628_v9  ;;  %v2675_v32 = vsel %vm591_vm3, %v2673_v19, %v2674_v3  ;;  %v5709_v51 = vmul.u32 52429, %v1932_v56  ;;  %v1938_v59 = vshll.u32 %v5701_v20, 16  ;;  %3039 = vmatpush.bf16.msra.mxu2 %v4518_v61 }
 0x190   : > { %v2125_v39 = vrot.slane %v2123_v12, 6  ;;  %v2128_v40 = vrot.slane %v2126_v30, 7  ;;  %v1312_v11 = vpop.f32.mrf.mxu2  ;;  %2745 = vmatmul.bf16.vlgmr.msrb.gmra.mxu0 %v2675_v32  ;;  %vm5714_vm11 = vcmp.lt.s32.totalorder %v2004_v28, 8  ;;  %v1922_v63 = vadd.s32 %v1921_v37, %v1912_v1  ;;  %v1617_v28 = vpop.f32.mrf.mxu0 }
 0x191   : > { %v1484_v48 = vpop.f32.mrf.mxu3  ;;  %v1652_v35 = vmax.f32 %v1642_v26, 0.0  ;;  %v1327_v13 = vadd.f32 %v1312_v11, %v5405_v45  ;;  %v2284_v2 = vor.u32 %v2282_v24, %v2280_v50  ;;  %v1937_v47 = vmul.u32 52428, %v1932_v56  ;;  %v4509_v24 = vld [vmem:[#allocation8 + $0x120] sm:$0xff]  ;;  %v4531_v45 = vld [vmem:[#allocation8 + $0x1b0] sm:$0xff] }
 0x192   : > { %v2129_v49 = vor.u32 %v2128_v40, %v2125_v39  ;;  %v1923_v7 = vshrl.u32 %v1922_v63, 3  ;;  %v1940_v10 = vshll.u32 %v5709_v51, 16  ;;  %vm1942_vm7 = vc.u32 %v1934_v42, %v1938_v59 }
 0x193   : > { %v2043_v52 = vsel %vm5661_vm10, %v1652_v35, 0.0  ;;  %v1499_v22 = vadd.f32 %v1484_v48, %v1327_v13  ;;  %v1943_v56 = vsel %vm1942_vm7, 1, %v4853_v44  ;;  %v1944_v21 = vadd.s32 %v1938_v59, %v1934_v42  ;;  %v1153_v48 = vpop.f32.mrf.mxu1 }
 0x194   : > { %v2130_v4 = vsel %vm5530_vm15, %v2121_v55, %v2129_v49  ;;  %v2053_v18 = vpack.c.bf16 %v2043_v52, %v2043_v52  ;;  %v5720_v5 = vld [vmem:[#allocation2 + $0x10] sm:$0xff]  ;;  %v1924_v8 = vmul.u32 10, %v1923_v7  ;;  %v2131_v27 = vrot.slane %v2129_v49, 4 }
 0x195   : > { %2190 = vst [vmem:[#allocation2 + $0x18] sm:$0xf] %v2130_v4  ;;  %v1629_v34 = vadd.f32 %v1614_v14, %v1499_v22  ;;  %2472 = vmatmul.bf16.gmra.mxu2 %v5720_v5  ;;  %v2512_v58 = vrot.slane %v5720_v5, 1  ;;  %v2286_v23 = vshll.u32 %v5720_v5, 16  ;;  %v1945_v39 = vadd.s32 %v1943_v56, %v1937_v47  ;;  %v4516_v22 = vld [vmem:[#allocation8 + $0x158] sm:$0xff] }
 0x196   : > { %v2133_v46 = vshrl.u32 %v2053_v18, 16  ;;  %v2136_v60 = vshll.u32 %v2053_v18, 16  ;;  %v1925_v26 = vsub.s32 %v5612_v31, %v1924_v8  ;;  %vm5741_vm9 = vc.u32 %v1944_v21, %v1940_v10  ;;  %v4532_v31 = vld [vmem:[#allocation8 + $0x1b8] sm:$0xff] }
 0x197   : > { %v1643_v50 = vadd.f32 %v5421_v36, %v1629_v34  ;;  %v2513_v12 = vsel %vm591_vm3, %v2510_v57, %v2512_v58  ;;  %v5735_v30 = vrot.slane %v2286_v23, 1  ;;  %v4510_v57 = vld [vmem:[#allocation8 + $0x128] sm:$0xff]  ;;  %v1939_v42 = vshrl.u32 %v5701_v20, 16  ;;  %3201 = vmatpush.bf16.msra.mxu3 %v4532_v31 }
 0x198   : > { %v2135_v1 = vrot.slane %v2133_v46, 6  ;;  %v2138_v9 = vrot.slane %v2136_v60, 7  ;;  %v1315_v19 = vpop.f32.mrf.mxu2  ;;  %2586 = vmatmul.bf16.gmra.mxu3 %v2513_v12  ;;  %vm1965_vm10 = vcmp.ne.s32.totalorder %v1925_v26, 0  ;;  %vm1975_vm12 = vcmp.lt.s32.totalorder %v1925_v26, 0  ;;  %2910 = vmatpush.bf16.msrb.mxu1 %v4510_v57  ;;  %v4508_v60 = vld [vmem:[#allocation8 + $0x118] sm:$0xff] }
 0x199   : > { %v1487_v29 = vpop.f32.mrf.mxu3  ;;  %v1653_v0 = vmax.f32 %v1643_v50, 0.0  ;;  %v1328_v55 = vadd.f32 %v1315_v19, %v5439_v62  ;;  %v2289_v25 = vsel %vm351_vm0, %v2284_v2, %v5735_v30  ;;  %v4517_v62 = vld [vmem:[#allocation8 + $0x160] sm:$0xff]  ;;  %vm5749_vm14 = vmand %vm1975_vm12, %vm1965_vm10  ;;  %v1995_v37 = vadd.s32 10, %v1925_v26  ;;  %v4515_v50 = vld [vmem:[#allocation8 + $0x150] sm:$0xff] }
 0x19a   : > { %v2139_v14 = vor.u32 %v2138_v9, %v2135_v1  ;;  %2380 = vmatmul.bf16.gmra.mxu1 %v2289_v25  ;;  %v1941_v38 = vshrl.u32 %v5709_v51, 16  ;;  %v1947_v52 = vsel %vm5741_vm9, 1, %v4853_v44  ;;  %3040 = vmatpush.bf16.msra.mxu2 %v4517_v62  ;;  %v1165_v2 = vadd.f32 %v1153_v48, %v5464_v16  ;;  %v4529_v62 = vld [vmem:[#allocation8 + $0x1a0] sm:$0xff] }
 0x19b   : > { %v2044_v40 = vsel %vm5714_vm11, %v1653_v0, 0.0  ;;  %v1500_v11 = vadd.f32 %v1487_v29, %v1328_v55  ;;  %v2005_v20 = vsel %vm5749_vm14, %v1995_v37, %v1925_v26  ;;  %v1949_v18 = vadd.s32 %v1947_v52, %v1945_v39  ;;  %3202 = vmatpush.bf16.msra.mxu3 %v4531_v45  ;;  %v4507_v29 = vld [vmem:[#allocation8 + $0x110] sm:$0xff]  ;;  %v1619_v0 = vpop.f32.mrf.mxu0  ;;  %v4530_v26 = vld [vmem:[#allocation8 + $0x1a8] sm:$0xff]  ;;  %v4513_v52 = vld [vmem:[#allocation8 + $0x140] sm:$0xff] }
 0x19c   : > { %v2140_v32 = vsel %vm5530_vm15, %v2131_v27, %v2139_v14  ;;  %v2054_v35 = vpack.c.bf16 %v2044_v40, %v2044_v40  ;;  %v5754_v49 = vld [vmem:[#allocation2 + $0x14] sm:$0xff]  ;;  %vm5765_vm6 = vcmp.lt.s32.totalorder %v2005_v20, 8  ;;  %2911 = vmatpush.bf16.msrb.mxu1 %v4509_v24  ;;  %v2141_v8 = vrot.slane %v2139_v14, 4  ;;  %v4514_v39 = vld [vmem:[#allocation8 + $0x148] sm:$0xff] }
 0x19d   : > { %2191 = vst [vmem:[#allocation2 + $0x1c] sm:$0xf] %v2140_v32  ;;  %v1630_v59 = vadd.f32 %v1617_v28, %v1500_v11  ;;  %v2676_v51 = vrot.slane %v5754_v49, 1  ;;  %v1950_v46 = vadd.s32 %v1949_v18, %v1939_v42  ;;  %v4540_v14 = vld [vmem:[#allocation8 + $0x1f8] sm:$0xff]  ;;  %v2290_v25 = vshrl.u32 %v5720_v5, 16 }
 0x19e   : > { %v2143_v63 = vshrl.u32 %v2054_v35, 16  ;;  %v2146_v4 = vshll.u32 %v2054_v35, 16  ;;  %3041 = vmatpush.bf16.msra.mxu2 %v4516_v22  ;;  %3372 = vmatpush.bf16.msra.mxu0 %v4540_v14  ;;  %v4539_v35 = vld [vmem:[#allocation8 + $0x1f0] sm:$0xff]  ;;  %v2803_v13 = vshrl.u32 %v5655_v41, 16  ;;  %v4506_v22 = vld [vmem:[#allocation8 + $0x108] sm:$0xff]  ;;  %v2806_v45 = vshll.u32 %v5655_v41, 16 }
 0x19f   : > { %v1644_v47 = vadd.f32 %v5421_v36, %v1630_v59  ;;  %v2677_v16 = vsel %vm591_vm3, %v2674_v3, %v2676_v51  ;;  %v1951_v1 = vadd.s32 %v1950_v46, %v1941_v38  ;;  %3203 = vmatpush.bf16.msra.mxu3 %v4530_v26  ;;  %v2292_v48 = vor.u32 %v2290_v25, %v5735_v30  ;;  %v4526_v26 = vld [vmem:[#allocation8 + $0x188] sm:$0xff] }
 0x1a0   : > { %v2145_v34 = vrot.slane %v2143_v63, 6  ;;  %v2148_v7 = vrot.slane %v2146_v4, 7  ;;  %v1317_v10 = vpop.f32.mrf.mxu2  ;;  %2750 = vmatmul.bf16.gmra.mxu0 %v2677_v16  ;;  %2912 = vmatpush.bf16.msrb.mxu1 %v4508_v60  ;;  %v4528_v4 = vld [vmem:[#allocation8 + $0x198] sm:$0xff]  ;;  %v2805_v20 = vrot.slane %v2803_v13, 1  ;;  %v2811_v18 = vshrl.u32 %v5685_v53, 16  ;;  %v4527_v60 = vld [vmem:[#allocation8 + $0x190] sm:$0xff] }
 0x1a1   : > { %v1654_v23 = vmax.f32 %v1644_v47, 0.0  ;;  %v1329_v61 = vadd.f32 %v1317_v10, %v1165_v2  ;;  %v1489_v21 = vpop.f32.mrf.mxu3  ;;  %v1952_v55 = vshrl.u32 %v1951_v1, 3  ;;  %v4537_v16 = vld [vmem:[#allocation8 + $0x1e0] sm:$0xff]  ;;  %v2823_v14 = vshll.u32 %v5754_v49, 16 }
 0x1a2   : > { %v2149_v56 = vor.u32 %v2148_v7, %v2145_v34  ;;  %3042 = vmatpush.bf16.msra.mxu2 %v4515_v50  ;;  %3373 = vmatpush.bf16.msra.mxu0 %v4539_v35  ;;  %v2808_v34 = vrot.slane %v2806_v45, 2  ;;  %v2814_v7 = vshll.u32 %v5685_v53, 16  ;;  %v2813_v44 = vrot.slane %v2811_v18, 1 }
 0x1a3   : > { %v2045_v9 = vsel %vm5765_vm6, %v1654_v23, 0.0  ;;  %v1501_v19 = vadd.f32 %v1489_v21, %v1329_v61  ;;  %v1953_v40 = vmul.u32 10, %v1952_v55  ;;  %3204 = vmatpush.bf16.msra.mxu3 %v4529_v62  ;;  %v4505_v55 = vld [vmem:[#allocation8 + $0x100] sm:$0xff] }
 0x1a4   : > { %v2150_v12 = vsel %vm5530_vm15, %v2141_v8, %v2149_v56  ;;  %v2055_v27 = vpack.c.bf16 %v2045_v9, %v2045_v9  ;;  %v5778_v3 = vld [vmem:[#allocation2 + $0x18] sm:$0xff]  ;;  %2913 = vmatpush.bf16.msrb.mxu1 %v4507_v29  ;;  %v2816_v23 = vrot.slane %v2814_v7, 2  ;;  %v2809_v8 = vor.u32 %v2808_v34, %v2805_v20 }
 0x1a5   : > { %2192 = vst [vmem:[#allocation2 + $0x20] sm:$0xf] %v2150_v12  ;;  %v1631_v28 = vadd.f32 %v1619_v0, %v1501_v19  ;;  %2477 = vmatmul.bf16.gmra.mxu2 %v5778_v3  ;;  %v2514_v11 = vrot.slane %v5778_v3, 1  ;;  %v2294_v32 = vshll.u32 %v5778_v3, 16  ;;  %v1954_v24 = vsub.s32 %v5615_v54, %v1953_v40  ;;  %v2195_v40 = vld [vmem:[#allocation2 + $0x2c] sm:$0x3] }
 0x1a6   : > { %v2153_v43 = vshrl.u32 %v2055_v27, 16  ;;  %v2156_v57 = vshll.u32 %v2055_v27, 16  ;;  %3043 = vmatpush.bf16.msra.mxu2 %v4514_v39  ;;  %v2820_v19 = vshrl.u32 %v5754_v49, 16  ;;  %v3416_v27 = vld [vmem:[#allocation2 + $0x8] sm:$0x8]  ;;  %v2298_v39 = vshrl.u32 %v5778_v3, 16 }
 0x1a7   : > { %v1645_v31 = vadd.f32 %v5421_v36, %v1631_v28  ;;  %v2515_v59 = vsel %vm591_vm3, %v2512_v58, %v2514_v11  ;;  %v2151_v36 = vrot.slane %v2149_v56, 4  ;;  %v5793_v30 = vrot.slane %v2294_v32, 1  ;;  %v4538_v58 = vld [vmem:[#allocation8 + $0x1e8] sm:$0xff]  ;;  %3205 = vmatpush.bf16.msra.mxu3 %v4528_v4 }
 0x1a8   : > { %v2155_v37 = vrot.slane %v2153_v43, 6  ;;  %v2158_v42 = vrot.slane %v2156_v57, 7  ;;  %2591 = vmatmul.bf16.gmra.mxu3 %v2515_v59  ;;  %vm1966_vm8 = vcmp.ne.s32.totalorder %v1954_v24, 0  ;;  %vm1976_vm11 = vcmp.lt.s32.totalorder %v1954_v24, 0  ;;  %2914 = vmatpush.bf16.msrb.mxu1 %v4506_v22  ;;  %v4536_v43 = vld [vmem:[#allocation8 + $0x1d8] sm:$0xff] }
 0x1a9   : > { %v1655_v38 = vmax.f32 %v1645_v31, 0.0  ;;  %v1996_v54 = vadd.s32 10, %v1954_v24  ;;  %vm1986_vm7 = vmand %vm1976_vm11, %vm1966_vm8  ;;  %v2297_v5 = vsel %vm351_vm0, %v2292_v48, %v5793_v30  ;;  %3374 = vmatpush.bf16.msra.mxu0 %v4538_v58  ;;  %v2817_v56 = vor.u32 %v2816_v23, %v2813_v44  ;;  %v5835_v22 = vld [vmem:[#allocation2 + $0x18] sm:$0xff] }
 0x1aa   : > { %v2159_v63 = vor.u32 %v2158_v42, %v2155_v37  ;;  %2385 = vmatmul.bf16.gmra.mxu1 %v2297_v5  ;;  %3044 = vmatpush.bf16.msra.mxu2 %v4513_v52  ;;  %v3121_v57 = vunpack.c.h.b16 %v5641_v33  ;;  %v2825_v48 = vrot.slane %v2823_v14, 2  ;;  %v2300_v13 = vor.u32 %v2298_v39, %v5793_v30  ;;  %v4525_v37 = vld [vmem:[#allocation8 + $0x180] sm:$0xff]  ;;  %v4535_v42 = vld [vmem:[#allocation8 + $0x1d0] sm:$0xff]  ;;  %v4548_v58 = vld [vmem:[#allocation8 + $0x238] sm:$0xff] }
 0x1ab   : > { %v2006_v47 = vsel %vm1986_vm7, %v1996_v54, %v1954_v24  ;;  %3206 = vmatpush.bf16.msra.mxu3 %v4527_v60  ;;  %v5811_v9 = vsel %vm885_vm1, %v2809_v8, %v2817_v56  ;;  %v3435_v24 = vunpack.c.l.b16 %v3416_v27  ;;  %v3440_v34 = vrot.slane %v5835_v22, 3  ;;  %v4533_v23 = vld [vmem:[#allocation8 + $0x1c0] sm:$0xff] }
 0x1ac   : > { %v2160_v2 = vsel %vm5530_vm15, %v2151_v36, %v2159_v63  ;;  %v5801_v41 = vld [vmem:[#allocation2 + $0x1c] sm:$0xff]  ;;  %vm2016_vm9 = vcmp.lt.s32.totalorder %v2006_v47, 8  ;;  %v2161_v28 = vrot.slane %v2159_v63, 4  ;;  %2915 = vmatpush.bf16.msrb.mxu1 %v4505_v55 }
 0x1ad   : > { %2193 = vst [vmem:[#allocation2 + $0x24] sm:$0xf] %v2160_v2  ;;  %v2046_v10 = vsel %vm2016_vm9, %v1655_v38, 0.0  ;;  %v2678_v46 = vrot.slane %v5801_v41, 1  ;;  %3375 = vmatpush.bf16.msra.mxu0 %v4537_v16  ;;  %v5830_v38 = vld [vmem:[#allocation2 + $0x10] sm:$0xff]  ;;  %v2829_v52 = vshrl.u32 %v5801_v41, 16  ;;  %v3436_v63 = vpack.c.b16 %v3121_v57, %v3435_v24 }
 0x1ae   : > { %v2056_v61 = vpack.c.bf16 %v2046_v10, %v2046_v10  ;;  %v2832_v45 = vshll.u32 %v5801_v41, 16  ;;  %v3438_v18 = vrot.slane %v5830_v38, 3 }
 0x1af   : > { %v2679_v50 = vsel %vm591_vm3, %v2676_v51, %v2678_v46  ;;  %v2822_v51 = vrot.slane %v2820_v19, 1  ;;  %3207 = vmatpush.bf16.msra.mxu3 %v4526_v26  ;;  %v2831_v4 = vrot.slane %v2829_v52, 1  ;;  %v3437_v20 = vrot.slane %v3436_v63, 3  ;;  %v4547_v26 = vld [vmem:[#allocation8 + $0x230] sm:$0xff] }
 0x1b0   : > { %v2163_v21 = vshrl.u32 %v2056_v61, 16  ;;  %v2166_v1 = vshll.u32 %v2056_v61, 16  ;;  %2755 = vmatmul.bf16.gmra.mxu0 %v2679_v50  ;;  %v2834_v5 = vrot.slane %v2832_v45, 2  ;;  %3501 = vmatpush.bf16.msra.mxu1 %v4548_v58  ;;  %v5857_v16 = vsel %vm1523_vm4, %v3438_v18, %v3440_v34 }
 0x1b1   : > { %3376 = vmatpush.bf16.msra.mxu0 %v4536_v43  ;;  %v2826_v17 = vor.u32 %v2825_v48, %v2822_v51  ;;  %v5847_v7 = vsel %vm1523_vm4, %v3437_v20, %v3438_v18  ;;  %v4545_v18 = vld [vmem:[#allocation8 + $0x220] sm:$0xff] }
 0x1b2   : > { %v2165_v29 = vrot.slane %v2163_v21, 6  ;;  %v2168_v12 = vrot.slane %v2166_v1, 7  ;;  %v2835_v47 = vor.u32 %v2834_v5, %v2831_v4 }
 0x1b3   : > { %v5842_v54 = vsel %vm885_vm1, %v2817_v56, %v2826_v17  ;;  %3208 = vmatpush.bf16.msra.mxu3 %v4525_v37  ;;  %v2974_v56 = vrot.slane %v5685_v53, 2  ;;  %v3245_v37 = vld [vmem:[#allocation2 + $0x30] sm:$0x7] }
 0x1b4   : > { %v5814_v0 = vld [vmem:[#allocation2 + $0x20] sm:$0xff]  ;;  %v2169_v25 = vor.u32 %v2168_v12, %v2165_v29  ;;  %v5854_v61 = vsel %vm885_vm1, %v2826_v17, %v2835_v47  ;;  %3502 = vmatpush.bf16.msra.mxu1 %v4547_v26  ;;  %v2976_v17 = vrot.slane %v5754_v49, 2  ;;  %v3278_v49 = vshll.u32 %v5830_v38, 16 }
 0x1b5   : > { %2482 = vmatmul.bf16.gmra.mxu2 %v5814_v0  ;;  %v2516_v62 = vrot.slane %v5814_v0, 1  ;;  %v2302_v31 = vshll.u32 %v5814_v0, 16  ;;  %3377 = vmatpush.bf16.msra.mxu0 %v4535_v42  ;;  %v3081_v42 = vld [vmem:[#allocation2 + $0x8] sm:$0xc] }
 0x1b6   : > { %v2170_v32 = vsel %vm5530_vm15, %v2161_v28, %v2169_v25  ;;  %v2171_v35 = vrot.slane %v2169_v25, 4  ;;  %v2306_v28 = vshrl.u32 %v5814_v0, 16 }
 0x1b7   : > { %2194 = vst [vmem:[#allocation2 + $0x28] sm:$0xf] %v2170_v32  ;;  %v2517_v59 = vsel %vm591_vm3, %v2514_v11, %v2516_v62  ;;  %v2304_v36 = vrot.slane %v2302_v31, 1  ;;  %v2952_v11 = vld [vmem:[#allocation2 + $0x4] sm:$0xc] }
 0x1b8   : > { %v2196_v30 = vsel %vm5267_vm13, %v2171_v35, %v2195_v40  ;;  %2596 = vmatmul.bf16.gmra.mxu3 %v2517_v59  ;;  %v2971_v2 = vunpack.c.l.b16 %v2952_v11  ;;  %v5873_v31 = vld [vmem:[#allocation2 + $0x20] sm:$0xff]  ;;  %v2977_v11 = vsel %vm1057_vm2, %v2974_v56, %v2976_v17 }
 0x1b9   : > { %2197 = vst [vmem:[#allocation2 + $0x2c] sm:$0x3] %v2196_v30  ;;  %v2305_v3 = vsel %vm351_vm0, %v2300_v13, %v2304_v36  ;;  %3378 = vmatpush.bf16.msra.mxu0 %v4534_v15  ;;  %v2308_v40 = vor.u32 %v2306_v28, %v2304_v36  ;;  %v4546_v13 = vld [vmem:[#allocation8 + $0x228] sm:$0xff]  ;;  %v3442_v24 = vrot.slane %v5873_v31, 3  ;;  %v3120_v36 = vunpack.c.l.b16 %v3081_v42 }
 0x1ba   : > { %2390 = vmatmul.bf16.gmra.mxu1 %v2305_v3  ;;  %v2972_v10 = vpack.c.b16 %v2657_v6, %v2971_v2  ;;  %v3138_v3 = vrot.slane %v5830_v38, 2  ;;  %v3275_v15 = vshrl.u32 %v5830_v38, 16  ;;  %v3293_v28 = vshrl.u32 %v5873_v31, 16 }
 0x1bb   : > { %3503 = vmatpush.bf16.msra.mxu1 %v4546_v13  ;;  %v5882_v59 = vsel %vm1523_vm4, %v3440_v34, %v3442_v24  ;;  %v3131_v52 = vpack.c.b16 %v3121_v57, %v3120_v36 }
 0x1bc   : > { %v2973_v6 = vrot.slane %v2972_v10, 2  ;;  %v3277_v34 = vrot.slane %v3275_v15, 2  ;;  %v3280_v10 = vrot.slane %v3278_v49, 3 }
 0x1bd   : > { %3379 = vmatpush.bf16.msra.mxu0 %v4533_v23  ;;  %v3137_v4 = vrot.slane %v3131_v52, 2  ;;  %v3267_v58 = vshrl.u32 %v3131_v52, 16  ;;  %v3270_v20 = vshll.u32 %v3131_v52, 16 }
 0x1be   : > { %v5849_v44 = vld [vmem:[#allocation2 + $0x24] sm:$0xff]  ;;  %v2975_v51 = vsel %vm1057_vm2, %v2973_v6, %v2974_v56  ;;  %v3281_v23 = vor.u32 %v3280_v10, %v3277_v34 }
 0x1bf   : > { %v2224_v60 = vld [vmem:[#allocation2 + $0x28] sm:$0x1]  ;;  %v2680_v8 = vrot.slane %v5849_v44, 1  ;;  %v2838_v19 = vshrl.u32 %v5849_v44, 16  ;;  %v2841_v29 = vshll.u32 %v5849_v44, 16  ;;  %v3139_v5 = vsel %vm1057_vm2, %v3137_v4, %v3138_v3  ;;  %3504 = vmatpush.bf16.msra.mxu1 %v4545_v18 }
 0x1c0   : > { %v2263_v50 = vunpack.c.l.b16 %v2224_v60  ;;  %v2627_v55 = vld [vmem:[#allocation2 + $0x2c] sm:$0x1]  ;;  %v3269_v38 = vrot.slane %v3267_v58, 2  ;;  %v3272_v60 = vrot.slane %v3270_v20, 3  ;;  %v2980_v26 = vrot.slane %v5849_v44, 2 }
 0x1c1   : > { %v2681_v1 = vsel %vm591_vm3, %v2678_v46, %v2680_v8  ;;  %v2840_v14 = vrot.slane %v2838_v19, 1  ;;  %v2843_v53 = vrot.slane %v2841_v29, 2  ;;  %v2666_v25 = vunpack.c.l.b16 %v2627_v55  ;;  %v5888_v45 = vld [vmem:[#allocation2 + $0x28] sm:$0xff] }
 0x1c2   : > { %v2269_v21 = vpack.c.b16 %v2263_v50, %v2263_v50  ;;  %2760 = vmatmul.bf16.gmra.mxu0 %v2681_v1  ;;  %v3444_v33 = vrot.slane %v5888_v45, 3  ;;  %v3273_v50 = vor.u32 %v3272_v60, %v3269_v38  ;;  %v4544_v1 = vld [vmem:[#allocation8 + $0x218] sm:$0xff]  ;;  %v3284_v19 = vshrl.u32 %v5835_v22, 16 }
 0x1c3   : > { %v5868_v39 = vor.u32 %v2843_v53, %v2840_v14  ;;  %v2672_v35 = vpack.c.b16 %v2666_v25, %v2666_v25  ;;  %3505 = vmatpush.bf16.msra.mxu1 %v4544_v1  ;;  %v3142_v14 = vrot.slane %v5873_v31, 2  ;;  %v4542_v25 = vld [vmem:[#allocation8 + $0x208] sm:$0xff]  ;;  %v3295_v44 = vrot.slane %v3293_v28, 2 }
 0x1c4   : > { %v2518_v12 = vrot.slane %v2269_v21, 1  ;;  %v2310_v27 = vshll.u32 %v2269_v21, 16  ;;  %v5900_v2 = vsel %vm1523_vm4, %v3442_v24, %v3444_v33  ;;  %v3282_v56 = vsel %vm1351_vm5, %v3273_v50, %v3281_v23 }
 0x1c5   : > { %3045 = vmatmul.bf16.vlgmr.msra.gmra.mxu2 %v2975_v51  ;;  %v5877_v48 = vsel %vm885_vm1, %v2835_v47, %v5868_v39  ;;  %v2682_v0 = vrot.slane %v2672_v35, 1  ;;  %v3140_v21 = vrot.slane %v5835_v22, 2  ;;  %v3302_v36 = vshrl.u32 %v5888_v45, 16 }
 0x1c6   : > { %v2312_v46 = vrot.slane %v2310_v27, 1  ;;  %v2519_v43 = vsel %vm591_vm3, %v2516_v62, %v2518_v12  ;;  %v3264_v62 = vunpack.c.l.b16 %v3245_v37  ;;  %v3286_v12 = vrot.slane %v3284_v19, 2 }
 0x1c7   : > { %v2683_v30 = vsel %vm591_vm3, %v2680_v8, %v2682_v0  ;;  %v2978_v8 = vrot.slane %v5801_v41, 2  ;;  %v3141_v29 = vsel %vm1057_vm2, %v3138_v3, %v3140_v21  ;;  %v4543_v41 = vld [vmem:[#allocation8 + $0x210] sm:$0xff]  ;;  %v4541_v0 = vld [vmem:[#allocation8 + $0x200] sm:$0xff]  ;;  %v3304_v4 = vrot.slane %v3302_v36, 2 }
 0x1c8   : > { %2601 = vmatmul.bf16.gmra.mxu3 %v2519_v43  ;;  %v2313_v32 = vsel %vm351_vm0, %v2308_v40, %v2312_v46  ;;  %v5890_v63 = vpack.c.b16 %v3264_v62, %v3264_v62  ;;  %3506 = vmatpush.bf16.msra.mxu1 %v4543_v41  ;;  %v3296_v46 = vshll.u32 %v5873_v31, 16  ;;  %v3143_v43 = vsel %vm1057_vm2, %v3140_v21, %v3142_v14  ;;  %v3091_v3 = vld [vmem:[#allocation2 + $0x30] sm:$0x3] }
 0x1c9   : > { %v2979_v6 = vsel %vm1057_vm2, %v2976_v17, %v2978_v8  ;;  %v2981_v53 = vsel %vm1057_vm2, %v2978_v8, %v2980_v26  ;;  %v3144_v31 = vrot.slane %v5888_v45, 2  ;;  %v3305_v17 = vshll.u32 %v5888_v45, 16 }
 0x1ca   : > { %2395 = vmatmul.bf16.gmra.mxu1 %v2313_v32  ;;  %v3446_v57 = vrot.slane %v5890_v63, 3  ;;  %v3298_v32 = vrot.slane %v3296_v46, 3 }
 0x1cb   : > { %v3307_v15 = vrot.slane %v3305_v17, 3 }
 0x1cc   : > { %v5903_v47 = vsel %vm1523_vm4, %v3444_v33, %v3446_v57  ;;  %3507 = vmatpush.bf16.msra.mxu1 %v4542_v25  ;;  %v3299_v13 = vor.u32 %v3298_v32, %v3295_v44  ;;  %v3130_v33 = vunpack.c.l.b16 %v3091_v3 }
 0x1cd   : > { %v3308_v20 = vor.u32 %v3307_v15, %v3304_v4 }
 0x1ce   : > { %v3136_v10 = vpack.c.b16 %v3130_v33, %v3130_v33 }
 0x1cf   : > { %v3309_v60 = vsel %vm1351_vm5, %v3299_v13, %v3308_v20 }
 0x1d0   : > { %3508 = vmatpush.bf16.msra.mxu1 %v4541_v0 }
 0x1d2   : > { %2765 = vmatmul.bf16.gmra.mxu0 %v2683_v30 }
 0x1d5   : > { %3050 = vmatmul.bf16.gmra.mxu2 %v2977_v11 }
 0x1d8   : > { %3209 = vmatmul.bf16.vlgmr.msra.gmra.mxu3 %v3139_v5 }
 0x1da   : > { %2916 = vmatmul.bf16.vlgmr.msrb.gmra.mxu1 %v5811_v9  ;;  %v3287_v9 = vshll.u32 %v5835_v22, 16  ;;  %v2781_v22 = vld [vmem:[#allocation2 + $0x2c] sm:$0x3] }
 0x1db   : > { %v2800_v40 = vunpack.c.l.b16 %v2781_v22 }
 0x1dc   : > { %v3289_v27 = vrot.slane %v3287_v9, 3  ;;  %v3311_v9 = vshrl.u32 %v5890_v63, 16 }
 0x1dd   : > { %v2801_v35 = vpack.c.b16 %v2800_v40, %v2800_v40 }
 0x1de   : > { %v3290_v55 = vor.u32 %v3289_v27, %v3286_v12 }
 0x1df   : > { %v2982_v42 = vrot.slane %v2801_v35, 2  ;;  %v2847_v18 = vshrl.u32 %v2801_v35, 16  ;;  %v2850_v45 = vshll.u32 %v2801_v35, 16 }
 0x1e0   : > { %v3291_v51 = vsel %vm1351_vm5, %v3281_v23, %v3290_v55  ;;  %v3300_v24 = vsel %vm1351_vm5, %v3290_v55, %v3299_v13 }
 0x1e1   : > { %v2983_v62 = vsel %vm1057_vm2, %v2980_v26, %v2982_v42  ;;  %v2849_v23 = vrot.slane %v2847_v18, 1  ;;  %v2852_v50 = vrot.slane %v2850_v45, 2  ;;  %v3313_v26 = vrot.slane %v3311_v9, 2 }
 0x1e2   : > { %3380 = vmatmul.bf16.vlgmr.msra.gmra.mxu0 %v3282_v56 }
 0x1e3   : > { %v2853_v19 = vor.u32 %v2852_v50, %v2849_v23 }
 0x1e5   : > { %3055 = vmatmul.bf16.gmra.mxu2 %v2979_v6  ;;  %v2854_v55 = vsel %vm885_vm1, %v5868_v39, %v2853_v19 }
 0x1e8   : > { %3214 = vmatmul.bf16.gmra.mxu3 %v3141_v29  ;;  %v3314_v29 = vshll.u32 %v5890_v63, 16 }
 0x1ea   : > { %2921 = vmatmul.bf16.gmra.mxu1 %v5842_v54 }
 0x1f2   : > { %3385 = vmatmul.bf16.gmra.mxu0 %v3291_v51  ;;  %v3316_v51 = vrot.slane %v3314_v29, 3 }
 0x1f4   : > { %v3317_v46 = vor.u32 %v3316_v51, %v3313_v26 }
 0x1f5   : > { %3060 = vmatmul.bf16.gmra.mxu2 %v2981_v53 }
 0x1f6   : > { %v3318_v63 = vsel %vm1351_vm5, %v3308_v20, %v3317_v46 }
 0x1f8   : > { %v2463_v54 = vpop.f32.mrf.mxu2  ;;  %3219 = vmatmul.bf16.gmra.mxu3 %v3143_v43 }
 0x1fa   : > { %2926 = vmatmul.bf16.gmra.mxu1 %v5854_v61  ;;  %v3145_v61 = vsel %vm1057_vm2, %v3142_v14, %v3144_v31 }
 0x200   : > { %v2465_v37 = vpop.f32.mrf.mxu2 }
 0x202   : > { %3390 = vmatmul.bf16.gmra.mxu0 %v3300_v24 }
 0x205   : > { %3065 = vmatmul.bf16.gmra.mxu2 %v2983_v62 }
 0x207   : > { %v2376_v52 = vpop.f32.mrf.mxu1 }
 0x208   : > { %v2464_v30 = vadd.f32 %v2463_v54, %v2376_v52  ;;  %3224 = vmatmul.bf16.gmra.mxu3 %v3145_v61  ;;  %v2468_v11 = vpop.f32.mrf.mxu2 }
 0x20a   : > { %2931 = vmatmul.bf16.gmra.mxu1 %v5877_v48  ;;  %v3146_v48 = vrot.slane %v3136_v10, 2 }
 0x20b   : > { %v2582_v49 = vpop.f32.mrf.mxu3 }
 0x20c   : > { %v2607_v57 = vadd.f32 %v2582_v49, %v2464_v30  ;;  %v3147_v27 = vsel %vm1057_vm2, %v3144_v31, %v3146_v48 }
 0x20d   : > { %v2746_v5 = vpop.f32.mrf.mxu0 }
 0x20e   : > { %v5929_v58 = vadd.f32 %v2746_v5, %v2607_v57 }
 0x20f   : > { %v2378_v34 = vpop.f32.mrf.mxu1 }
 0x210   : > { %v2466_v38 = vadd.f32 %v2465_v37, %v2378_v34  ;;  %v2470_v8 = vpop.f32.mrf.mxu2 }
 0x212   : > { %3395 = vmatmul.bf16.gmra.mxu0 %v3309_v60 }
 0x213   : > { %v2584_v56 = vpop.f32.mrf.mxu3 }
 0x214   : > { %v2608_v21 = vadd.f32 %v2584_v56, %v2466_v38 }
 0x215   : > { %v2748_v1 = vpop.f32.mrf.mxu0 }
 0x216   : > { %v5932_v6 = vadd.f32 %v2748_v1, %v2608_v21 }
 0x217   : > { %v2381_v12 = vpop.f32.mrf.mxu1 }
 0x218   : > { %v2469_v41 = vadd.f32 %v2468_v11, %v2381_v12  ;;  %3229 = vmatmul.bf16.gmra.mxu3 %v3147_v27  ;;  %v2473_v22 = vpop.f32.mrf.mxu2 }
 0x21a   : > { %2936 = vmatmul.bf16.gmra.mxu1 %v2854_v55 }
 0x21b   : > { %v2587_v14 = vpop.f32.mrf.mxu3 }
 0x21c   : > { %v2609_v53 = vadd.f32 %v2587_v14, %v2469_v41 }
 0x21d   : > { %v2751_v28 = vpop.f32.mrf.mxu0 }
 0x21e   : > { %v2773_v25 = vadd.f32 %v2751_v28, %v2609_v53 }
 0x21f   : > { %v2383_v54 = vpop.f32.mrf.mxu1 }
 0x220   : > { %v2471_v43 = vadd.f32 %v2470_v8, %v2383_v54  ;;  %v2475_v35 = vpop.f32.mrf.mxu2 }
 0x222   : > { %3400 = vmatmul.bf16.gmra.mxu0 %v3318_v63 }
 0x223   : > { %v2589_v40 = vpop.f32.mrf.mxu3 }
 0x224   : > { %v2610_v44 = vadd.f32 %v2589_v40, %v2471_v43 }
 0x225   : > { %v2753_v32 = vpop.f32.mrf.mxu0 }
 0x226   : > { %v2774_v13 = vadd.f32 %v2753_v32, %v2610_v44 }
 0x227   : > { %v2386_v39 = vpop.f32.mrf.mxu1 }
 0x228   : > { %v2474_v37 = vadd.f32 %v2473_v22, %v2386_v39  ;;  %v2478_v36 = vpop.f32.mrf.mxu2 }
 0x22a   : > { %3509 = vmatmul.bf16.vlgmr.msra.gmra.mxu1 %v5847_v7 }
 0x22b   : > { %v2592_v42 = vpop.f32.mrf.mxu3 }
 0x22c   : > { %v2611_v24 = vadd.f32 %v2592_v42, %v2474_v37 }
 0x22d   : > { %v2756_v31 = vpop.f32.mrf.mxu0 }
 0x22e   : > { %v2775_v0 = vadd.f32 %v2756_v31, %v2611_v24 }
 0x22f   : > { %v2388_v62 = vpop.f32.mrf.mxu1 }
 0x230   : > { %v2476_v17 = vadd.f32 %v2475_v35, %v2388_v62  ;;  %v2480_v15 = vpop.f32.mrf.mxu2 }
 0x233   : > { %v2594_v52 = vpop.f32.mrf.mxu3 }
 0x234   : > { %v2612_v61 = vadd.f32 %v2594_v52, %v2476_v17 }
 0x235   : > { %v2758_v30 = vpop.f32.mrf.mxu0 }
 0x236   : > { %v2776_v3 = vadd.f32 %v2758_v30, %v2612_v61 }
 0x237   : > { %v2391_v11 = vpop.f32.mrf.mxu1 }
 0x238   : > { %v2479_v4 = vadd.f32 %v2478_v36, %v2391_v11  ;;  %v2483_v34 = vpop.f32.mrf.mxu2 }
 0x23a   : > { %3514 = vmatmul.bf16.gmra.mxu1 %v5857_v16 }
 0x23b   : > { %v2597_v49 = vpop.f32.mrf.mxu3 }
 0x23c   : > { %v2613_v33 = vadd.f32 %v2597_v49, %v2479_v4  ;;  %v5958_v4 = vld [vmem:[%s6020_s4] ss:$0 sm:$0xff] }
 0x23f   : > { %v2761_v57 = vpop.f32.mrf.mxu0  ;;  %v2393_v7 = vpop.f32.mrf.mxu1 }
 0x240   : > { %v2777_v5 = vadd.f32 %v2761_v57, %v2613_v33  ;;  %v2481_v20 = vadd.f32 %v2480_v15, %v2393_v7  ;;  %v2485_v56 = vpop.f32.mrf.mxu2 }
 0x243   : > { %v2599_v18 = vpop.f32.mrf.mxu3 }
 0x244   : > { %v2614_v45 = vadd.f32 %v2599_v18, %v2481_v20 }
 0x247   : > { %v2763_v10 = vpop.f32.mrf.mxu0  ;;  %v2396_v38 = vpop.f32.mrf.mxu1 }
 0x248   : > { %v2778_v60 = vadd.f32 %v2763_v10, %v2614_v45  ;;  %v2484_v23 = vadd.f32 %v2483_v34, %v2396_v38  ;;  %v3046_v40 = vpop.f32.mrf.mxu2 }
 0x24a   : > { %3519 = vmatmul.bf16.gmra.mxu1 %v5882_v59 }
 0x24b   : > { %v2602_v50 = vpop.f32.mrf.mxu3 }
 0x24c   : > { %v2615_v8 = vadd.f32 %v2602_v50, %v2484_v23 }
 0x24f   : > { %v2766_v48 = vpop.f32.mrf.mxu0  ;;  %v2398_v16 = vpop.f32.mrf.mxu1 }
 0x250   : > { %v2779_v21 = vadd.f32 %v2766_v48, %v2615_v8  ;;  %v2486_v1 = vadd.f32 %v2485_v56, %v2398_v16 }
 0x253   : > { %v2604_v19 = vpop.f32.mrf.mxu3 }
 0x254   : > { %v2616_v9 = vadd.f32 %v2604_v19, %v2486_v1 }
 0x257   : > { %v2768_v29 = vpop.f32.mrf.mxu0  ;;  %v2917_v12 = vpop.f32.mrf.mxu1 }
 0x258   : > { %v2780_v27 = vadd.f32 %v2768_v29, %v2616_v9  ;;  %v2942_v41 = vadd.f32 %v2917_v12, %v5929_v58 }
 0x25a   : > { %3524 = vmatmul.bf16.gmra.mxu1 %v5900_v2  ;;  %v3071_v31 = vadd.f32 %v3046_v40, %v2942_v41 }
 0x25b   : > { %v3210_v58 = vpop.f32.mrf.mxu3 }
 0x25c   : > { %v3235_v62 = vadd.f32 %v3210_v58, %v3071_v31 }
 0x25f   : > { %v2919_v55 = vpop.f32.mrf.mxu1  ;;  %v3381_v32 = vpop.f32.mrf.mxu0 }
 0x260   : > { %v2943_v26 = vadd.f32 %v2919_v55, %v5932_v6  ;;  %v3048_v6 = vpop.f32.mrf.mxu2  ;;  %v3406_v61 = vadd.f32 %v3381_v32, %v3235_v62 }
 0x262   : > { %v3072_v36 = vadd.f32 %v3048_v6, %v2943_v26 }
 0x263   : > { %v3212_v35 = vpop.f32.mrf.mxu3 }
 0x264   : > { %v3236_v30 = vadd.f32 %v3212_v35, %v3072_v36 }
 0x267   : > { %v2922_v59 = vpop.f32.mrf.mxu1 }
 0x268   : > { %v2944_v51 = vadd.f32 %v2922_v59, %v2773_v25 }
 0x26a   : > { %3529 = vmatmul.bf16.gmra.mxu1 %v5903_v47  ;;  %v3383_v47 = vpop.f32.mrf.mxu0 }
 0x26b   : > { %v3215_v24 = vpop.f32.mrf.mxu3  ;;  %v3407_v15 = vadd.f32 %v3383_v47, %v3236_v30 }
 0x26f   : > { %v2924_v14 = vpop.f32.mrf.mxu1 }
 0x270   : > { %v2945_v53 = vadd.f32 %v2924_v14, %v2774_v13  ;;  %v3051_v13 = vpop.f32.mrf.mxu2 }
 0x277   : > { %v2927_v22 = vpop.f32.mrf.mxu1 }
 0x278   : > { %v2946_v28 = vadd.f32 %v2927_v22, %v2775_v0  ;;  %v3386_v0 = vpop.f32.mrf.mxu0  ;;  %v3053_v52 = vpop.f32.mrf.mxu2 }
 0x27f   : > { %v2929_v46 = vpop.f32.mrf.mxu1 }
 0x280   : > { %v2947_v54 = vadd.f32 %v2929_v46, %v2776_v3  ;;  %v3217_v3 = vpop.f32.mrf.mxu3  ;;  %v3388_v49 = vpop.f32.mrf.mxu0 }
 0x281   : > { %v3056_v18 = vpop.f32.mrf.mxu2 }
 0x287   : > { %v2932_v43 = vpop.f32.mrf.mxu1 }
 0x288   : > { %v5947_v63 = vadd.f32 %v2932_v43, %v2777_v5  ;;  %v3073_v5 = vadd.f32 %v3051_v13, %v2944_v51  ;;  %v3220_v10 = vpop.f32.mrf.mxu3  ;;  %v3391_v8 = vpop.f32.mrf.mxu0 }
 0x28a   : > { %v3237_v38 = vadd.f32 %v3215_v24, %v3073_v5 }
 0x28c   : > { %v3408_v56 = vadd.f32 %v3386_v0, %v3237_v38 }
 0x28f   : > { %v2934_v44 = vpop.f32.mrf.mxu1 }
 0x290   : > { %v5949_v2 = vadd.f32 %v2934_v44, %v2778_v60  ;;  %v3074_v60 = vadd.f32 %v3053_v52, %v2945_v53  ;;  %v3222_v19 = vpop.f32.mrf.mxu3  ;;  %v3393_v55 = vpop.f32.mrf.mxu0 }
 0x292   : > { %v3238_v48 = vadd.f32 %v3217_v3, %v3074_v60 }
 0x294   : > { %v3409_v1 = vadd.f32 %v3388_v49, %v3238_v48 }
 0x297   : > { %v2937_v25 = vpop.f32.mrf.mxu1 }
 0x298   : > { %v5951_v39 = vadd.f32 %v2937_v25, %v2779_v21  ;;  %v3058_v21 = vpop.f32.mrf.mxu2  ;;  %v3225_v43 = vpop.f32.mrf.mxu3 }
 0x299   : > { %v3076_v14 = vadd.f32 %v3058_v21, %v2947_v54  ;;  %v3396_v32 = vpop.f32.mrf.mxu0 }
 0x29b   : > { %v3240_v58 = vadd.f32 %v3222_v19, %v3076_v14 }
 0x29d   : > { %v3411_v6 = vadd.f32 %v3393_v55, %v3240_v58 }
 0x29f   : > { %v2939_v37 = vpop.f32.mrf.mxu1 }
 0x2a0   : > { %v5953_v42 = vadd.f32 %v2939_v37, %v2780_v27  ;;  %v3075_v27 = vadd.f32 %v3056_v18, %v2946_v28  ;;  %v3061_v22 = vpop.f32.mrf.mxu2  ;;  %v3227_v37 = vpop.f32.mrf.mxu3 }
 0x2a1   : > { %v3077_v13 = vadd.f32 %v3061_v22, %v5947_v63 }
 0x2a2   : > { %v3239_v51 = vadd.f32 %v3220_v10, %v3075_v27 }
 0x2a3   : > { %v3241_v0 = vadd.f32 %v3225_v43, %v3077_v13 }
 0x2a4   : > { %v3410_v40 = vadd.f32 %v3391_v8, %v3239_v51 }
 0x2a7   : > { %v3510_v17 = vpop.f32.mrf.mxu1 }
 0x2a8   : > { %v3535_v11 = vadd.f32 %v3510_v17, %v3406_v61  ;;  %v3063_v47 = vpop.f32.mrf.mxu2  ;;  %v3398_v17 = vpop.f32.mrf.mxu0  ;;  %v3412_v61 = vadd.f32 %v3396_v32, %v3241_v0 }
 0x2a9   : > { %v3078_v62 = vadd.f32 %v3063_v47, %v5949_v2 }
 0x2aa   : > { %v3549_v57 = vadd.f32 %v5958_v4, %v3535_v11 }
 0x2ab   : > { %v3242_v30 = vadd.f32 %v3227_v37, %v3078_v62 }
 0x2ac   : > { %v3559_v45 = vmax.f32 %v3549_v57, 0.0 }
 0x2ad   : > { %v3413_v49 = vadd.f32 %v3398_v17, %v3242_v30 }
 0x2af   : > { %v3512_v33 = vpop.f32.mrf.mxu1 }
 0x2b0   : > { %v3536_v7 = vadd.f32 %v3512_v33, %v3407_v15  ;;  %v3066_v3 = vpop.f32.mrf.mxu2  ;;  %v3230_v15 = vpop.f32.mrf.mxu3 }
 0x2b1   : > { %v3079_v63 = vadd.f32 %v3066_v3, %v5951_v39  ;;  %v3401_v5 = vpop.f32.mrf.mxu0 }
 0x2b2   : > { %v3550_v20 = vadd.f32 %v5958_v4, %v3536_v7 }
 0x2b3   : > { %v3243_v2 = vadd.f32 %v3230_v15, %v3079_v63 }
 0x2b4   : > { %v3560_v34 = vmax.f32 %v3550_v20, 0.0 }
 0x2b5   : > { %v3414_v10 = vadd.f32 %v3401_v5, %v3243_v2 }
 0x2b6   : > { %v4560_v23 = vpack.c.bf16 %v3560_v34, %v3559_v45 }
 0x2b7   : > { %v3515_v50 = vpop.f32.mrf.mxu1 }
 0x2b8   : > { %4561 = vst [vmem:[%s5963_s13] sm:$0xff] %v4560_v23   ;;  %v3537_v16 = vadd.f32 %v3515_v50, %v3408_v56  ;;  %v3068_v34 = vpop.f32.mrf.mxu2  ;;  %v3232_v23 = vpop.f32.mrf.mxu3 }
 0x2b9   : > { %v3080_v38 = vadd.f32 %v3068_v34, %v5953_v42  ;;  %v3403_v48 = vpop.f32.mrf.mxu0 }
 0x2ba   : > { %v3551_v29 = vadd.f32 %v5958_v4, %v3537_v16 }
 0x2bb   : > { %v3244_v8 = vadd.f32 %v3232_v23, %v3080_v38 }
 0x2bc   : > { %v3561_v26 = vmax.f32 %v3551_v29, 0.0 }
 0x2bd   : > { %v3415_v16 = vadd.f32 %v3403_v48, %v3244_v8 }
 0x2bf   : > { %v3517_v9 = vpop.f32.mrf.mxu1 }
 0x2c0   : > { %v3538_v12 = vadd.f32 %v3517_v9, %v3409_v1 }
 0x2c2   : > { %v3552_v41 = vadd.f32 %v5958_v4, %v3538_v12 }
 0x2c4   : > { %v3562_v59 = vmax.f32 %v3552_v41, 0.0 }
 0x2c6   : > { %v4565_v53 = vpack.c.bf16 %v3562_v59, %v3561_v26 }
 0x2c7   : > { %v3520_v46 = vpop.f32.mrf.mxu1 }
 0x2c8   : > { %4588 = vst [vmem:[%s5963_s13 + $0x8] sm:$0xff] %v4565_v53   ;;  %v3539_v44 = vadd.f32 %v3520_v46, %v3410_v40 }
 0x2ca   : > { %v3553_v28 = vadd.f32 %v5958_v4, %v3539_v44 }
 0x2cc   : > { %v3563_v24 = vmax.f32 %v3553_v28, 0.0 }
 0x2cf   : > { %v3522_v35 = vpop.f32.mrf.mxu1 }
 0x2d0   : > { %v3540_v25 = vadd.f32 %v3522_v35, %v3411_v6 }
 0x2d2   : > { %v3554_v54 = vadd.f32 %v5958_v4, %v3540_v25 }
 0x2d4   : > { %v3564_v31 = vmax.f32 %v3554_v54, 0.0 }
 0x2d6   : > { %v4570_v36 = vpack.c.bf16 %v3564_v31, %v3563_v24 }
 0x2d7   : > { %v3525_v52 = vpop.f32.mrf.mxu1 }
 0x2d8   : > { %4589 = vst [vmem:[%s5963_s13 + $0x10] sm:$0xff] %v4570_v36   ;;  %v3541_v11 = vadd.f32 %v3525_v52, %v3412_v61 }
 0x2da   : > { %v3555_v57 = vadd.f32 %v5958_v4, %v3541_v11 }
 0x2dc   : > { %v3565_v18 = vmax.f32 %v3555_v57, 0.0 }
 0x2df   : > { %v3527_v33 = vpop.f32.mrf.mxu1 }
 0x2e0   : > { %v3542_v7 = vadd.f32 %v3527_v33, %v3413_v49 }
 0x2e2   : > { %v3556_v20 = vadd.f32 %v5958_v4, %v3542_v7 }
 0x2e4   : > { %v3566_v45 = vmax.f32 %v3556_v20, 0.0 }
 0x2e6   : > { %v4575_v60 = vpack.c.bf16 %v3566_v45, %v3565_v18 }
 0x2e7   : > { %v3530_v50 = vpop.f32.mrf.mxu1 }
 0x2e8   : > { %4590 = vst [vmem:[%s5963_s13 + $0x18] sm:$0xff] %v4575_v60   ;;  %v3543_v39 = vadd.f32 %v3530_v50, %v3414_v10 }
 0x2ea   : > { %v3557_v56 = vadd.f32 %v5958_v4, %v3543_v39 }
 0x2ec   : > { %v3567_v19 = vmax.f32 %v3557_v56, 0.0 }
 0x2ef   : > { %v3532_v21 = vpop.f32.mrf.mxu1 }
 0x2f0   : > { %v3544_v1 = vadd.f32 %v3532_v21, %v3415_v16 }
 0x2f2   : > { %v3558_v42 = vadd.f32 %v5958_v4, %v3544_v1 }
 0x2f4   : > { %v3568_v9 = vmax.f32 %v3558_v42, 0.0 }
 0x2f6   : > { %v4580_v29 = vpack.c.bf16 %v3568_v9, %v3567_v19 }
 0x2f8   : > { %4591 = vst [vmem:[%s5963_s13 + $0x20] sm:$0xff] %v4580_v29  }
 0x2f9   : > { %4804 = shalt.err (!%p4801_p10)
}
 0x2fa   : > { %s4854_s1 = smov 64   ;;  %s4855_s9 = smov 4  }
 0x2fb   : > { %4623 = dma.vmem_to_hbm [thread:$0]  (%p4958_p3), %s3603_s28, 640, %s3605_s26, %s3590_s27, %s4854_s1, %s4854_s1, %s4855_s9  }
 0x2fc PF: > { %s3619_s12 = sand.u32 1, %s4835_s18   ;;  %p6081_p12 = scmp.ge.s32.totalorder %s4847_s21, 2 }
 0x2fd   : > { %s3620_s13 = scalar_lea.sflag [#allocation5], %s3619_s12 }
 0x2fe   : > { %p4637_p13 = pnand %p6081_p12, %p4921_p6 }
 0x300   : > { %p4638_p0 = pneg %p4637_p13 }
 0x302   : > { %4830 = dma.done.wait (%p4638_p0), %s3620_s13, 640  }
 0x303   : > { %4832 = vsyncadd (%p4638_p0), %s3620_s13, 4294966656  ;;  %p19_p5 = scmp.ge.s32.totalorder %s4948_s14, 4   ;;  %s6082_s18 = smov %s4839_s19 }
 0x304   : > { %s6083_s19 = smov %s4843_s20  ;;  %s6084_s20 = smov %s4964_s23 }
 0x305   : > { %s6085_s21 = smov %s4948_s14  ;;  %21 = sbr.rel (!%p19_p5) target bundleno = 8 (0x8), region = 109 }
 0x30a   :  { %3626 = vsyncpa [#allocation4], 1 }
 0x30b   :  { %3628 = vsyncpa [#allocation4 + $0x1], 1 }
 0x30c   :  { %3629 = vsyncpa [#allocation7], 1 }
 0x30d   :  { %3630 = vsyncpa [#allocation5], 1 }
 0x30e   :  { %3632 = vsyncpa [#allocation5 + $0x1], 1 }

// kernel: tpu_custom_call.1
= control target key start
LH: loop header
LB: loop body
LE: loop exit
PB: predicated region body
PF: predicated region fallthrough
CT: control target
= control target key end

     0   :  { %s6016_s0 = inlined_call_operand.hbm [shape: bf16[2,104,128], index: 0, kind: input, shape index: {}]   ;;  %s6017_s1 = inlined_call_operand.hbm [shape: bf16[9,128,128], index: 1, kind: input, shape index: {}]   ;;  %s6018_s2 = inlined_call_operand.vmem [shape: f32[1,128], index: 2, kind: input, shape index: {}]   ;;  %s6019_s3 = inlined_call_operand.hbm [shape: bf16[9,128,128], index: 3, kind: input, shape index: {}]   ;;  %s6020_s4 = inlined_call_operand.vmem [shape: f32[1,128], index: 4, kind: input, shape index: {}]   ;;  %s6021_s5 = inlined_call_operand.hbm [shape: bf16[2,80,128], index: 5, kind: output, shape index: {}]  }
   0x1   :  { %6024 = sst [smem:[#allocation13_spill]] %s6017_s1 }
   0x2   :  { %10 = vsyncpa [#allocation4], 0 }
   0x3   :  { %12 = vsyncpa [#allocation4 + $0x1], 0 }
   0x4   :  { %13 = vsyncpa [#allocation7], 0 }
   0x5   :  { %14 = vsyncpa [#allocation5], 0 }
   0x6   :  { %16 = vsyncpa [#allocation5 + $0x1], 0  ;;  %s4886_s18 = smov 0   ;;  %s4888_s19 = smov 0  }
   0x7   :  { %s4890_s20 = smov 0   ;;  %s4892_s21 = smov 0  }
   0x8 LB: > { %s4907_s22 = sadd.s32 4294967295, %s4847_s21   ;;  %s3697_s23 = sadd.s32 4294967294, %s4847_s21   ;;  %s4847_s21 = sphi %s4892_s21, %s6085_s21   ;;  %s4843_s20 = sphi %s4890_s20, %s6084_s20   ;;  %s4839_s19 = sphi %s4888_s19, %s6083_s19   ;;  %s4835_s18 = sphi %s4886_s18, %s6082_s18  }
   0x9   : > { %p42_p0 = scmp.ne.s32.totalorder %s4839_s19, %s4835_s18  ;;  %p43_p1 = scmp.eq.s32.totalorder %s4907_s22, 0 }
   0xa   : > { %p150_p2 = scmp.eq.s32.totalorder %s4907_s22, 1  ;;  %p156_p3 = scmp.eq.s32.totalorder %s3697_s23, 1 }
   0xb   : > { %p4916_p4 = por %p43_p1, %p42_p0  ;;  %p3698_p5 = scmp.ge.s32.totalorder %s4847_s21, 1 }
   0xc   : > { %p4921_p6 = por %p156_p3, %p42_p0  ;;  %p163_p7 = scmp.lt.s32.totalorder %s4847_s21, 3 }
   0xd   : > { %s6027_s1 = sld [smem:[#allocation13_spill]]  ;;  %s4849_s30 = smov [#allocation6]  }
   0xe   : > { %p4929_p8 = pnand %p3698_p5, %p163_p7  ;;  %s176_s6 = sshll.u32 %s4849_s30, 4  ;;  %s177_s6 = int_to_ptr.vmem [resolvable:$true] %s176_s6 }
   0xf   : > { %s191_s9 = sshll.u32 %s6019_s3, 4  ;;  %s6022_s10 = smov 64   ;;  %s192_s9 = int_to_ptr.hbm [resolvable:$true] %s191_s9 }
  0x10   : > { %p4625_p9 = pneg %p4929_p8  ;;  %s6023_s11 = smov 4  }
  0x11   : > { %s4852_s12 = smov [#allocation8]   ;;  %s4948_s14 = sadd.s32 1, %s4847_s21  }
  0x12   : > { %p4626_p10 = pnand %p4625_p9, %p43_p1  ;;  %s193_s13 = sshll.u32 %s4852_s12, 4  ;;  %s194_s13 = int_to_ptr.vmem [resolvable:$true] %s193_s13 }
  0x13   : > { %s174_s28 = sshll.u32 %s6027_s1, 4  ;;  %s29_s15 = sadd.s32 1, %s4843_s20  ;;  %s175_s28 = int_to_ptr.hbm [resolvable:$true] %s174_s28 }
  0x14   : > { %4628 = dma.hbm_to_vmem [thread:$0]  (!%p4626_p10), %s175_s28, 9216, %s177_s6, [#allocation7], %s6022_s10, %s6022_s10, %s6023_s11  }
  0x15   : > { %4631 = dma.hbm_to_vmem [thread:$0]  (!%p4626_p10), %s192_s9, 9216, %s194_s13, [#allocation7], %s6022_s10, %s6022_s10, %s6023_s11  }
  0x16   : > { %s26_s16 = ssub.s32 %s4847_s21, %s4948_s14  ;;  %p36_p12 = scmp.ne.s32.totalorder %s4843_s20, %s4839_s19 }
  0x17   : > { %p27_p13 = scmp.eq.s32.totalorder %s26_s16, 0  ;;  %p37_p0 = scmp.eq.s32.totalorder %s4847_s21, 0 }
  0x18   : > { %p4958_p3 = por %p150_p2, %p36_p12  ;;  %p4642_p5 = scmp.lt.s32.totalorder %s4847_s21, 2 }
  0x19   : > { %s4964_s23 = scalar_select %p27_p13, %s4843_s20, %s29_s15  }
  0x1a   : > { %p38_p7 = por %p37_p0, %p36_p12  ;;  %s210_s26 = sand.u32 1, %s4843_s20  }
  0x1b   : > { %s4608_s27 = smul.u32 52, %s210_s26  ;;  %s211_s15 = scalar_lea.sflag [#allocation4], %s210_s26 }
  0x1c   : > { %s4609_s28 = smul.u32 52, %s4847_s21  ;;  %p4968_p9 = pnand %p4642_p5, %p38_p7 }
  0x1d   : > { %s214_s9 = scalar_lea.vmem [#allocation3], %s4608_s27  ;;  %s4754_s6 = scalar_lea.hbm %s6016_s0, 104 }
  0x1e   : > { %s219_s8 = scalar_lea.hbm %s6016_s0, %s4609_s28  ;;  %s222_s12 = sshll.u32 %s214_s9, 4  ;;  %s223_s12 = int_to_ptr.vmem [resolvable:$true] %s222_s12 }
  0x1f   : > { %s220_s13 = sshll.u32 %s219_s8, 4  ;;  %p4751_p10 = pneg %p4968_p9  ;;  %s221_s13 = int_to_ptr.hbm [resolvable:$true] %s220_s13 }
  0x20   : > { %s4747_s16 = sshra.s32 %s221_s13, 4  ;;  %s4748_s16 = int_to_ptr.hbm [resolvable:$true] %s4747_s16 }
  0x21   : > { %s4749_s10 = scalar_lea.hbm %s4748_s16, 52  ;;  %p4755_p0 = scmp.lt.s32.totalorder %s4748_s16, %s6016_s0 }
  0x22   : > { %p4750_p2 = scmp.ne.s32.totalorder %s4748_s16, %s4749_s10  ;;  %p4756_p5 = scmp.lt.s32.totalorder %s4754_s6, %s4749_s10 }
  0x24   : > { %p4752_p12 = pnand %p4751_p10, %p4750_p2  ;;  %p4757_p7 = por %p4756_p5, %p4755_p0 }
  0x26   : > { %p4753_p13 = pneg %p4752_p12 }
  0x28   : > { %p4758_p11 = pnand %p4757_p7, %p4753_p13 }
  0x2a   : > { %4761 = shalt.err (!%p4758_p11)
}
  0x2b   : > { %s6031_s26 = smov 4   ;;  %s6032_s27 = smov 64  }
  0x2c   : > { %4635 = dma.hbm_to_vmem [thread:$0]  (!%p4968_p9), %s221_s13, 832, %s223_s12, %s211_s15, %s6032_s27, %s6032_s27, %s6031_s26  }
  0x2d   : > { %234 = sbr.rel (%p4929_p8) target bundleno = 764 (0x2fc), region = 40  ;;  %s4991_s1 = sand.u32 (!%p4929_p8), 1, %s4839_s19  }
  0x2e   : > { %s4610_s11 = smul.u32 (!%p4929_p8), 52, %s4991_s1  ;;  %s237_s10 = scalar_lea.sflag (!%p4929_p8), [#allocation4], %s4991_s1 }
  0x30   : > { %s4995_s8 = scalar_lea.vmem (!%p4929_p8), [#allocation3], %s4610_s11 }
  0x32   : > { %4822 = dma.done.wait (%p4916_p4), %s237_s10, 832  }
  0x33   : > { %4824 = vsyncadd (%p4916_p4), %s237_s10, 4294966464 }
  0x34   : > { %4826 = dma.done.wait (%p43_p1), [#allocation7], 18432  }
  0x35   : > { %4828 = vsyncadd (%p43_p1), [#allocation7], 4294948864  ;;  %v4400_v0 = vld [vmem:[#allocation6 + $0x78] sm:$0xff]  ;;  %v4399_v2 = vld [vmem:[#allocation6 + $0x70] sm:$0xff]  ;;  %vm351_vm0 = vsmask.f32 7424 }
  0x36   : > { %v4392_v1 = vld [vmem:[#allocation6 + $0x38] sm:$0xff]  ;;  %4592 = vmatpush.bf16.msra.mxu2 %v4400_v0  ;;  %v4391_v3 = vld [vmem:[#allocation6 + $0x30] sm:$0xff]  ;;  %449 = vmatpush.bf16.msra.mxu0 %v4400_v0  ;;  %v4398_v4 = vld [vmem:[#allocation6 + $0x68] sm:$0xff]  ;;  %vm885_vm1 = vsmask.f32 6400  ;;  %vm1057_vm2 = vcmask 1045504  }
  0x37   : > { %4600 = vmatpush.bf16.msra.mxu3 %v4392_v1  ;;  %536 = vmatpush.bf16.msra.mxu1 %v4392_v1  ;;  %v4390_v5 = vld [vmem:[#allocation6 + $0x28] sm:$0xff]  ;;  %v4397_v6 = vld [vmem:[#allocation6 + $0x60] sm:$0xff]  ;;  %v4396_v8 = vld [vmem:[#allocation6 + $0x58] sm:$0xff]  ;;  %vm591_vm3 = vcmask 1046528   ;;  %vm1523_vm4 = vcmask 1044480   ;;  %vm2058_vm10 = vcmask 1041408  }
  0x38   : > { %v4389_v7 = vld [vmem:[#allocation6 + $0x20] sm:$0xff]  ;;  %v4388_v9 = vld [vmem:[#allocation6 + $0x18] sm:$0xff]  ;;  %v4395_v11 = vld [vmem:[#allocation6 + $0x50] sm:$0xff]  ;;  %vm1351_vm5 = vsmask.f32 5376  ;;  %vm2064_vm14 = vcmask 1043457  }
  0x39   : > { %v5006_v10 = vld [vmem:[%s4995_s8 + $0x10] sm:$0xff]  ;;  %v4387_v12 = vld [vmem:[#allocation6 + $0x10] sm:$0xff]  ;;  %vm2059_vm11 = vsmask.f32 1280  ;;  %vm2065_vm15 = vsmask.f32 7942 }
  0x3a   : > { %4593 = vmatpush.bf16.msra.mxu2 %v4399_v2  ;;  %450 = vmatpush.bf16.msra.mxu0 %v4399_v2  ;;  %v5009_v13 = vld [vmem:[%s4995_s8 + $0x18] sm:$0xff]  ;;  %v368_v14 = vshll.u32 %v5006_v10, 16  ;;  %v4550_v15 = vld [vmem:[%s4995_s8] sm:$0xff]   ;;  %v5014_v16 = vld [vmem:[%s4995_s8 + $0x8] sm:$0xff]  ;;  %v372_v21 = vshrl.u32 %v5006_v10, 16  ;;  %s4611_s12 = smul.u32 40, %s4991_s1 }
  0x3b   : > { %4601 = vmatpush.bf16.msra.mxu3 %v4391_v3  ;;  %537 = vmatpush.bf16.msra.mxu1 %v4391_v3  ;;  %v355_v17 = vshll.u32 %v4550_v15, 16  ;;  %v4394_v18 = vld [vmem:[#allocation6 + $0x48] sm:$0xff]  ;;  %v376_v22 = vshll.u32 %v5009_v13, 16  ;;  %v353_v23 = vshrl.u32 %v4550_v15, 16  ;;  %v360_v25 = vshll.u32 %v5014_v16, 16  ;;  %v4393_v26 = vld [vmem:[#allocation6 + $0x40] sm:$0xff]  ;;  %vm5267_vm13 = vmand %vm2058_vm10, %vm2059_vm11 }
  0x3c   : > { %v4386_v19 = vld [vmem:[#allocation6 + $0x8] sm:$0xff]  ;;  %v5016_v20 = vrot.slane %v368_v14, 1  ;;  %v4385_v27 = vld [vmem:[#allocation6] sm:$0xff]  ;;  %v4408_v30 = vld [vmem:[#allocation6 + $0xb8] sm:$0xff]  ;;  %v380_v45 = vshrl.u32 %v5009_v13, 16  ;;  %v364_v51 = vshrl.u32 %v5014_v16, 16 }
  0x3d   : > { %v357_v24 = vrot.slane %v355_v17, 1  ;;  %v378_v29 = vrot.slane %v376_v22, 1  ;;  %v4420_v31 = vld [vmem:[#allocation6 + $0xf8] sm:$0xff]  ;;  %v362_v33 = vrot.slane %v360_v25, 1  ;;  %v4407_v37 = vld [vmem:[#allocation6 + $0xb0] sm:$0xff]  ;;  %v4406_v43 = vld [vmem:[#allocation6 + $0xa8] sm:$0xff] }
  0x3e   : > { %4594 = vmatpush.bf16.msra.mxu2 %v4398_v4  ;;  %451 = vmatpush.bf16.msra.mxu0 %v4398_v4  ;;  %v374_v28 = vor.u32 %v372_v21, %v5016_v20  ;;  %v4428_v35 = vld [vmem:[#allocation6 + $0x138] sm:$0xff]  ;;  %v4419_v38 = vld [vmem:[#allocation6 + $0xf0] sm:$0xff]  ;;  %v4418_v44 = vld [vmem:[#allocation6 + $0xe8] sm:$0xff]  ;;  %s5963_s13 = scalar_lea.vmem [#allocation9], %s4611_s12  ;;  %s4612_s15 = smul.u32 40, %s4907_s22 }
  0x3f   : > { %4602 = vmatpush.bf16.msra.mxu3 %v4390_v5  ;;  %538 = vmatpush.bf16.msra.mxu1 %v4390_v5  ;;  %v358_v32 = vor.u32 %v357_v24, %v353_v23  ;;  %v4436_v36 = vld [vmem:[#allocation6 + $0x178] sm:$0xff]  ;;  %v4427_v41 = vld [vmem:[#allocation6 + $0x130] sm:$0xff]  ;;  %v4426_v47 = vld [vmem:[#allocation6 + $0x128] sm:$0xff]  ;;  %v382_v54 = vor.u32 %v380_v45, %v378_v29  ;;  %v366_v63 = vor.u32 %v364_v51, %v362_v33  ;;  %s3602_s28 = sshll.u32 %s5963_s13, 4  ;;  %s3590_s27 = scalar_lea.sflag [#allocation5], %s4991_s1  ;;  %s3603_s28 = int_to_ptr.vmem [resolvable:$true] %s3602_s28 }
  0x40   : > { %v379_v34 = vsel %vm351_vm0, %v374_v28, %v378_v29  ;;  %v5026_v40 = vld [vmem:[%s4995_s8 + $0x20] sm:$0xff]  ;;  %v4405_v49 = vld [vmem:[#allocation6 + $0xa0] sm:$0xff]  ;;  %s3601_s7 = scalar_lea.hbm %s6021_s5, %s4612_s15  ;;  %s4797_s24 = scalar_lea.hbm %s6021_s5, 80 }
  0x41   : > { %v363_v39 = vsel %vm351_vm0, %v358_v32, %v362_v33  ;;  %v4435_v42 = vld [vmem:[#allocation6 + $0x170] sm:$0xff]  ;;  %v384_v46 = vshll.u32 %v5026_v40, 16  ;;  %v4434_v48 = vld [vmem:[#allocation6 + $0x168] sm:$0xff]  ;;  %v4417_v50 = vld [vmem:[#allocation6 + $0xe0] sm:$0xff]  ;;  %v388_v23 = vshrl.u32 %v5026_v40, 16  ;;  %s3604_s26 = sshll.u32 %s3601_s7, 4  ;;  %s3605_s26 = int_to_ptr.hbm [resolvable:$true] %s3604_s26 }
  0x42   : > { %4595 = vmatpush.bf16.msra.mxu2 %v4397_v6  ;;  %452 = vmatpush.bf16.msra.mxu0 %v4397_v6  ;;  %v700_v52 = vld [vmem:[%s4995_s8 + $0x4] sm:$0xe]  ;;  %v5033_v53 = vld [vmem:[%s4995_s8 + $0x8] sm:$0xff]   ;;  %v4402_v14 = vld [vmem:[#allocation6 + $0x88] sm:$0xff]  ;;  %s4791_s22 = sshra.s32 %s3605_s26, 4  ;;  %s4792_s22 = int_to_ptr.hbm [resolvable:$true] %s4791_s22 }
  0x43   : > { %4603 = vmatpush.bf16.msra.mxu3 %v4389_v7  ;;  %539 = vmatpush.bf16.msra.mxu1 %v4389_v7  ;;  %v386_v55 = vrot.slane %v384_v46, 1  ;;  %v4425_v56 = vld [vmem:[#allocation6 + $0x120] sm:$0xff]  ;;  %v4404_v58 = vld [vmem:[#allocation6 + $0x98] sm:$0xff]  ;;  %v739_v61 = vunpack.c.l.b16 %v700_v52  ;;  %v740_v62 = vunpack.c.l.b16 %v5033_v53  ;;  %v4403_v4 = vld [vmem:[#allocation6 + $0x90] sm:$0xff]  ;;  %v371_v7 = vsel %vm351_vm0, %v366_v63, %v5016_v20  ;;  %s4793_s11 = scalar_lea.hbm %s4792_s22, 40  ;;  %p4798_p11 = scmp.lt.s32.totalorder %s4792_s22, %s6021_s5 }
  0x44   : > { %v4433_v57 = vld [vmem:[#allocation6 + $0x160] sm:$0xff]  ;;  %v4416_v59 = vld [vmem:[#allocation6 + $0xd8] sm:$0xff]  ;;  %v4415_v5 = vld [vmem:[#allocation6 + $0xd0] sm:$0xff]  ;;  %v595_v52 = vrot.slane %v5006_v10, 1  ;;  %p4794_p1 = scmp.ne.s32.totalorder %s4792_s22, %s4793_s11  ;;  %p4799_p9 = scmp.lt.s32.totalorder %s4797_s24, %s4793_s11 }
  0x45   : > { %v305_v60 = vld [vmem:[%s4995_s8 + $0x28] sm:$0x1]  ;;  %v387_v0 = vsel %vm351_vm0, %v382_v54, %v386_v55  ;;  %v4424_v2 = vld [vmem:[#allocation6 + $0x118] sm:$0xff]  ;;  %v5038_v6 = vpack.c.b16 %v740_v62, %v739_v61  ;;  %v4422_v25 = vld [vmem:[#allocation6 + $0x108] sm:$0xff] }
  0x46   : > { %4596 = vmatpush.bf16.msra.mxu2 %v4396_v8  ;;  %453 = vmatpush.bf16.msra.mxu0 %v4396_v8  ;;  %v344_v1 = vunpack.c.l.b16 %v305_v60  ;;  %v4432_v3 = vld [vmem:[#allocation6 + $0x158] sm:$0xff]  ;;  %v4413_v28 = vld [vmem:[#allocation6 + $0xc0] sm:$0xff]  ;;  %v4446_v54 = vld [vmem:[#allocation6 + $0x1a8] sm:$0xff]  ;;  %p4795_p4 = pnand %p4794_p1, %p4958_p3  ;;  %p4800_p2 = por %p4799_p9, %p4798_p11 }
  0x47   : > { %4604 = vmatpush.bf16.msra.mxu3 %v4388_v9  ;;  %540 = vmatpush.bf16.msra.mxu1 %v4388_v9  ;;  %v5044_v8 = vld [vmem:[%s4995_s8 + $0xc] sm:$0xff]  ;;  %v1036_v17 = vld [vmem:[%s4995_s8 + $0x4] sm:$0xc] }
  0x48   : > { %v5046_v9 = vpack.c.b16 %v344_v1, %v344_v1  ;;  %v895_v20 = vshrl.u32 %v5044_v8, 16  ;;  %v898_v21 = vshll.u32 %v5044_v8, 16  ;;  %v1055_v22 = vunpack.c.l.b16 %v1036_v17  ;;  %v4448_v29 = vld [vmem:[#allocation6 + $0x1b8] sm:$0xff]  ;;  %v4462_v60 = vld [vmem:[#allocation6 + $0x228] sm:$0xff]  ;;  %v4445_v63 = vld [vmem:[#allocation6 + $0x1a0] sm:$0xff]  ;;  %p4796_p8 = pneg %p4795_p4 }
  0x49   : > { %v5082_v17 = vld [vmem:[%s4995_s8 + $0x1c] sm:$0xff] }
  0x4a   : > { %4597 = vmatpush.bf16.msra.mxu2 %v4395_v11  ;;  %454 = vmatpush.bf16.msra.mxu0 %v4395_v11  ;;  %v4423_v11 = vld [vmem:[#allocation6 + $0x110] sm:$0xff]  ;;  %v392_v24 = vshll.u32 %v5046_v9, 16  ;;  %v897_v33 = vrot.slane %v895_v20, 1  ;;  %v4444_v20 = vld [vmem:[#allocation6 + $0x198] sm:$0xff]  ;;  %p4801_p10 = pnand %p4800_p2, %p4796_p8 }
  0x4b   : > { %4605 = vmatpush.bf16.msra.mxu3 %v4387_v12  ;;  %541 = vmatpush.bf16.msra.mxu1 %v4387_v12  ;;  %v4431_v12 = vld [vmem:[#allocation6 + $0x150] sm:$0xff] }
  0x4e   : > { %4598 = vmatpush.bf16.msra.mxu2 %v4394_v18  ;;  %455 = vmatpush.bf16.msra.mxu0 %v4394_v18  ;;  %v887_v18 = vshrl.u32 %v5038_v6, 16 }
  0x4f   : > { %4606 = vmatpush.bf16.msra.mxu3 %v4386_v19  ;;  %542 = vmatpush.bf16.msra.mxu1 %v4386_v19  ;;  %v890_v19 = vshll.u32 %v5038_v6, 16 }
  0x51   : > { %v892_v32 = vrot.slane %v890_v19, 2 }
  0x52   : > { %4599 = vmatpush.bf16.msra.mxu2 %v4393_v26  ;;  %456 = vmatpush.bf16.msra.mxu0 %v4393_v26  ;;  %v4430_v26 = vld [vmem:[#allocation6 + $0x148] sm:$0xff] }
  0x53   : > { %4607 = vmatpush.bf16.msra.mxu3 %v4385_v27  ;;  %543 = vmatpush.bf16.msra.mxu1 %v4385_v27  ;;  %v4401_v27 = vld [vmem:[#allocation6 + $0x80] sm:$0xff] }
  0x55   : > { %467 = vmatmul.bf16.vlgmr.msra.gmra.mxu2 %v379_v34  ;;  %457 = vmatmul.bf16.vlgmr.msra.gmra.mxu0 %v363_v39  ;;  %v900_v34 = vrot.slane %v898_v21, 2  ;;  %v4429_v39 = vld [vmem:[#allocation6 + $0x140] sm:$0xff]  ;;  %v913_v21 = vshrl.u32 %v5082_v17, 16 }
  0x56   : > { %656 = vmatpush.bf16.msrb.mxu2 %v4408_v30  ;;  %554 = vmatmul.bf16.vlgmr.msra.gmra.mxu3 %v5006_v10  ;;  %v889_v30 = vrot.slane %v887_v18, 1 }
  0x57   : > { %820 = vmatpush.bf16.msrb.mxu3 %v4420_v31  ;;  %992 = vmatpush.bf16.msrb.mxu0 %v4428_v35  ;;  %v4456_v31 = vld [vmem:[#allocation6 + $0x1f8] sm:$0xff]  ;;  %v1056_v35 = vpack.c.b16 %v740_v62, %v1055_v22  ;;  %v901_v45 = vor.u32 %v900_v34, %v897_v33  ;;  %v916_v22 = vshll.u32 %v5082_v17, 16  ;;  %v4443_v33 = vld [vmem:[#allocation6 + $0x190] sm:$0xff] }
  0x58   : > { %1122 = vmatpush.bf16.msrb.mxu1 %v4436_v36  ;;  %v390_v36 = vor.u32 %v388_v23, %v386_v55  ;;  %v4463_v55 = vld [vmem:[#allocation6 + $0x230] sm:$0xff]  ;;  %v915_v23 = vrot.slane %v913_v21, 1  ;;  %v4460_v34 = vld [vmem:[#allocation6 + $0x218] sm:$0xff] }
  0x59   : > { %544 = vmatmul.bf16.vlgmr.msra.gmra.mxu1 %v4550_v15  ;;  %v4414_v15 = vld [vmem:[#allocation6 + $0xc8] sm:$0xff]  ;;  %v1058_v46 = vrot.slane %v1056_v35, 2  ;;  %v4451_v35 = vld [vmem:[#allocation6 + $0x1d0] sm:$0xff] }
  0x5a   : > { %657 = vmatpush.bf16.msrb.mxu2 %v4407_v37  ;;  %v394_v37 = vrot.slane %v392_v24, 1  ;;  %v918_v24 = vrot.slane %v916_v22, 2 }
  0x5b   : > { %821 = vmatpush.bf16.msrb.mxu3 %v4419_v38  ;;  %993 = vmatpush.bf16.msrb.mxu0 %v4427_v41  ;;  %v4421_v38 = vld [vmem:[#allocation6 + $0x100] sm:$0xff]  ;;  %v4464_v41 = vld [vmem:[#allocation6 + $0x238] sm:$0xff] }
  0x5c   : > { %1123 = vmatpush.bf16.msrb.mxu1 %v4435_v42  ;;  %v4447_v42 = vld [vmem:[#allocation6 + $0x1b0] sm:$0xff] }
  0x5e   : > { %658 = vmatpush.bf16.msrb.mxu2 %v4406_v43  ;;  %v4455_v43 = vld [vmem:[#allocation6 + $0x1f0] sm:$0xff] }
  0x5f   : > { %822 = vmatpush.bf16.msrb.mxu3 %v4418_v44  ;;  %994 = vmatpush.bf16.msrb.mxu0 %v4426_v47  ;;  %v893_v44 = vor.u32 %v892_v32, %v889_v30  ;;  %v1059_v47 = vrot.slane %v5044_v8, 2  ;;  %v5093_v30 = vld [vmem:[%s4995_s8 + $0x24] sm:$0xff] }
  0x60   : > { %1124 = vmatpush.bf16.msrb.mxu1 %v4434_v48  ;;  %v395_v48 = vsel %vm351_vm0, %v390_v36, %v394_v37  ;;  %v4442_v36 = vld [vmem:[#allocation6 + $0x188] sm:$0xff]  ;;  %v4459_v37 = vld [vmem:[#allocation6 + $0x210] sm:$0xff] }
  0x61   : > { %v1060_v51 = vsel %vm1057_vm2, %v1058_v46, %v1059_v47 }
  0x62   : > { %659 = vmatpush.bf16.msrb.mxu2 %v4405_v49  ;;  %v5059_v49 = vld [vmem:[%s4995_s8 + $0x14] sm:$0xff] }
  0x63   : > { %823 = vmatpush.bf16.msrb.mxu3 %v4417_v50  ;;  %995 = vmatpush.bf16.msrb.mxu0 %v4425_v56  ;;  %v902_v50 = vsel %vm885_vm1, %v893_v44, %v901_v45  ;;  %v4454_v56 = vld [vmem:[#allocation6 + $0x1e8] sm:$0xff]  ;;  %v904_v62 = vshrl.u32 %v5059_v49, 16  ;;  %v907_v10 = vshll.u32 %v5059_v49, 16  ;;  %v761_v44 = vrot.slane %v5082_v17, 1 }
  0x64   : > { %1125 = vmatpush.bf16.msrb.mxu1 %v4433_v57  ;;  %v597_v57 = vrot.slane %v5009_v13, 1 }
  0x65   : > { %472 = vmatmul.bf16.gmra.mxu2 %v387_v0  ;;  %462 = vmatmul.bf16.gmra.mxu0 %v371_v7  ;;  %v906_v1 = vrot.slane %v904_v62, 1  ;;  %v757_v7 = vrot.slane %v5044_v8, 1  ;;  %v4452_v8 = vld [vmem:[#allocation6 + $0x1d8] sm:$0xff] }
  0x66   : > { %660 = vmatpush.bf16.msrb.mxu2 %v4404_v58  ;;  %559 = vmatmul.bf16.gmra.mxu3 %v5009_v13  ;;  %v4582_v58 = vld [vmem:[%s4995_s8] sm:$0xf0]  ;;  %v5071_v61 = vsel %vm591_vm3, %v595_v52, %v597_v57  ;;  %v1206_v13 = vunpack.c.h.b16 %v5033_v53 }
  0x67   : > { %824 = vmatpush.bf16.msrb.mxu3 %v4416_v59  ;;  %996 = vmatpush.bf16.msrb.mxu0 %v4424_v2  ;;  %v4583_v59 = vld [vmem:[%s4995_s8] sm:$0xe]  ;;  %v909_v2 = vrot.slane %v907_v10, 2  ;;  %v599_v10 = vrot.slane %v5026_v40, 1 }
  0x68   : > { %1126 = vmatpush.bf16.msrb.mxu1 %v4432_v3  ;;  %v4584_v0 = vor.u32 %v4583_v59, %v4582_v58  ;;  %v4457_v58 = vld [vmem:[#allocation6 + $0x200] sm:$0xff] }
  0x69   : > { %549 = vmatmul.bf16.gmra.mxu1 %v5014_v16 }
  0x6a   : > { %661 = vmatpush.bf16.msrb.mxu2 %v4403_v4  ;;  %v592_v3 = vrot.slane %v4584_v0, 1  ;;  %v593_v4 = vrot.slane %v5014_v16, 1  ;;  %v4453_v16 = vld [vmem:[#allocation6 + $0x1e0] sm:$0xff] }
  0x6b   : > { %825 = vmatpush.bf16.msrb.mxu3 %v4415_v5  ;;  %997 = vmatpush.bf16.msrb.mxu0 %v4423_v11  ;;  %v756_v5 = vrot.slane %v5038_v6, 1  ;;  %v910_v11 = vor.u32 %v909_v2, %v906_v1  ;;  %v4461_v6 = vld [vmem:[#allocation6 + $0x220] sm:$0xff]  ;;  %v600_v2 = vsel %vm591_vm3, %v597_v57, %v599_v10 }
  0x6c   : > { %1127 = vmatpush.bf16.msrb.mxu1 %v4431_v12  ;;  %v1061_v12 = vrot.slane %v5059_v49, 2 }
  0x6d   : > { %v911_v18 = vsel %vm885_vm1, %v901_v45, %v910_v11  ;;  %v864_v45 = vld [vmem:[%s4995_s8 + $0x2c] sm:$0x3] }
  0x6e   : > { %662 = vmatpush.bf16.msrb.mxu2 %v4402_v14  ;;  %v594_v14 = vsel %vm591_vm3, %v592_v3, %v593_v4  ;;  %v1062_v19 = vsel %vm1057_vm2, %v1059_v47, %v1061_v12  ;;  %v1065_v47 = vrot.slane %v5093_v30, 2 }
  0x6f   : > { %826 = vmatpush.bf16.msrb.mxu3 %v4414_v15  ;;  %998 = vmatpush.bf16.msrb.mxu0 %v4422_v25  ;;  %v758_v15 = vsel %vm591_vm3, %v756_v5, %v757_v7  ;;  %v759_v25 = vrot.slane %v5059_v49, 1 }
  0x70   : > { %1128 = vmatpush.bf16.msrb.mxu1 %v4430_v26  ;;  %v919_v26 = vor.u32 %v918_v24, %v915_v23 }
  0x71   : > { %v762_v49 = vsel %vm591_vm3, %v759_v25, %v761_v44 }
  0x72   : > { %663 = vmatpush.bf16.msrb.mxu2 %v4401_v27  ;;  %v1063_v27 = vrot.slane %v5082_v17, 2  ;;  %v601_v17 = vrot.slane %v5046_v9, 1 }
  0x73   : > { %827 = vmatpush.bf16.msrb.mxu3 %v4413_v28  ;;  %999 = vmatpush.bf16.msrb.mxu0 %v4421_v38  ;;  %v596_v28 = vsel %vm591_vm3, %v593_v4, %v595_v52  ;;  %v922_v38 = vshrl.u32 %v5093_v30, 16  ;;  %v710_v4 = vld [vmem:[%s4995_s8 + $0x2c] sm:$0x1] }
  0x74   : > { %1129 = vmatpush.bf16.msrb.mxu1 %v4429_v39  ;;  %v1064_v32 = vsel %vm1057_vm2, %v1061_v12, %v1063_v27  ;;  %v925_v39 = vshll.u32 %v5093_v30, 16 }
  0x75   : > { %477 = vmatmul.bf16.gmra.mxu2 %v395_v48  ;;  %v883_v48 = vunpack.c.l.b16 %v864_v45 }
  0x76   : > { %1286 = vmatpush.bf16.msra.mxu2 %v4448_v29  ;;  %564 = vmatmul.bf16.gmra.mxu3 %v5026_v40  ;;  %v760_v29 = vsel %vm591_vm3, %v757_v7, %v759_v25  ;;  %v749_v40 = vunpack.c.l.b16 %v710_v4 }
  0x77   : > { %1458 = vmatpush.bf16.msra.mxu3 %v4456_v31  ;;  %1588 = vmatpush.bf16.msra.mxu0 %v4464_v41  ;;  %v920_v31 = vsel %vm885_vm1, %v910_v11, %v919_v26  ;;  %v4450_v41 = vld [vmem:[#allocation6 + $0x1c8] sm:$0xff]  ;;  %v884_v52 = vpack.c.b16 %v883_v48, %v883_v48  ;;  %v1502_v11 = vld [vmem:[%s4995_s8 + $0x8] sm:$0x8] }
  0x78   : > { %1000 = vmatmul.bf16.vlgmr.msrb.gmra.mxu0 %v902_v50  ;;  %v1521_v12 = vunpack.c.l.b16 %v1502_v11 }
  0x79   : > { %1130 = vmatmul.bf16.vlgmr.msrb.gmra.mxu1 %v1060_v51  ;;  %v1066_v51 = vsel %vm1057_vm2, %v1063_v27, %v1065_v47  ;;  %v931_v59 = vshrl.u32 %v884_v52, 16  ;;  %v1067_v1 = vrot.slane %v884_v52, 2 }
  0x7a   : > { %1287 = vmatpush.bf16.msra.mxu2 %v4447_v42  ;;  %v924_v42 = vrot.slane %v922_v38, 1  ;;  %v1522_v57 = vpack.c.b16 %v1206_v13, %v1521_v12  ;;  %v4440_v12 = vld [vmem:[%s4995_s8 + $0x28] sm:$0xff] }
  0x7b   : > { %1459 = vmatpush.bf16.msra.mxu3 %v4455_v43  ;;  %1589 = vmatpush.bf16.msra.mxu0 %v4463_v55  ;;  %v927_v43 = vrot.slane %v925_v39, 2  ;;  %v4458_v55 = vld [vmem:[#allocation6 + $0x208] sm:$0xff]  ;;  %v1068_v7 = vsel %vm1057_vm2, %v1065_v47, %v1067_v1 }
  0x7d   : > { %v928_v46 = vor.u32 %v927_v43, %v924_v42 }
  0x7e   : > { %1288 = vmatpush.bf16.msra.mxu2 %v4446_v54  ;;  %v4441_v54 = vld [vmem:[#allocation6 + $0x180] sm:$0xff] }
  0x7f   : > { %1460 = vmatpush.bf16.msra.mxu3 %v4454_v56  ;;  %1590 = vmatpush.bf16.msra.mxu0 %v4462_v60  ;;  %v929_v50 = vsel %vm885_vm1, %v919_v26, %v928_v46  ;;  %v4449_v56 = vld [vmem:[#allocation6 + $0x1c0] sm:$0xff]  ;;  %v934_v60 = vshll.u32 %v884_v52, 16 }
  0x81   : > { %v936_v62 = vrot.slane %v934_v60, 2 }
  0x82   : > { %1289 = vmatpush.bf16.msra.mxu2 %v4445_v63  ;;  %v763_v63 = vrot.slane %v5093_v30, 1 }
  0x83   : > { %1461 = vmatpush.bf16.msra.mxu3 %v4453_v16  ;;  %1591 = vmatpush.bf16.msra.mxu0 %v4461_v6  ;;  %v4437_v16 = vld [vmem:[%s4995_s8 + $0x10] sm:$0xff] }
  0x84   : > { %v764_v3 = vsel %vm591_vm3, %v761_v44, %v763_v63  ;;  %v1525_v6 = vrot.slane %v4437_v16, 3  ;;  %v1361_v25 = vshrl.u32 %v4437_v16, 16  ;;  %v1364_v9 = vshll.u32 %v4437_v16, 16 }
  0x85   : > { %664 = vmatmul.bf16.vlgmr.msrb.gmra.mxu2 %v594_v14  ;;  %v755_v14 = vpack.c.b16 %v749_v40, %v749_v40 }
  0x86   : > { %828 = vmatmul.bf16.vlgmr.msrb.gmra.mxu3 %v758_v15  ;;  %1290 = vmatpush.bf16.msra.mxu2 %v4444_v20  ;;  %v1166_v15 = vld [vmem:[%s4995_s8 + $0x8] sm:$0xc]  ;;  %v1524_v20 = vrot.slane %v1522_v57, 3 }
  0x87   : > { %1462 = vmatpush.bf16.msra.mxu3 %v4452_v8  ;;  %1592 = vmatpush.bf16.msra.mxu0 %v4460_v34  ;;  %v602_v8 = vsel %vm591_vm3, %v599_v10, %v601_v17  ;;  %v4438_v34 = vld [vmem:[%s4995_s8 + $0x18] sm:$0xff] }
  0x88   : > { %1005 = vmatmul.bf16.gmra.mxu0 %v911_v18  ;;  %v765_v18 = vrot.slane %v755_v14, 1  ;;  %v1526_v23 = vsel %vm1523_vm4, %v1524_v20, %v1525_v6  ;;  %v1373_v42 = vshll.u32 %v4438_v34, 16  ;;  %v1391_v20 = vshll.u32 %v4440_v12, 16 }
  0x89   : > { %1135 = vmatmul.bf16.gmra.mxu1 %v1062_v19  ;;  %v1205_v19 = vunpack.c.l.b16 %v1166_v15 }
  0x8a   : > { %1291 = vmatpush.bf16.msra.mxu2 %v4443_v33  ;;  %v766_v21 = vsel %vm591_vm3, %v763_v63, %v765_v18  ;;  %v1375_v47 = vrot.slane %v1373_v42, 3 }
  0x8b   : > { %1463 = vmatpush.bf16.msra.mxu3 %v4451_v35  ;;  %1593 = vmatpush.bf16.msra.mxu0 %v4459_v37  ;;  %v1216_v22 = vpack.c.b16 %v1206_v13, %v1205_v19  ;;  %v1527_v35 = vrot.slane %v4438_v34, 3  ;;  %v1531_v13 = vrot.slane %v4440_v12, 3 }
  0x8d   : > { %v1353_v53 = vshrl.u32 %v1216_v22, 16  ;;  %v1356_v24 = vshll.u32 %v1216_v22, 16  ;;  %v1222_v30 = vrot.slane %v1216_v22, 2  ;;  %v1528_v39 = vsel %vm1523_vm4, %v1525_v6, %v1527_v35 }
  0x8e   : > { %1292 = vmatpush.bf16.msra.mxu2 %v4442_v36 }
  0x8f   : > { %1464 = vmatpush.bf16.msra.mxu3 %v4450_v41  ;;  %1594 = vmatpush.bf16.msra.mxu0 %v4458_v55  ;;  %v1355_v26 = vrot.slane %v1353_v53, 2  ;;  %v1358_v27 = vrot.slane %v1356_v24, 3  ;;  %v1370_v41 = vshrl.u32 %v4438_v34, 16  ;;  %v1393_v24 = vrot.slane %v1391_v20, 3 }
  0x92   : > { %1293 = vmatpush.bf16.msra.mxu2 %v4441_v54 }
  0x93   : > { %1465 = vmatpush.bf16.msra.mxu3 %v4449_v56  ;;  %1595 = vmatpush.bf16.msra.mxu0 %v4457_v58 }
  0x95   : > { %669 = vmatmul.bf16.gmra.mxu2 %v596_v28  ;;  %v1363_v28 = vrot.slane %v1361_v25, 2 }
  0x96   : > { %833 = vmatmul.bf16.gmra.mxu3 %v760_v29  ;;  %v1366_v29 = vrot.slane %v1364_v9, 3 }
  0x98   : > { %1010 = vmatmul.bf16.gmra.mxu0 %v920_v31  ;;  %v1223_v31 = vrot.slane %v4437_v16, 2  ;;  %v1367_v33 = vor.u32 %v1366_v29, %v1363_v28  ;;  %v1388_v16 = vshrl.u32 %v4440_v12, 16 }
  0x99   : > { %1140 = vmatmul.bf16.gmra.mxu1 %v1064_v32  ;;  %v1359_v32 = vor.u32 %v1358_v27, %v1355_v26  ;;  %v1229_v26 = vrot.slane %v4440_v12, 2 }
  0x9a   : > { %v1224_v36 = vsel %vm1057_vm2, %v1222_v30, %v1223_v31  ;;  %v1390_v53 = vrot.slane %v1388_v16, 2 }
  0x9b   : > { %v1368_v37 = vsel %vm1351_vm5, %v1359_v32, %v1367_v33 }
  0x9c   : > { %v1394_v27 = vor.u32 %v1393_v24, %v1390_v53 }
  0xa5   : > { %674 = vmatmul.bf16.gmra.mxu2 %v5071_v61  ;;  %v933_v61 = vrot.slane %v931_v59, 1 }
  0xa6   : > { %838 = vmatmul.bf16.gmra.mxu3 %v762_v49  ;;  %v1225_v49 = vrot.slane %v4438_v34, 2 }
  0xa7   : > { %v937_v0 = vor.u32 %v936_v62, %v933_v61 }
  0xa8   : > { %1015 = vmatmul.bf16.gmra.mxu0 %v929_v50  ;;  %v1226_v58 = vsel %vm1057_vm2, %v1223_v31, %v1225_v49 }
  0xa9   : > { %1145 = vmatmul.bf16.gmra.mxu1 %v1066_v51  ;;  %v938_v5 = vsel %vm885_vm1, %v928_v46, %v937_v0  ;;  %v1372_v46 = vrot.slane %v1370_v41, 2  ;;  %v4439_v51 = vld [vmem:[%s4995_s8 + $0x20] sm:$0xff] }
  0xaa   : > { %v1529_v56 = vrot.slane %v4439_v51, 3  ;;  %v1379_v10 = vshrl.u32 %v4439_v51, 16  ;;  %v1382_v63 = vshll.u32 %v4439_v51, 16 }
  0xab   : > { %v1376_v50 = vor.u32 %v1375_v47, %v1372_v46 }
  0xac   : > { %v1530_v62 = vsel %vm1523_vm4, %v1527_v35, %v1529_v56  ;;  %v1384_v4 = vrot.slane %v1382_v63, 3  ;;  %v1532_v19 = vsel %vm1523_vm4, %v1529_v56, %v1531_v13  ;;  %v1176_v35 = vld [vmem:[%s4995_s8 + $0x30] sm:$0x3] }
  0xad   : > { %v1377_v59 = vsel %vm1351_vm5, %v1367_v33, %v1376_v50 }
  0xb5   : > { %679 = vmatmul.bf16.gmra.mxu2 %v600_v2 }
  0xb6   : > { %843 = vmatmul.bf16.gmra.mxu3 %v764_v3  ;;  %v1381_v3 = vrot.slane %v1379_v10, 2 }
  0xb8   : > { %1020 = vmatmul.bf16.gmra.mxu0 %v938_v5  ;;  %v1385_v40 = vor.u32 %v1384_v4, %v1381_v3 }
  0xb9   : > { %1150 = vmatmul.bf16.gmra.mxu1 %v1068_v7  ;;  %v1227_v7 = vrot.slane %v4439_v51, 2 }
  0xba   : > { %v1386_v17 = vsel %vm1351_vm5, %v1376_v50, %v1385_v40  ;;  %v1395_v33 = vsel %vm1351_vm5, %v1385_v40, %v1394_v27 }
  0xbb   : > { %v1228_v57 = vsel %vm1057_vm2, %v1225_v49, %v1227_v7  ;;  %v1230_v32 = vsel %vm1057_vm2, %v1227_v7, %v1229_v26 }
  0xc5   : > { %684 = vmatmul.bf16.gmra.mxu2 %v602_v8 }
  0xc6   : > { %848 = vmatmul.bf16.gmra.mxu3 %v766_v21  ;;  %v1330_v21 = vld [vmem:[%s4995_s8 + $0x30] sm:$0x7] }
  0xc7   : > { %v1349_v25 = vunpack.c.l.b16 %v1330_v21 }
  0xc8   : > { %1596 = vmatmul.bf16.vlgmr.msra.gmra.mxu0 %v1526_v23 }
  0xc9   : > { %v1350_v28 = vpack.c.b16 %v1349_v25, %v1349_v25 }
  0xcb   : > { %v1533_v31 = vrot.slane %v1350_v28, 3  ;;  %v1397_v41 = vshrl.u32 %v1350_v28, 16  ;;  %v1400_v42 = vshll.u32 %v1350_v28, 16 }
  0xcd   : > { %v1399_v50 = vrot.slane %v1397_v41, 2  ;;  %v1402_v51 = vrot.slane %v1400_v42, 3 }
  0xd2   : > { %v5126_v38 = vpop.f32.mrf.mxu0 }
  0xd5   : > { %1294 = vmatmul.bf16.vlgmr.msra.gmra.mxu2 %v1224_v36 }
  0xd6   : > { %1466 = vmatmul.bf16.vlgmr.msra.gmra.mxu3 %v1368_v37  ;;  %v545_v60 = vpop.f32.mrf.mxu1  ;;  %v1534_v37 = vsel %vm1523_vm4, %v1531_v13, %v1533_v31  ;;  %v4484_v13 = vld [vmem:[#allocation8 + $0x78] sm:$0xff] }
  0xd7   : > { %2367 = vmatpush.bf16.msra.mxu1 %v4484_v13 }
  0xd8   : > { %v468_v43 = vpop.f32.mrf.mxu2  ;;  %1601 = vmatmul.bf16.gmra.mxu0 %v1528_v39  ;;  %v1215_v39 = vunpack.c.l.b16 %v1176_v35 }
  0xd9   : > { %v555_v44 = vpop.f32.mrf.mxu3 }
  0xda   : > { %v5129_v45 = vadd.f32 %v555_v44, %v468_v43  ;;  %v5131_v48 = vpop.f32.mrf.mxu0  ;;  %v546_v43 = vadd.f32 %v545_v60, %v5126_v38  ;;  %v1221_v49 = vpack.c.b16 %v1215_v39, %v1215_v39 }
  0xde   : > { %v5145_v11 = vpop.f32.mrf.mxu1 }
  0xe0   : > { %v470_v52 = vpop.f32.mrf.mxu2 }
  0xe1   : > { %v557_v54 = vpop.f32.mrf.mxu3 }
  0xe2   : > { %v5134_v55 = vadd.f32 %v557_v54, %v470_v52  ;;  %v5138_v61 = vpop.f32.mrf.mxu0 }
  0xe5   : > { %1299 = vmatmul.bf16.gmra.mxu2 %v1226_v58 }
  0xe6   : > { %1471 = vmatmul.bf16.gmra.mxu3 %v1377_v59  ;;  %v550_v22 = vpop.f32.mrf.mxu1  ;;  %v1231_v59 = vrot.slane %v1221_v49, 2 }
  0xe7   : > { %v551_v3 = vadd.f32 %v550_v22, %v5138_v61  ;;  %v4483_v61 = vld [vmem:[#allocation8 + $0x70] sm:$0xff] }
  0xe8   : > { %v473_v0 = vpop.f32.mrf.mxu2  ;;  %1606 = vmatmul.bf16.gmra.mxu0 %v1530_v62  ;;  %v1403_v62 = vor.u32 %v1402_v51, %v1399_v50  ;;  %v1232_v38 = vsel %vm1057_vm2, %v1229_v26, %v1231_v59  ;;  %2368 = vmatpush.bf16.msra.mxu1 %v4483_v61  ;;  %v4482_v51 = vld [vmem:[#allocation8 + $0x68] sm:$0xff] }
  0xe9   : > { %v560_v1 = vpop.f32.mrf.mxu3 }
  0xea   : > { %v5141_v2 = vadd.f32 %v560_v1, %v473_v0  ;;  %v5143_v5 = vpop.f32.mrf.mxu0  ;;  %v1404_v60 = vsel %vm1351_vm5, %v1394_v27, %v1403_v62 }
  0xec   : > { %2369 = vmatpush.bf16.msra.mxu1 %v4482_v51 }
  0xee   : > { %v5166_v34 = vpop.f32.mrf.mxu1 }
  0xf0   : > { %v5148_v14 = vpop.f32.mrf.mxu2 }
  0xf1   : > { %v5150_v15 = vpop.f32.mrf.mxu3 }
  0xf5   : > { %1304 = vmatmul.bf16.gmra.mxu2 %v1228_v57  ;;  %v1001_v18 = vpop.f32.mrf.mxu0 }
  0xf6   : > { %1476 = vmatmul.bf16.gmra.mxu3 %v1386_v17  ;;  %v5171_v54 = vpop.f32.mrf.mxu1 }
  0xf8   : > { %v478_v6 = vpop.f32.mrf.mxu2  ;;  %1611 = vmatmul.bf16.gmra.mxu0 %v1532_v19 }
  0xf9   : > { %v565_v8 = vpop.f32.mrf.mxu3 }
  0xfa   : > { %v5156_v23 = vadd.f32 %v565_v8, %v478_v6  ;;  %v1656_v6 = vlaneseq }
  0xfc   : > { %v5198_v8 = vshrl.u32 %v1656_v6, 7 }
  0xfd   : > { %v5158_v9 = vpop.f32.mrf.mxu0 }
  0xfe   : > { %v5183_v0 = vpop.f32.mrf.mxu1  ;;  %v1670_v25 = vand.u32 65535, %v5198_v8  ;;  %v1671_v27 = vshrl.u32 %v5198_v8, 16 }
 0x100   : > { %v5160_v29 = vpop.f32.mrf.mxu2  ;;  %v1674_v28 = vmul.u32 52428, %v1670_v25  ;;  %v1675_v35 = vmul.u32 52429, %v1671_v27 }
 0x101   : > { %v5162_v30 = vpop.f32.mrf.mxu3 }
 0x102   : > { %v1679_v39 = vshll.u32 %v1675_v35, 16 }
 0x105   : > { %1309 = vmatmul.bf16.gmra.mxu2 %v1230_v32  ;;  %v1006_v36 = vpop.f32.mrf.mxu0 }
 0x106   : > { %1481 = vmatmul.bf16.gmra.mxu3 %v1395_v33  ;;  %v1673_v33 = vmul.u32 52429, %v1670_v25 }
 0x108   : > { %v665_v44 = vpop.f32.mrf.mxu2  ;;  %1616 = vmatmul.bf16.gmra.mxu0 %v1534_v37  ;;  %v1676_v37 = vmul.u32 52428, %v1671_v27  ;;  %v4475_v27 = vld [vmem:[#allocation8 + $0x30] sm:$0xff] }
 0x109   : > { %v829_v46 = vpop.f32.mrf.mxu3  ;;  %v690_v47 = vadd.f32 %v665_v44, %v546_v43  ;;  %v5214_v43 = vadd.s32 8, %v5198_v8  ;;  %v4853_v44 = vmov 0  }
 0x10a   : > { %2057 = vst [vmem:[#allocation2] sm:$0xf] %v4853_v44 }
 0x10b   : > { %v854_v52 = vadd.f32 %v829_v46, %v690_v47  ;;  %2070 = vst [vmem:[#allocation2 + $0x30] sm:$0xf] %v4853_v44  ;;  %v1699_v49 = vand.u32 65535, %v5214_v43  ;;  %v1700_v62 = vshrl.u32 %v5214_v43, 16 }
 0x10d   : > { %v5173_v56 = vadd.f32 %v1001_v18, %v854_v52  ;;  %v5175_v58 = vpop.f32.mrf.mxu0  ;;  %v5190_v18 = vpop.f32.mrf.mxu1  ;;  %v1678_v52 = vshrl.u32 %v1674_v28, 16 }
 0x110   : > { %v5177_v10 = vpop.f32.mrf.mxu2 }
 0x111   : > { %v5179_v63 = vpop.f32.mrf.mxu3 }
 0x115   : > { %1314 = vmatmul.bf16.gmra.mxu2 %v1232_v38  ;;  %v1011_v1 = vpop.f32.mrf.mxu0  ;;  %v5200_v53 = vpop.f32.mrf.mxu1  ;;  %v548_v38 = vadd.f32 %v5145_v11, %v5131_v48  ;;  %v553_v48 = vadd.f32 %v5166_v34, %v5143_v5 }
 0x116   : > { %1486 = vmatmul.bf16.gmra.mxu3 %v1404_v60  ;;  %v4476_v60 = vld [vmem:[#allocation8 + $0x38] sm:$0xff] }
 0x117   : > { %v691_v13 = vadd.f32 %v5177_v10, %v548_v38  ;;  %2454 = vmatpush.bf16.msrb.mxu2 %v4476_v60 }
 0x118   : > { %v670_v4 = vpop.f32.mrf.mxu2 }
 0x119   : > { %v834_v7 = vpop.f32.mrf.mxu3  ;;  %v692_v40 = vadd.f32 %v670_v4, %v551_v3  ;;  %v1703_v3 = vmul.u32 52428, %v1699_v49 }
 0x11b   : > { %v856_v12 = vadd.f32 %v834_v7, %v692_v40  ;;  %v1680_v7 = vshrl.u32 %v1675_v35, 16  ;;  %v1702_v40 = vmul.u32 52429, %v1699_v49  ;;  %v1706_v61 = vshll.u32 %v1703_v3, 16  ;;  %2455 = vmatpush.bf16.msrb.mxu2 %v4475_v27  ;;  %v4474_v49 = vld [vmem:[#allocation8 + $0x28] sm:$0xff] }
 0x11c   : > { %v1707_v34 = vshrl.u32 %v1703_v3, 16 }
 0x11d   : > { %v5186_v57 = vadd.f32 %v1006_v36, %v856_v12  ;;  %v5188_v17 = vpop.f32.mrf.mxu0  ;;  %v1677_v36 = vshll.u32 %v1674_v28, 16  ;;  %v5220_v50 = vpop.f32.mrf.mxu1  ;;  %v1704_v12 = vmul.u32 52429, %v1700_v62  ;;  %vm1710_vm8 = vc.u32 %v1702_v40, %v1706_v61 }
 0x11e   : > { %v1712_v28 = vadd.s32 %v1706_v61, %v1702_v40  ;;  %v1711_v10 = vsel %vm1710_vm8, 1, %v4853_v44 }
 0x11f   : > { %vm1681_vm6 = vc.u32 %v1673_v33, %v1677_v36  ;;  %v1683_v42 = vadd.s32 %v1677_v36, %v1673_v33  ;;  %v855_v36 = vadd.f32 %v5179_v63, %v691_v13  ;;  %2456 = vmatpush.bf16.msrb.mxu2 %v4474_v49 }
 0x120   : > { %v5192_v19 = vpop.f32.mrf.mxu2  ;;  %v1682_v46 = vsel %vm1681_vm6, 1, %v4853_v44  ;;  %vm5293_vm6 = vmand %vm2064_vm14, %vm2065_vm15 }
 0x121   : > { %v5194_v16 = vpop.f32.mrf.mxu3  ;;  %v1684_v47 = vadd.s32 %v1682_v46, %v1676_v37  ;;  %vm1685_vm7 = vc.u32 %v1683_v42, %v1679_v39  ;;  %v693_v37 = vadd.f32 %v5192_v19, %v553_v48  ;;  %v1027_v3 = vadd.f32 %v5158_v9, %v855_v36  ;;  %v2061_v9 = vld [vmem:[#allocation2 + $0x4] sm:$0x3] }
 0x122   : > { %v1686_v59 = vsel %vm1685_vm7, 1, %v4853_v44 }
 0x123   : > { %v5280_v48 = vadd.f32 %v5183_v0, %v1027_v3  ;;  %v4472_v0 = vld [vmem:[#allocation8 + $0x18] sm:$0xff] }
 0x125   : > { %v5196_v20 = vpop.f32.mrf.mxu0 }
 0x128   : > { %v675_v21 = vpop.f32.mrf.mxu2 }
 0x129   : > { %v839_v22 = vpop.f32.mrf.mxu3  ;;  %v694_v24 = vadd.f32 %v675_v21, %v5129_v45  ;;  %v1705_v21 = vmul.u32 52428, %v1700_v62  ;;  %v1709_v62 = vshrl.u32 %v1704_v12, 16 }
 0x12b   : > { %v858_v26 = vadd.f32 %v839_v22, %v694_v24  ;;  %v1708_v22 = vshll.u32 %v1704_v12, 16  ;;  %v5230_v24 = vadd.s32 16, %v5198_v8  ;;  %v1713_v39 = vadd.s32 %v1711_v10, %v1705_v21  ;;  %v4473_v21 = vld [vmem:[#allocation8 + $0x20] sm:$0xff] }
 0x12c   : > { %2457 = vmatpush.bf16.msrb.mxu2 %v4473_v21  ;;  %v4491_v21 = vld [vmem:[#allocation8 + $0xb0] sm:$0xff] }
 0x12d   : > { %v5205_v31 = vadd.f32 %v1011_v1, %v858_v26  ;;  %v5207_v32 = vpop.f32.mrf.mxu0  ;;  %v1688_v1 = vadd.s32 %v1686_v59, %v1684_v47  ;;  %v1728_v35 = vand.u32 65535, %v5230_v24  ;;  %vm1714_vm9 = vc.u32 %v1712_v28, %v1708_v22 }
 0x12e   : > { %v1715_v42 = vsel %vm1714_vm9, 1, %v4853_v44  ;;  %v1729_v46 = vshrl.u32 %v5230_v24, 16  ;;  %v5288_v28 = vadd.f32 %v5190_v18, %v5186_v57 }
 0x12f   : > { %v1689_v6 = vadd.s32 %v1688_v1, %v1678_v52  ;;  %v5241_v51 = vmul.u32 52428, %v1728_v35  ;;  %v5243_v52 = vpop.f32.mrf.mxu1  ;;  %v1731_v19 = vmul.u32 52429, %v1728_v35  ;;  %v563_v1 = vadd.f32 %v5150_v15, %v5148_v14  ;;  %v4534_v15 = vld [vmem:[#allocation8 + $0x1c8] sm:$0xff] }
 0x130   : > { %v5209_v41 = vpop.f32.mrf.mxu2  ;;  %v5248_v59 = vmul.u32 52429, %v1729_v46  ;;  %v1734_v22 = vmul.u32 52428, %v1729_v46  ;;  %2458 = vmatpush.bf16.msrb.mxu2 %v4472_v0 }
 0x131   : > { %v5211_v45 = vpop.f32.mrf.mxu3  ;;  %v1690_v26 = vadd.s32 %v1689_v6, %v1680_v7  ;;  %v1735_v60 = vshll.u32 %v5241_v51, 16  ;;  %v857_v7 = vadd.f32 %v5194_v16, %v693_v37  ;;  %v695_v13 = vadd.f32 %v5209_v41, %v5134_v55 }
 0x132   : > { %v1737_v14 = vshll.u32 %v5248_v59, 16  ;;  %v5273_v16 = vadd.s32 24, %v5198_v8  ;;  %v5277_v41 = vadd.f32 %v5171_v54, %v5173_v56  ;;  %v1738_v36 = vshrl.u32 %v5248_v59, 16 }
 0x133   : > { %v1691_v47 = vshrl.u32 %v1690_v26, 3  ;;  %vm1739_vm12 = vc.u32 %v1731_v19, %v1735_v60  ;;  %v859_v26 = vadd.f32 %v5211_v45, %v695_v13 }
 0x134   : > { %v1740_v55 = vsel %vm1739_vm12, 1, %v4853_v44  ;;  %v1757_v57 = vand.u32 65535, %v5273_v16 }
 0x135   : > { %v5226_v4 = vpop.f32.mrf.mxu0  ;;  %v1692_v61 = vmul.u32 10, %v1691_v47  ;;  %v1742_v27 = vadd.s32 %v1740_v55, %v1734_v22  ;;  %v1031_v46 = vadd.f32 %v5188_v17, %v859_v26 }
 0x137   : > { %v5291_v54 = vsub.s32 %v5198_v8, %v1692_v61  ;;  %v5302_v18 = vpop.f32.mrf.mxu1  ;;  %v4470_v61 = vld [vmem:[#allocation8 + $0x8] sm:$0xff] }
 0x138   : > { %v680_v11 = vpop.f32.mrf.mxu2 }
 0x139   : > { %v844_v25 = vpop.f32.mrf.mxu3  ;;  %v696_v33 = vadd.f32 %v680_v11, %v5141_v2  ;;  %v1717_v2 = vadd.s32 %v1715_v42, %v1713_v39  ;;  %v1029_v11 = vadd.f32 %v5175_v58, %v857_v7  ;;  %v2067_v58 = vld [vmem:[#allocation2 + $0x2c] sm:$0xe]  ;;  %v1758_v39 = vshrl.u32 %v5273_v16, 16 }
 0x13a   : > { %v2068_v45 = vsel %vm5293_vm6, 0, %v2067_v58  ;;  %v5314_v42 = vadd.f32 %v5220_v50, %v5205_v31  ;;  %vm1957_vm8 = vcmp.ne.s32.totalorder %v5291_v54, 0  ;;  %vm1967_vm9 = vcmp.lt.s32.totalorder %v5291_v54, 0 }
 0x13b   : > { %v860_v5 = vadd.f32 %v844_v25, %v696_v33  ;;  %v1718_v38 = vadd.s32 %v1717_v2, %v1707_v34  ;;  %v2062_v25 = vsel %vm5267_vm13, 0, %v2061_v9  ;;  %v1736_v33 = vshrl.u32 %v5241_v51, 16  ;;  %2069 = vst [vmem:[#allocation2 + $0x2c] sm:$0xe] %v2068_v45  ;;  %v4471_v2 = vld [vmem:[#allocation8 + $0x10] sm:$0xff]  ;;  %v4492_v51 = vld [vmem:[#allocation8 + $0xb8] sm:$0xff]  ;;  %vm5346_vm12 = vmand %vm1967_vm9, %vm1957_vm8 }
 0x13c   : > { %2063 = vst [vmem:[#allocation2 + $0x4] sm:$0x3] %v2062_v25  ;;  %v5310_v34 = vadd.f32 %v5200_v53, %v1029_v11  ;;  %v5322_v53 = vmul.u32 52429, %v1758_v39  ;;  %2573 = vmatpush.bf16.msrb.mxu3 %v4492_v51  ;;  %2459 = vmatpush.bf16.msrb.mxu2 %v4471_v2  ;;  %v1763_v13 = vmul.u32 52428, %v1758_v39  ;;  %v5336_v9 = vadd.s32 10, %v5291_v54 }
 0x13d   : > { %v5246_v63 = vadd.f32 %v5196_v20, %v860_v5  ;;  %v5255_v40 = vpop.f32.mrf.mxu0  ;;  %v5259_v20 = vadd.f32 %v5162_v30, %v5160_v29  ;;  %v1719_v29 = vadd.s32 %v1718_v38, %v1709_v62  ;;  %v1741_v30 = vadd.s32 %v1735_v60, %v1731_v19 }
 0x13e   : > { %v5307_v5 = vadd.s32 32, %v5198_v8  ;;  %v1760_v19 = vmul.u32 52429, %v1757_v57  ;;  %v5320_v60 = vmul.u32 52428, %v1757_v57  ;;  %v1766_v22 = vshll.u32 %v5322_v53, 16  ;;  %v4504_v57 = vld [vmem:[#allocation8 + $0xf8] sm:$0xff] }
 0x13f   : > { %vm1743_vm7 = vc.u32 %v1741_v30, %v1737_v14  ;;  %v1720_v10 = vshrl.u32 %v1719_v29, 3  ;;  %v4481_v29 = vld [vmem:[#allocation8 + $0x60] sm:$0xff]  ;;  %v5359_v39 = vadd.s32 40, %v5198_v8  ;;  %v1148_v51 = vpop.f32.mrf.mxu1  ;;  %2737 = vmatpush.bf16.msrb.mxu0 %v4504_v57 }
 0x140   : > { %v682_v12 = vpop.f32.mrf.mxu2  ;;  %v1744_v35 = vsel %vm1743_vm7, 1, %v4853_v44  ;;  %v1786_v17 = vand.u32 65535, %v5307_v5  ;;  %2574 = vmatpush.bf16.msrb.mxu3 %v4491_v21  ;;  %2370 = vmatpush.bf16.msra.mxu1 %v4481_v29  ;;  %v1765_v0 = vshrl.u32 %v5320_v60, 16 }
 0x141   : > { %v5263_v6 = vpop.f32.mrf.mxu3  ;;  %v1746_v37 = vadd.s32 %v1744_v35, %v1742_v27  ;;  %v697_v3 = vadd.f32 %v682_v12, %v563_v1  ;;  %v1721_v31 = vmul.u32 10, %v1720_v10  ;;  %v1787_v1 = vshrl.u32 %v5307_v5, 16  ;;  %2460 = vmatpush.bf16.msrb.mxu2 %v4470_v61  ;;  %v4490_v35 = vld [vmem:[#allocation8 + $0xa8] sm:$0xff] }
 0x142   : > { %v5330_v12 = vmul.u32 52428, %v1786_v17  ;;  %v1789_v25 = vmul.u32 52429, %v1786_v17  ;;  %v4489_v17 = vld [vmem:[#allocation8 + $0xa0] sm:$0xff]  ;;  %v1816_v21 = vshrl.u32 %v5359_v39, 16 }
 0x143   : > { %v1747_v38 = vadd.s32 %v1746_v37, %v1736_v33  ;;  %v5339_v26 = vmul.u32 52429, %v1787_v1  ;;  %v861_v27 = vadd.f32 %v5263_v6, %v697_v3  ;;  %v5351_v58 = vsub.s32 %v5214_v43, %v1721_v31  ;;  %v4469_v6 = vld [vmem:[#allocation8] sm:$0xff] }
 0x144   : > { %v5362_v43 = vadd.f32 %v5243_v52, %v1031_v46  ;;  %v1792_v2 = vmul.u32 52428, %v1787_v1  ;;  %2575 = vmatpush.bf16.msrb.mxu3 %v4490_v35  ;;  %v1997_v52 = vsel %vm5346_vm12, %v5336_v9, %v5291_v54  ;;  %v1794_v54 = vshrl.u32 %v5330_v12, 16 }
 0x145   : > { %v5318_v62 = vpop.f32.mrf.mxu0  ;;  %v1748_v7 = vadd.s32 %v1747_v38, %v1738_v36  ;;  %v1793_v36 = vshll.u32 %v5330_v12, 16  ;;  %v1795_v37 = vshll.u32 %v5339_v26, 16  ;;  %v1033_v3 = vadd.f32 %v5207_v32, %v861_v27  ;;  %2461 = vmatpush.bf16.msrb.mxu2 %v4469_v6  ;;  %v4502_v27 = vld [vmem:[#allocation8 + $0xe8] sm:$0xff] }
 0x146   : > { %vm1958_vm7 = vcmp.ne.s32.totalorder %v5351_v58, 0  ;;  %vm1968_vm9 = vcmp.lt.s32.totalorder %v5351_v58, 0  ;;  %v5382_v32 = vadd.s32 10, %v5351_v58  ;;  %v1821_v6 = vmul.u32 52428, %v1816_v21 }
 0x147   : > { %v1749_v55 = vshrl.u32 %v1748_v7, 3  ;;  %vm1797_vm15 = vc.u32 %v1789_v25, %v1793_v36  ;;  %v1799_v38 = vadd.s32 %v1793_v36, %v1789_v25  ;;  %v4488_v25 = vld [vmem:[#allocation8 + $0x98] sm:$0xff]  ;;  %vm5411_vm12 = vmand %vm1968_vm9, %vm1958_vm7  ;;  %v5421_v36 = vld [vmem:[%s6018_s2] ss:$0 sm:$0xff] }
 0x148   : > { %v685_v47 = vpop.f32.mrf.mxu2  ;;  %2576 = vmatpush.bf16.msrb.mxu3 %v4489_v17 }
 0x149   : > { %v849_v49 = vpop.f32.mrf.mxu3  ;;  %v698_v59 = vadd.f32 %v685_v47, %v5156_v23  ;;  %v1764_v23 = vshll.u32 %v5320_v60, 16  ;;  %v1767_v47 = vshrl.u32 %v5322_v53, 16  ;;  %v5368_v60 = vadd.f32 %v5302_v18, %v5246_v63  ;;  %v4480_v18 = vld [vmem:[#allocation8 + $0x58] sm:$0xff] }
 0x14a   : > { %v1815_v53 = vand.u32 65535, %v5359_v39  ;;  %v1798_v63 = vsel %vm1797_vm15, 1, %v4853_v44  ;;  %vm1801_vm8 = vc.u32 %v1799_v38, %v1795_v37  ;;  %2371 = vmatpush.bf16.msra.mxu1 %v4480_v18 }
 0x14b   : > { %v862_v50 = vadd.f32 %v849_v49, %v698_v59  ;;  %vm1768_vm10 = vc.u32 %v1760_v19, %v1764_v23  ;;  %v1770_v11 = vadd.s32 %v1764_v23, %v1760_v19  ;;  %v1750_v19 = vmul.u32 10, %v1749_v55 }
 0x14c   : > { %v1769_v30 = vsel %vm1768_vm10, 1, %v4853_v44  ;;  %v1800_v7 = vadd.s32 %v1798_v63, %v1792_v2  ;;  %v1802_v61 = vsel %vm1801_vm8, 1, %v4853_v44  ;;  %v1818_v9 = vmul.u32 52429, %v1815_v53  ;;  %2577 = vmatpush.bf16.msrb.mxu3 %v4488_v25  ;;  %v4487_v2 = vld [vmem:[#allocation8 + $0x90] sm:$0xff] }
 0x14d   : > { %v5333_v14 = vadd.f32 %v5226_v4, %v862_v50  ;;  %v1771_v33 = vadd.s32 %v1769_v30, %v1763_v13  ;;  %vm1772_vm14 = vc.u32 %v1770_v11, %v1766_v22  ;;  %v5375_v46 = vpop.f32.mrf.mxu0  ;;  %v4503_v50 = vld [vmem:[#allocation8 + $0xf0] sm:$0xff]  ;;  %v5386_v13 = vsub.s32 %v5230_v24, %v1750_v19 }
 0x14e   : > { %v1773_v49 = vsel %vm1772_vm14, 1, %v4853_v44  ;;  %2738 = vmatpush.bf16.msrb.mxu0 %v4503_v50  ;;  %v1796_v22 = vshrl.u32 %v5339_v26, 16  ;;  %v1804_v1 = vadd.s32 %v1802_v61, %v1800_v7  ;;  %v5391_v29 = vmul.u32 52428, %v1815_v53  ;;  %v4479_v50 = vld [vmem:[#allocation8 + $0x50] sm:$0xff] }
 0x14f   : > { %v1775_v59 = vadd.s32 %v1773_v49, %v1771_v33  ;;  %vm5394_vm10 = vcmp.lt.s32.totalorder %v1997_v52, 8  ;;  %v5398_v4 = vmul.u32 52429, %v1816_v21  ;;  %vm1959_vm14 = vcmp.ne.s32.totalorder %v5386_v13, 0  ;;  %v1151_v49 = vpop.f32.mrf.mxu1  ;;  %2372 = vmatpush.bf16.msra.mxu1 %v4479_v50 }
 0x150   : > { %v687_v45 = vpop.f32.mrf.mxu2  ;;  %v1805_v33 = vadd.s32 %v1804_v1, %v1794_v54  ;;  %vm1969_vm15 = vcmp.lt.s32.totalorder %v5386_v13, 0  ;;  %v5435_v18 = vadd.s32 10, %v5386_v13  ;;  %2578 = vmatpush.bf16.msrb.mxu3 %v4487_v2  ;;  %v1823_v7 = vshrl.u32 %v5391_v29, 16 }
 0x151   : > { %v5354_v10 = vpop.f32.mrf.mxu3  ;;  %v1776_v31 = vadd.s32 %v1775_v59, %v1765_v0  ;;  %v699_v12 = vadd.f32 %v687_v45, %v5259_v20  ;;  %v5401_v0 = vadd.s32 48, %v5198_v8  ;;  %v1822_v20 = vshll.u32 %v5391_v29, 16  ;;  %vm5446_vm9 = vmand %vm1969_vm15, %vm1959_vm14  ;;  %v4500_v29 = vld [vmem:[#allocation8 + $0xd8] sm:$0xff] }
 0x152   : > { %v5405_v45 = vadd.f32 %v1148_v51, %v1033_v3  ;;  %2739 = vmatpush.bf16.msrb.mxu0 %v4502_v27  ;;  %v4501_v51 = vld [vmem:[#allocation8 + $0xe0] sm:$0xff]  ;;  %v1999_v27 = vsel %vm5446_vm9, %v5435_v18, %v5386_v13 }
 0x153   : > { %v1777_v23 = vadd.s32 %v1776_v31, %v1767_v47  ;;  %v1806_v47 = vadd.s32 %v1805_v33, %v1796_v22  ;;  %vm1826_vm7 = vc.u32 %v1818_v9, %v1822_v20  ;;  %v1828_v59 = vadd.s32 %v1822_v20, %v1818_v9  ;;  %v4486_v9 = vld [vmem:[#allocation8 + $0x88] sm:$0xff] }
 0x154   : > { %v1827_v19 = vsel %vm1826_vm7, 1, %v4853_v44  ;;  %v1844_v38 = vand.u32 65535, %v5401_v0  ;;  %v1845_v3 = vshrl.u32 %v5401_v0, 16  ;;  %v863_v52 = vadd.f32 %v5354_v10, %v699_v12  ;;  %2579 = vmatpush.bf16.msrb.mxu3 %v4486_v9 }
 0x155   : > { %v1778_v11 = vshrl.u32 %v1777_v23, 3  ;;  %v1998_v31 = vsel %vm5411_vm12, %v5382_v32, %v5351_v58  ;;  %v5432_v17 = vpop.f32.mrf.mxu0  ;;  %v1829_v63 = vadd.s32 %v1827_v19, %v1821_v6  ;;  %v1807_v54 = vshrl.u32 %v1806_v47, 3 }
 0x156   : > { %2740 = vmatpush.bf16.msrb.mxu0 %v4501_v51  ;;  %vm5454_vm12 = vcmp.lt.s32.totalorder %v1998_v31, 8  ;;  %v1825_v22 = vshrl.u32 %v5398_v4, 16  ;;  %v5459_v12 = vmul.u32 52428, %v1844_v38  ;;  %v1847_v25 = vmul.u32 52429, %v1844_v38  ;;  %v4477_v38 = vld [vmem:[#allocation8 + $0x40] sm:$0xff] }
 0x157   : > { %v1779_v37 = vmul.u32 10, %v1778_v11  ;;  %vm2071_vm7 = vsmask.f32 5392 }
 0x158   : > { %v1295_v55 = vpop.f32.mrf.mxu2  ;;  %v1851_v6 = vshll.u32 %v5459_v12, 16 }
 0x159   : > { %v1467_v30 = vpop.f32.mrf.mxu3  ;;  %v1320_v26 = vadd.f32 %v1295_v55, %v5277_v41  ;;  %v1824_v41 = vshll.u32 %v5398_v4, 16  ;;  %v5451_v32 = vsub.s32 %v5273_v16, %v1779_v37  ;;  %v5461_v55 = vmul.u32 52429, %v1845_v3 }
 0x15a   : > { %v5464_v16 = vadd.f32 %v5255_v40, %v863_v52  ;;  %v1808_v4 = vmul.u32 10, %v1807_v54  ;;  %2741 = vmatpush.bf16.msrb.mxu0 %v4500_v29  ;;  %v1850_v37 = vmul.u32 52428, %v1845_v3  ;;  %v1857_v24 = vadd.s32 %v1851_v6, %v1847_v25 }
 0x15b   : > { %v1492_v57 = vadd.f32 %v1467_v30, %v1320_v26  ;;  %vm1830_vm8 = vc.u32 %v1828_v59, %v1824_v41  ;;  %v4478_v26 = vld [vmem:[#allocation8 + $0x48] sm:$0xff]  ;;  %vm1960_vm14 = vcmp.ne.s32.totalorder %v5451_v32, 0  ;;  %vm1970_vm15 = vcmp.lt.s32.totalorder %v5451_v32, 0  ;;  %v4485_v41 = vld [vmem:[#allocation8 + $0x80] sm:$0xff] }
 0x15c   : > { %v1831_v23 = vsel %vm1830_vm8, 1, %v4853_v44  ;;  %2373 = vmatpush.bf16.msra.mxu1 %v4478_v26  ;;  %v5482_v19 = vsub.s32 %v5307_v5, %v1808_v4  ;;  %2580 = vmatpush.bf16.msrb.mxu3 %v4485_v41  ;;  %vm5494_vm9 = vmand %vm1970_vm15, %vm1960_vm14 }
 0x15d   : > { %v1622_v53 = vadd.f32 %v5318_v62, %v1492_v57  ;;  %v5439_v62 = vadd.f32 %v1151_v49, %v5333_v14  ;;  %v1833_v1 = vadd.s32 %v1831_v23, %v1829_v63  ;;  %v4499_v57 = vld [vmem:[#allocation8 + $0xd0] sm:$0xff]  ;;  %v5479_v49 = vadd.s32 10, %v5451_v32  ;;  %v5485_v3 = vpop.f32.mrf.mxu0  ;;  %vm5530_vm15 = vmor %vm2059_vm11, %vm2071_vm7 }
 0x15e   : > { %2742 = vmatpush.bf16.msrb.mxu0 %v4499_v57  ;;  %vm1971_vm14 = vcmp.lt.s32.totalorder %v5482_v19, 0 }
 0x15f   : > { %v1636_v10 = vadd.f32 %v5421_v36, %v1622_v53  ;;  %v1834_v33 = vadd.s32 %v1833_v1, %v1823_v7  ;;  %v2183_v7 = vld [vmem:[#allocation2 + $0x4] sm:$0xe] }
 0x160   : > { %v1297_v61 = vpop.f32.mrf.mxu2  ;;  %2374 = vmatpush.bf16.msra.mxu1 %v4477_v38 }
 0x161   : > { %v1469_v21 = vpop.f32.mrf.mxu3  ;;  %v1646_v30 = vmax.f32 %v1636_v10, 0.0  ;;  %v1321_v11 = vadd.f32 %v1297_v61, %v5280_v48  ;;  %v1853_v48 = vshll.u32 %v5461_v55, 16  ;;  %v1835_v13 = vadd.s32 %v1834_v33, %v1825_v22  ;;  %v4497_v33 = vld [vmem:[#allocation8 + $0xc0] sm:$0xff] }
 0x162   : > { %v5500_v22 = vadd.s32 56, %v5198_v8 }
 0x163   : > { %v2037_v40 = vsel %vm5394_vm10, %v1646_v30, 0.0  ;;  %v1493_v20 = vadd.f32 %v1469_v21, %v1321_v11  ;;  %vm1855_vm10 = vc.u32 %v1847_v25, %v1851_v6  ;;  %v1836_v59 = vshrl.u32 %v1835_v13, 3  ;;  %v4498_v21 = vld [vmem:[#allocation8 + $0xc8] sm:$0xff] }
 0x164   : > { %v2047_v35 = vpack.c.bf16 %v2037_v40, %v2037_v40  ;;  %v1856_v53 = vsel %vm1855_vm10, 1, %v4853_v44  ;;  %vm1859_vm8 = vc.u32 %v1857_v24, %v1853_v48  ;;  %vm5502_vm10 = vcmp.lt.s32.totalorder %v1999_v27, 8  ;;  %2743 = vmatpush.bf16.msrb.mxu0 %v4498_v21 }
 0x165   : > { %v1623_v47 = vadd.f32 %v5375_v46, %v1493_v20  ;;  %v1852_v46 = vshrl.u32 %v5459_v12, 16  ;;  %v1837_v54 = vmul.u32 10, %v1836_v59  ;;  %v1858_v5 = vadd.s32 %v1856_v53, %v1850_v37 }
 0x166   : > { %v2074_v2 = vshrl.u32 %v2047_v35, 16  ;;  %v2077_v51 = vshll.u32 %v2047_v35, 16  ;;  %v1860_v61 = vsel %vm1859_vm8, 1, %v4853_v44  ;;  %v1873_v25 = vand.u32 65535, %v5500_v22 }
 0x167   : > { %v1637_v52 = vadd.f32 %v5421_v36, %v1623_v47  ;;  %v1862_v29 = vadd.s32 %v1860_v61, %v1858_v5  ;;  %v5510_v11 = vsub.s32 %v5359_v39, %v1837_v54  ;;  %v1874_v26 = vshrl.u32 %v5500_v22, 16 }
 0x168   : > { %v2076_v31 = vrot.slane %v2074_v2, 6  ;;  %v2079_v50 = vrot.slane %v2077_v51, 7  ;;  %v1300_v63 = vpop.f32.mrf.mxu2  ;;  %v1991_v40 = vadd.s32 10, %v5482_v19  ;;  %v5524_v20 = vmul.u32 52428, %v1873_v25  ;;  %2744 = vmatpush.bf16.msrb.mxu0 %v4497_v33  ;;  %v1607_v2 = vpop.f32.mrf.mxu0 }
 0x169   : > { %v1472_v18 = vpop.f32.mrf.mxu3  ;;  %v1647_v10 = vmax.f32 %v1637_v52, 0.0  ;;  %v1322_v58 = vadd.f32 %v1300_v63, %v5288_v28  ;;  %v1854_v28 = vshrl.u32 %v5461_v55, 16  ;;  %v2000_v55 = vsel %vm5494_vm9, %v5479_v49, %v5451_v32 }
 0x16a   : > { %v2080_v1 = vor.u32 %v2079_v50, %v2076_v31  ;;  %v1863_v39 = vadd.s32 %v1862_v29, %v1852_v46  ;;  %v1876_v35 = vmul.u32 52429, %v1873_v25  ;;  %vm1972_vm8 = vcmp.lt.s32.totalorder %v5510_v11, 0 }
 0x16b   : > { %v2038_v12 = vsel %vm5454_vm12, %v1647_v10, 0.0  ;;  %v1494_v30 = vadd.f32 %v1472_v18, %v1322_v58  ;;  %vm1961_vm12 = vcmp.ne.s32.totalorder %v5482_v19, 0  ;;  %v5535_v47 = vmul.u32 52429, %v1874_v26  ;;  %v4586_v18 = vld [vmem:[#allocation2] sm:$0xe] }
 0x16c   : > { %v2184_v4 = vsel %vm5293_vm6, %v2080_v1, %v2183_v7  ;;  %v2048_v27 = vpack.c.bf16 %v2038_v12, %v2038_v12  ;;  %vm1962_vm6 = vcmp.ne.s32.totalorder %v5510_v11, 0  ;;  %v1864_v32 = vadd.s32 %v1863_v39, %v1854_v28  ;;  %vm5542_vm11 = vmand %vm1971_vm14, %vm1961_vm12 }
 0x16d   : > { %2185 = vst [vmem:[#allocation2 + $0x4] sm:$0xe] %v2184_v4  ;;  %v1624_v14 = vadd.f32 %v5432_v17, %v1494_v30  ;;  %v1880_v38 = vshll.u32 %v5524_v20, 16  ;;  %v2081_v52 = vrot.slane %v2080_v1, 4  ;;  %vm5547_vm7 = vcmp.lt.s32.totalorder %v2000_v55, 8 }
 0x16e   : > { %v2083_v6 = vshrl.u32 %v2048_v27, 16  ;;  %v2086_v56 = vshll.u32 %v2048_v27, 16  ;;  %v1865_v59 = vshrl.u32 %v1864_v32, 3  ;;  %v2001_v58 = vsel %vm5542_vm11, %v1991_v40, %v5482_v19 }
 0x16f   : > { %v1638_v48 = vadd.f32 %v5421_v36, %v1624_v14  ;;  %vm5556_vm9 = vc.u32 %v1876_v35, %v1880_v38  ;;  %v1879_v21 = vmul.u32 52428, %v1874_v26  ;;  %v1882_v19 = vshll.u32 %v5535_v47, 16 }
 0x170   : > { %v2085_v13 = vrot.slane %v2083_v6, 6  ;;  %v2088_v41 = vrot.slane %v2086_v56, 7  ;;  %v1302_v57 = vpop.f32.mrf.mxu2  ;;  %v1866_v63 = vmul.u32 10, %v1865_v59  ;;  %v1885_v30 = vsel %vm5556_vm9, 1, %v4853_v44 }
 0x171   : > { %v1474_v37 = vpop.f32.mrf.mxu3  ;;  %v1648_v49 = vmax.f32 %v1638_v48, 0.0  ;;  %v1323_v24 = vadd.f32 %v1302_v57, %v5310_v34  ;;  %v5552_v34 = vadd.s32 10, %v5510_v11  ;;  %v1886_v25 = vadd.s32 %v1880_v38, %v1876_v35 }
 0x172   : > { %v2089_v46 = vor.u32 %v2088_v41, %v2085_v13  ;;  %v5575_v28 = vsub.s32 %v5401_v0, %v1866_v63  ;;  %v1881_v0 = vshrl.u32 %v5524_v20, 16  ;;  %vm5587_vm12 = vcmp.lt.s32.totalorder %v2001_v58, 8  ;;  %v1609_v41 = vpop.f32.mrf.mxu0 }
 0x173   : > { %v2039_v31 = vsel %vm5502_vm10, %v1648_v49, 0.0  ;;  %v1495_v50 = vadd.f32 %v1474_v37, %v1323_v24  ;;  %vm5569_vm10 = vmand %vm1972_vm8, %vm1962_vm6  ;;  %vm1888_vm8 = vc.u32 %v1886_v25, %v1882_v19  ;;  %v1883_v51 = vshrl.u32 %v5535_v47, 16 }
 0x174   : > { %v2090_v5 = vsel %vm5530_vm15, %v2081_v52, %v2089_v46  ;;  %v2049_v7 = vpack.c.bf16 %v2039_v31, %v2039_v31  ;;  %v4554_v10 = vld [vmem:[#allocation2] sm:$0xff]   ;;  %vm1963_vm14 = vcmp.ne.s32.totalorder %v5575_v28, 0  ;;  %vm1973_vm6 = vcmp.lt.s32.totalorder %v5575_v28, 0 }
 0x175   : > { %v4585_v61 = vld [vmem:[#allocation2] sm:$0xf0]  ;;  %2186 = vst [vmem:[#allocation2 + $0x8] sm:$0xf] %v2090_v5  ;;  %v1625_v1 = vadd.f32 %v5485_v3, %v1495_v50  ;;  %v2273_v9 = vshll.u32 %v4554_v10, 16  ;;  %2462 = vmatmul.bf16.vlgmr.msrb.gmra.mxu2 %v4554_v10  ;;  %v2002_v3 = vsel %vm5569_vm10, %v5552_v34, %v5510_v11  ;;  %v1887_v11 = vadd.s32 %v1885_v30, %v1879_v21  ;;  %vm5604_vm11 = vmand %vm1973_vm6, %vm1963_vm14  ;;  %v4512_v34 = vld [vmem:[#allocation8 + $0x138] sm:$0xff] }
 0x176   : > { %v2093_v29 = vshrl.u32 %v2049_v7, 16  ;;  %v2096_v12 = vshll.u32 %v2049_v7, 16  ;;  %v4587_v27 = vor.u32 %v4586_v18, %v4585_v61  ;;  %v2091_v48 = vrot.slane %v2089_v46, 4  ;;  %v2617_v38 = vld [vmem:[#allocation2 + $0x4] sm:$0xe]  ;;  %2908 = vmatpush.bf16.msrb.mxu1 %v4512_v34 }
 0x177   : > { %v1639_v4 = vadd.f32 %v5421_v36, %v1625_v1  ;;  %v2275_v14 = vrot.slane %v2273_v9, 1  ;;  %v2271_v20 = vshrl.u32 %v4554_v10, 16  ;;  %v5597_v57 = vadd.s32 10, %v5575_v28 }
 0x178   : > { %v2095_v55 = vrot.slane %v2093_v29, 6  ;;  %v2098_v26 = vrot.slane %v2096_v12, 7  ;;  %v1305_v39 = vpop.f32.mrf.mxu2  ;;  %v1889_v37 = vsel %vm1888_vm8, 1, %v4853_v44  ;;  %v2509_v46 = vrot.slane %v4587_v27, 1 }
 0x179   : > { %v1477_v33 = vpop.f32.mrf.mxu3  ;;  %v1649_v56 = vmax.f32 %v1639_v4, 0.0  ;;  %v1324_v40 = vadd.f32 %v1305_v39, %v5314_v42  ;;  %v1891_v59 = vadd.s32 %v1889_v37, %v1887_v11  ;;  %v5609_v53 = vor.u32 %v2275_v14, %v2271_v20 }
 0x17a   : > { %v2099_v32 = vor.u32 %v2098_v26, %v2095_v55  ;;  %v5612_v31 = vadd.s32 64, %v5198_v8  ;;  %v5615_v54 = vadd.s32 72, %v5198_v8  ;;  %v2003_v47 = vsel %vm5604_vm11, %v5597_v57, %v5575_v28  ;;  %v1612_v11 = vpop.f32.mrf.mxu0 }
 0x17b   : > { %v2040_v35 = vsel %vm5547_vm7, %v1649_v56, 0.0  ;;  %v1496_v13 = vadd.f32 %v1477_v33, %v1324_v40  ;;  %v1892_v18 = vadd.s32 %v1891_v59, %v1881_v0  ;;  %vm5624_vm7 = vcmp.lt.s32.totalorder %v2002_v3, 8 }
 0x17c   : > { %v2100_v42 = vsel %vm5530_vm15, %v2091_v48, %v2099_v32  ;;  %v2050_v49 = vpack.c.bf16 %v2040_v35, %v2040_v35  ;;  %v1903_v7 = vshrl.u32 %v5612_v31, 16  ;;  %v2656_v1 = vunpack.c.l.b16 %v2617_v38  ;;  %v4511_v48 = vld [vmem:[#allocation8 + $0x130] sm:$0xff] }
 0x17d   : > { %2187 = vst [vmem:[#allocation2 + $0xc] sm:$0xf] %v2100_v42  ;;  %v1626_v52 = vadd.f32 %v1607_v2, %v1496_v13  ;;  %v1902_v2 = vand.u32 65535, %v5612_v31  ;;  %v1893_v8 = vadd.s32 %v1892_v18, %v1883_v51  ;;  %v2101_v9 = vrot.slane %v2099_v32, 4  ;;  %2909 = vmatpush.bf16.msrb.mxu1 %v4511_v48 }
 0x17e   : > { %v2103_v50 = vshrl.u32 %v2050_v49, 16  ;;  %v2106_v63 = vshll.u32 %v2050_v49, 16  ;;  %v5631_v25 = vmul.u32 52429, %v1903_v7  ;;  %v1931_v4 = vand.u32 65535, %v5615_v54 }
 0x17f   : > { %v1640_v5 = vadd.f32 %v5421_v36, %v1626_v52  ;;  %v5629_v28 = vmul.u32 52428, %v1902_v2  ;;  %v1894_v30 = vshrl.u32 %v1893_v8, 3  ;;  %v1905_v0 = vmul.u32 52429, %v1902_v2 }
 0x180   : > { %v2105_v10 = vrot.slane %v2103_v50, 6  ;;  %v2108_v58 = vrot.slane %v2106_v63, 7  ;;  %v1307_v23 = vpop.f32.mrf.mxu2  ;;  %v1932_v56 = vshrl.u32 %v5615_v54, 16  ;;  %v1908_v32 = vmul.u32 52428, %v1903_v7 }
 0x181   : > { %v1479_v61 = vpop.f32.mrf.mxu3  ;;  %v1650_v19 = vmax.f32 %v1640_v5, 0.0  ;;  %v1325_v29 = vadd.f32 %v1307_v23, %v5362_v43  ;;  %v1909_v55 = vshll.u32 %v5629_v28, 16  ;;  %v1895_v39 = vmul.u32 10, %v1894_v30 }
 0x182   : > { %v2109_v12 = vor.u32 %v2108_v58, %v2105_v10  ;;  %v1911_v20 = vshll.u32 %v5631_v25, 16  ;;  %vm5661_vm10 = vcmp.lt.s32.totalorder %v2003_v47, 8  ;;  %v1910_v21 = vshrl.u32 %v5629_v28, 16 }
 0x183   : > { %v2041_v3 = vsel %vm5587_vm12, %v1650_v19, 0.0  ;;  %v1497_v27 = vadd.f32 %v1479_v61, %v1325_v29  ;;  %v5651_v49 = vsub.s32 %v5500_v22, %v1895_v39  ;;  %vm5657_vm9 = vc.u32 %v1905_v0, %v1909_v55 }
 0x184   : > { %v2110_v26 = vsel %vm5530_vm15, %v2101_v9, %v2109_v12  ;;  %v2051_v14 = vpack.c.bf16 %v2041_v3, %v2041_v3  ;;  %v5639_v43 = vld [vmem:[#allocation2 + $0x8] sm:$0xff]  ;;  %v2111_v5 = vrot.slane %v2109_v12, 4  ;;  %v1915_v58 = vadd.s32 %v1909_v55, %v1905_v0  ;;  %v4520_v0 = vld [vmem:[#allocation8 + $0x178] sm:$0xff] }
 0x185   : > { %v5641_v33 = vld [vmem:[#allocation2 + $0x8] sm:$0xff]   ;;  %2188 = vst [vmem:[#allocation2 + $0x10] sm:$0xf] %v2110_v26  ;;  %v1627_v40 = vadd.f32 %v1609_v41, %v1497_v27  ;;  %2467 = vmatmul.bf16.gmra.mxu2 %v5639_v43  ;;  %v2510_v57 = vrot.slane %v5639_v43, 1  ;;  %v2278_v37 = vshll.u32 %v5639_v43, 16  ;;  %vm1964_vm12 = vcmp.ne.s32.totalorder %v5651_v49, 0 }
 0x186   : > { %v2657_v6 = vunpack.c.l.b16 %v5641_v33  ;;  %v2113_v35 = vshrl.u32 %v2051_v14, 16  ;;  %v2116_v13 = vshll.u32 %v2051_v14, 16  ;;  %vm1974_vm14 = vcmp.lt.s32.totalorder %v5651_v49, 0  ;;  %v1614_v14 = vpop.f32.mrf.mxu0  ;;  %3037 = vmatpush.bf16.msra.mxu2 %v4520_v0 }
 0x187   : > { %v1641_v42 = vadd.f32 %v5421_v36, %v1627_v40  ;;  %v2511_v22 = vsel %vm591_vm3, %v2509_v46, %v2510_v57  ;;  %v2280_v50 = vrot.slane %v2278_v37, 1  ;;  %v1994_v7 = vadd.s32 10, %v5651_v49  ;;  %vm5681_vm6 = vmand %vm1974_vm14, %vm1964_vm12 }
 0x188   : > { %v5655_v41 = vpack.c.b16 %v2657_v6, %v2656_v1  ;;  %v2115_v51 = vrot.slane %v2113_v35, 6  ;;  %v2118_v59 = vrot.slane %v2116_v13, 7  ;;  %v1310_v38 = vpop.f32.mrf.mxu2  ;;  %2581 = vmatmul.bf16.vlgmr.msrb.gmra.mxu3 %v2511_v22  ;;  %v1912_v1 = vshrl.u32 %v5631_v25, 16 }
 0x189   : > { %v1482_v52 = vpop.f32.mrf.mxu3  ;;  %v1651_v63 = vmax.f32 %v1641_v42, 0.0  ;;  %v1326_v18 = vadd.f32 %v1310_v38, %v5368_v60  ;;  %v2281_v47 = vsel %vm351_vm0, %v5609_v53, %v2280_v50  ;;  %v1914_v60 = vsel %vm5657_vm9, 1, %v4853_v44  ;;  %v4519_v38 = vld [vmem:[#allocation8 + $0x170] sm:$0xff] }
 0x18a   : > { %v2119_v2 = vor.u32 %v2118_v59, %v2115_v51  ;;  %2375 = vmatmul.bf16.vlgmr.msra.gmra.mxu1 %v2281_v47  ;;  %v2673_v19 = vrot.slane %v5655_v41, 1  ;;  %v1916_v29 = vadd.s32 %v1914_v60, %v1908_v32  ;;  %vm1917_vm8 = vc.u32 %v1915_v58, %v1911_v20  ;;  %3038 = vmatpush.bf16.msra.mxu2 %v4519_v38 }
 0x18b   : > { %v2042_v10 = vsel %vm5624_vm7, %v1651_v63, 0.0  ;;  %v1498_v46 = vadd.f32 %v1482_v52, %v1326_v18  ;;  %v1918_v27 = vsel %vm1917_vm8, 1, %v4853_v44  ;;  %v2004_v28 = vsel %vm5681_vm6, %v1994_v7, %v5651_v49 }
 0x18c   : > { %v2120_v23 = vsel %vm5530_vm15, %v2111_v5, %v2119_v2  ;;  %v2052_v61 = vpack.c.bf16 %v2042_v10, %v2042_v10  ;;  %v5685_v53 = vld [vmem:[#allocation2 + $0xc] sm:$0xff]  ;;  %v2121_v55 = vrot.slane %v2119_v2, 4  ;;  %v1920_v25 = vadd.s32 %v1918_v27, %v1916_v29 }
 0x18d   : > { %2189 = vst [vmem:[#allocation2 + $0x14] sm:$0xf] %v2120_v23  ;;  %v1628_v9 = vadd.f32 %v1612_v11, %v1498_v46  ;;  %v2674_v3 = vrot.slane %v5685_v53, 1  ;;  %v5701_v20 = vmul.u32 52428, %v1931_v4  ;;  %v1934_v42 = vmul.u32 52429, %v1931_v4 }
 0x18e   : > { %v2123_v12 = vshrl.u32 %v2052_v61, 16  ;;  %v2126_v30 = vshll.u32 %v2052_v61, 16  ;;  %v1921_v37 = vadd.s32 %v1920_v25, %v1910_v21  ;;  %v2282_v24 = vshrl.u32 %v5639_v43, 16  ;;  %v4518_v61 = vld [vmem:[#allocation8 + $0x168] sm:$0xff] }
 0x18f   : > { %v1642_v26 = vadd.f32 %v5421_v36, %v1628_v9  ;;  %v2675_v32 = vsel %vm591_vm3, %v2673_v19, %v2674_v3  ;;  %v5709_v51 = vmul.u32 52429, %v1932_v56  ;;  %v1938_v59 = vshll.u32 %v5701_v20, 16  ;;  %3039 = vmatpush.bf16.msra.mxu2 %v4518_v61 }
 0x190   : > { %v2125_v39 = vrot.slane %v2123_v12, 6  ;;  %v2128_v40 = vrot.slane %v2126_v30, 7  ;;  %v1312_v11 = vpop.f32.mrf.mxu2  ;;  %2745 = vmatmul.bf16.vlgmr.msrb.gmra.mxu0 %v2675_v32  ;;  %vm5714_vm11 = vcmp.lt.s32.totalorder %v2004_v28, 8  ;;  %v1922_v63 = vadd.s32 %v1921_v37, %v1912_v1  ;;  %v1617_v28 = vpop.f32.mrf.mxu0 }
 0x191   : > { %v1484_v48 = vpop.f32.mrf.mxu3  ;;  %v1652_v35 = vmax.f32 %v1642_v26, 0.0  ;;  %v1327_v13 = vadd.f32 %v1312_v11, %v5405_v45  ;;  %v2284_v2 = vor.u32 %v2282_v24, %v2280_v50  ;;  %v1937_v47 = vmul.u32 52428, %v1932_v56  ;;  %v4509_v24 = vld [vmem:[#allocation8 + $0x120] sm:$0xff]  ;;  %v4531_v45 = vld [vmem:[#allocation8 + $0x1b0] sm:$0xff] }
 0x192   : > { %v2129_v49 = vor.u32 %v2128_v40, %v2125_v39  ;;  %v1923_v7 = vshrl.u32 %v1922_v63, 3  ;;  %v1940_v10 = vshll.u32 %v5709_v51, 16  ;;  %vm1942_vm7 = vc.u32 %v1934_v42, %v1938_v59 }
 0x193   : > { %v2043_v52 = vsel %vm5661_vm10, %v1652_v35, 0.0  ;;  %v1499_v22 = vadd.f32 %v1484_v48, %v1327_v13  ;;  %v1943_v56 = vsel %vm1942_vm7, 1, %v4853_v44  ;;  %v1944_v21 = vadd.s32 %v1938_v59, %v1934_v42  ;;  %v1153_v48 = vpop.f32.mrf.mxu1 }
 0x194   : > { %v2130_v4 = vsel %vm5530_vm15, %v2121_v55, %v2129_v49  ;;  %v2053_v18 = vpack.c.bf16 %v2043_v52, %v2043_v52  ;;  %v5720_v5 = vld [vmem:[#allocation2 + $0x10] sm:$0xff]  ;;  %v1924_v8 = vmul.u32 10, %v1923_v7  ;;  %v2131_v27 = vrot.slane %v2129_v49, 4 }
 0x195   : > { %2190 = vst [vmem:[#allocation2 + $0x18] sm:$0xf] %v2130_v4  ;;  %v1629_v34 = vadd.f32 %v1614_v14, %v1499_v22  ;;  %2472 = vmatmul.bf16.gmra.mxu2 %v5720_v5  ;;  %v2512_v58 = vrot.slane %v5720_v5, 1  ;;  %v2286_v23 = vshll.u32 %v5720_v5, 16  ;;  %v1945_v39 = vadd.s32 %v1943_v56, %v1937_v47  ;;  %v4516_v22 = vld [vmem:[#allocation8 + $0x158] sm:$0xff] }
 0x196   : > { %v2133_v46 = vshrl.u32 %v2053_v18, 16  ;;  %v2136_v60 = vshll.u32 %v2053_v18, 16  ;;  %v1925_v26 = vsub.s32 %v5612_v31, %v1924_v8  ;;  %vm5741_vm9 = vc.u32 %v1944_v21, %v1940_v10  ;;  %v4532_v31 = vld [vmem:[#allocation8 + $0x1b8] sm:$0xff] }
 0x197   : > { %v1643_v50 = vadd.f32 %v5421_v36, %v1629_v34  ;;  %v2513_v12 = vsel %vm591_vm3, %v2510_v57, %v2512_v58  ;;  %v5735_v30 = vrot.slane %v2286_v23, 1  ;;  %v4510_v57 = vld [vmem:[#allocation8 + $0x128] sm:$0xff]  ;;  %v1939_v42 = vshrl.u32 %v5701_v20, 16  ;;  %3201 = vmatpush.bf16.msra.mxu3 %v4532_v31 }
 0x198   : > { %v2135_v1 = vrot.slane %v2133_v46, 6  ;;  %v2138_v9 = vrot.slane %v2136_v60, 7  ;;  %v1315_v19 = vpop.f32.mrf.mxu2  ;;  %2586 = vmatmul.bf16.gmra.mxu3 %v2513_v12  ;;  %vm1965_vm10 = vcmp.ne.s32.totalorder %v1925_v26, 0  ;;  %vm1975_vm12 = vcmp.lt.s32.totalorder %v1925_v26, 0  ;;  %2910 = vmatpush.bf16.msrb.mxu1 %v4510_v57  ;;  %v4508_v60 = vld [vmem:[#allocation8 + $0x118] sm:$0xff] }
 0x199   : > { %v1487_v29 = vpop.f32.mrf.mxu3  ;;  %v1653_v0 = vmax.f32 %v1643_v50, 0.0  ;;  %v1328_v55 = vadd.f32 %v1315_v19, %v5439_v62  ;;  %v2289_v25 = vsel %vm351_vm0, %v2284_v2, %v5735_v30  ;;  %v4517_v62 = vld [vmem:[#allocation8 + $0x160] sm:$0xff]  ;;  %vm5749_vm14 = vmand %vm1975_vm12, %vm1965_vm10  ;;  %v1995_v37 = vadd.s32 10, %v1925_v26  ;;  %v4515_v50 = vld [vmem:[#allocation8 + $0x150] sm:$0xff] }
 0x19a   : > { %v2139_v14 = vor.u32 %v2138_v9, %v2135_v1  ;;  %2380 = vmatmul.bf16.gmra.mxu1 %v2289_v25  ;;  %v1941_v38 = vshrl.u32 %v5709_v51, 16  ;;  %v1947_v52 = vsel %vm5741_vm9, 1, %v4853_v44  ;;  %3040 = vmatpush.bf16.msra.mxu2 %v4517_v62  ;;  %v1165_v2 = vadd.f32 %v1153_v48, %v5464_v16  ;;  %v4529_v62 = vld [vmem:[#allocation8 + $0x1a0] sm:$0xff] }
 0x19b   : > { %v2044_v40 = vsel %vm5714_vm11, %v1653_v0, 0.0  ;;  %v1500_v11 = vadd.f32 %v1487_v29, %v1328_v55  ;;  %v2005_v20 = vsel %vm5749_vm14, %v1995_v37, %v1925_v26  ;;  %v1949_v18 = vadd.s32 %v1947_v52, %v1945_v39  ;;  %3202 = vmatpush.bf16.msra.mxu3 %v4531_v45  ;;  %v4507_v29 = vld [vmem:[#allocation8 + $0x110] sm:$0xff]  ;;  %v1619_v0 = vpop.f32.mrf.mxu0  ;;  %v4530_v26 = vld [vmem:[#allocation8 + $0x1a8] sm:$0xff]  ;;  %v4513_v52 = vld [vmem:[#allocation8 + $0x140] sm:$0xff] }
 0x19c   : > { %v2140_v32 = vsel %vm5530_vm15, %v2131_v27, %v2139_v14  ;;  %v2054_v35 = vpack.c.bf16 %v2044_v40, %v2044_v40  ;;  %v5754_v49 = vld [vmem:[#allocation2 + $0x14] sm:$0xff]  ;;  %vm5765_vm6 = vcmp.lt.s32.totalorder %v2005_v20, 8  ;;  %2911 = vmatpush.bf16.msrb.mxu1 %v4509_v24  ;;  %v2141_v8 = vrot.slane %v2139_v14, 4  ;;  %v4514_v39 = vld [vmem:[#allocation8 + $0x148] sm:$0xff] }
 0x19d   : > { %2191 = vst [vmem:[#allocation2 + $0x1c] sm:$0xf] %v2140_v32  ;;  %v1630_v59 = vadd.f32 %v1617_v28, %v1500_v11  ;;  %v2676_v51 = vrot.slane %v5754_v49, 1  ;;  %v1950_v46 = vadd.s32 %v1949_v18, %v1939_v42  ;;  %v4540_v14 = vld [vmem:[#allocation8 + $0x1f8] sm:$0xff]  ;;  %v2290_v25 = vshrl.u32 %v5720_v5, 16 }
 0x19e   : > { %v2143_v63 = vshrl.u32 %v2054_v35, 16  ;;  %v2146_v4 = vshll.u32 %v2054_v35, 16  ;;  %3041 = vmatpush.bf16.msra.mxu2 %v4516_v22  ;;  %3372 = vmatpush.bf16.msra.mxu0 %v4540_v14  ;;  %v4539_v35 = vld [vmem:[#allocation8 + $0x1f0] sm:$0xff]  ;;  %v2803_v13 = vshrl.u32 %v5655_v41, 16  ;;  %v4506_v22 = vld [vmem:[#allocation8 + $0x108] sm:$0xff]  ;;  %v2806_v45 = vshll.u32 %v5655_v41, 16 }
 0x19f   : > { %v1644_v47 = vadd.f32 %v5421_v36, %v1630_v59  ;;  %v2677_v16 = vsel %vm591_vm3, %v2674_v3, %v2676_v51  ;;  %v1951_v1 = vadd.s32 %v1950_v46, %v1941_v38  ;;  %3203 = vmatpush.bf16.msra.mxu3 %v4530_v26  ;;  %v2292_v48 = vor.u32 %v2290_v25, %v5735_v30  ;;  %v4526_v26 = vld [vmem:[#allocation8 + $0x188] sm:$0xff] }
 0x1a0   : > { %v2145_v34 = vrot.slane %v2143_v63, 6  ;;  %v2148_v7 = vrot.slane %v2146_v4, 7  ;;  %v1317_v10 = vpop.f32.mrf.mxu2  ;;  %2750 = vmatmul.bf16.gmra.mxu0 %v2677_v16  ;;  %2912 = vmatpush.bf16.msrb.mxu1 %v4508_v60  ;;  %v4528_v4 = vld [vmem:[#allocation8 + $0x198] sm:$0xff]  ;;  %v2805_v20 = vrot.slane %v2803_v13, 1  ;;  %v2811_v18 = vshrl.u32 %v5685_v53, 16  ;;  %v4527_v60 = vld [vmem:[#allocation8 + $0x190] sm:$0xff] }
 0x1a1   : > { %v1654_v23 = vmax.f32 %v1644_v47, 0.0  ;;  %v1329_v61 = vadd.f32 %v1317_v10, %v1165_v2  ;;  %v1489_v21 = vpop.f32.mrf.mxu3  ;;  %v1952_v55 = vshrl.u32 %v1951_v1, 3  ;;  %v4537_v16 = vld [vmem:[#allocation8 + $0x1e0] sm:$0xff]  ;;  %v2823_v14 = vshll.u32 %v5754_v49, 16 }
 0x1a2   : > { %v2149_v56 = vor.u32 %v2148_v7, %v2145_v34  ;;  %3042 = vmatpush.bf16.msra.mxu2 %v4515_v50  ;;  %3373 = vmatpush.bf16.msra.mxu0 %v4539_v35  ;;  %v2808_v34 = vrot.slane %v2806_v45, 2  ;;  %v2814_v7 = vshll.u32 %v5685_v53, 16  ;;  %v2813_v44 = vrot.slane %v2811_v18, 1 }
 0x1a3   : > { %v2045_v9 = vsel %vm5765_vm6, %v1654_v23, 0.0  ;;  %v1501_v19 = vadd.f32 %v1489_v21, %v1329_v61  ;;  %v1953_v40 = vmul.u32 10, %v1952_v55  ;;  %3204 = vmatpush.bf16.msra.mxu3 %v4529_v62  ;;  %v4505_v55 = vld [vmem:[#allocation8 + $0x100] sm:$0xff] }
 0x1a4   : > { %v2150_v12 = vsel %vm5530_vm15, %v2141_v8, %v2149_v56  ;;  %v2055_v27 = vpack.c.bf16 %v2045_v9, %v2045_v9  ;;  %v5778_v3 = vld [vmem:[#allocation2 + $0x18] sm:$0xff]  ;;  %2913 = vmatpush.bf16.msrb.mxu1 %v4507_v29  ;;  %v2816_v23 = vrot.slane %v2814_v7, 2  ;;  %v2809_v8 = vor.u32 %v2808_v34, %v2805_v20 }
 0x1a5   : > { %2192 = vst [vmem:[#allocation2 + $0x20] sm:$0xf] %v2150_v12  ;;  %v1631_v28 = vadd.f32 %v1619_v0, %v1501_v19  ;;  %2477 = vmatmul.bf16.gmra.mxu2 %v5778_v3  ;;  %v2514_v11 = vrot.slane %v5778_v3, 1  ;;  %v2294_v32 = vshll.u32 %v5778_v3, 16  ;;  %v1954_v24 = vsub.s32 %v5615_v54, %v1953_v40  ;;  %v2195_v40 = vld [vmem:[#allocation2 + $0x2c] sm:$0x3] }
 0x1a6   : > { %v2153_v43 = vshrl.u32 %v2055_v27, 16  ;;  %v2156_v57 = vshll.u32 %v2055_v27, 16  ;;  %3043 = vmatpush.bf16.msra.mxu2 %v4514_v39  ;;  %v2820_v19 = vshrl.u32 %v5754_v49, 16  ;;  %v3416_v27 = vld [vmem:[#allocation2 + $0x8] sm:$0x8]  ;;  %v2298_v39 = vshrl.u32 %v5778_v3, 16 }
 0x1a7   : > { %v1645_v31 = vadd.f32 %v5421_v36, %v1631_v28  ;;  %v2515_v59 = vsel %vm591_vm3, %v2512_v58, %v2514_v11  ;;  %v2151_v36 = vrot.slane %v2149_v56, 4  ;;  %v5793_v30 = vrot.slane %v2294_v32, 1  ;;  %v4538_v58 = vld [vmem:[#allocation8 + $0x1e8] sm:$0xff]  ;;  %3205 = vmatpush.bf16.msra.mxu3 %v4528_v4 }
 0x1a8   : > { %v2155_v37 = vrot.slane %v2153_v43, 6  ;;  %v2158_v42 = vrot.slane %v2156_v57, 7  ;;  %2591 = vmatmul.bf16.gmra.mxu3 %v2515_v59  ;;  %vm1966_vm8 = vcmp.ne.s32.totalorder %v1954_v24, 0  ;;  %vm1976_vm11 = vcmp.lt.s32.totalorder %v1954_v24, 0  ;;  %2914 = vmatpush.bf16.msrb.mxu1 %v4506_v22  ;;  %v4536_v43 = vld [vmem:[#allocation8 + $0x1d8] sm:$0xff] }
 0x1a9   : > { %v1655_v38 = vmax.f32 %v1645_v31, 0.0  ;;  %v1996_v54 = vadd.s32 10, %v1954_v24  ;;  %vm1986_vm7 = vmand %vm1976_vm11, %vm1966_vm8  ;;  %v2297_v5 = vsel %vm351_vm0, %v2292_v48, %v5793_v30  ;;  %3374 = vmatpush.bf16.msra.mxu0 %v4538_v58  ;;  %v2817_v56 = vor.u32 %v2816_v23, %v2813_v44  ;;  %v5835_v22 = vld [vmem:[#allocation2 + $0x18] sm:$0xff] }
 0x1aa   : > { %v2159_v63 = vor.u32 %v2158_v42, %v2155_v37  ;;  %2385 = vmatmul.bf16.gmra.mxu1 %v2297_v5  ;;  %3044 = vmatpush.bf16.msra.mxu2 %v4513_v52  ;;  %v3121_v57 = vunpack.c.h.b16 %v5641_v33  ;;  %v2825_v48 = vrot.slane %v2823_v14, 2  ;;  %v2300_v13 = vor.u32 %v2298_v39, %v5793_v30  ;;  %v4525_v37 = vld [vmem:[#allocation8 + $0x180] sm:$0xff]  ;;  %v4535_v42 = vld [vmem:[#allocation8 + $0x1d0] sm:$0xff]  ;;  %v4548_v58 = vld [vmem:[#allocation8 + $0x238] sm:$0xff] }
 0x1ab   : > { %v2006_v47 = vsel %vm1986_vm7, %v1996_v54, %v1954_v24  ;;  %3206 = vmatpush.bf16.msra.mxu3 %v4527_v60  ;;  %v5811_v9 = vsel %vm885_vm1, %v2809_v8, %v2817_v56  ;;  %v3435_v24 = vunpack.c.l.b16 %v3416_v27  ;;  %v3440_v34 = vrot.slane %v5835_v22, 3  ;;  %v4533_v23 = vld [vmem:[#allocation8 + $0x1c0] sm:$0xff] }
 0x1ac   : > { %v2160_v2 = vsel %vm5530_vm15, %v2151_v36, %v2159_v63  ;;  %v5801_v41 = vld [vmem:[#allocation2 + $0x1c] sm:$0xff]  ;;  %vm2016_vm9 = vcmp.lt.s32.totalorder %v2006_v47, 8  ;;  %v2161_v28 = vrot.slane %v2159_v63, 4  ;;  %2915 = vmatpush.bf16.msrb.mxu1 %v4505_v55 }
 0x1ad   : > { %2193 = vst [vmem:[#allocation2 + $0x24] sm:$0xf] %v2160_v2  ;;  %v2046_v10 = vsel %vm2016_vm9, %v1655_v38, 0.0  ;;  %v2678_v46 = vrot.slane %v5801_v41, 1  ;;  %3375 = vmatpush.bf16.msra.mxu0 %v4537_v16  ;;  %v5830_v38 = vld [vmem:[#allocation2 + $0x10] sm:$0xff]  ;;  %v2829_v52 = vshrl.u32 %v5801_v41, 16  ;;  %v3436_v63 = vpack.c.b16 %v3121_v57, %v3435_v24 }
 0x1ae   : > { %v2056_v61 = vpack.c.bf16 %v2046_v10, %v2046_v10  ;;  %v2832_v45 = vshll.u32 %v5801_v41, 16  ;;  %v3438_v18 = vrot.slane %v5830_v38, 3 }
 0x1af   : > { %v2679_v50 = vsel %vm591_vm3, %v2676_v51, %v2678_v46  ;;  %v2822_v51 = vrot.slane %v2820_v19, 1  ;;  %3207 = vmatpush.bf16.msra.mxu3 %v4526_v26  ;;  %v2831_v4 = vrot.slane %v2829_v52, 1  ;;  %v3437_v20 = vrot.slane %v3436_v63, 3  ;;  %v4547_v26 = vld [vmem:[#allocation8 + $0x230] sm:$0xff] }
 0x1b0   : > { %v2163_v21 = vshrl.u32 %v2056_v61, 16  ;;  %v2166_v1 = vshll.u32 %v2056_v61, 16  ;;  %2755 = vmatmul.bf16.gmra.mxu0 %v2679_v50  ;;  %v2834_v5 = vrot.slane %v2832_v45, 2  ;;  %3501 = vmatpush.bf16.msra.mxu1 %v4548_v58  ;;  %v5857_v16 = vsel %vm1523_vm4, %v3438_v18, %v3440_v34 }
 0x1b1   : > { %3376 = vmatpush.bf16.msra.mxu0 %v4536_v43  ;;  %v2826_v17 = vor.u32 %v2825_v48, %v2822_v51  ;;  %v5847_v7 = vsel %vm1523_vm4, %v3437_v20, %v3438_v18  ;;  %v4545_v18 = vld [vmem:[#allocation8 + $0x220] sm:$0xff] }
 0x1b2   : > { %v2165_v29 = vrot.slane %v2163_v21, 6  ;;  %v2168_v12 = vrot.slane %v2166_v1, 7  ;;  %v2835_v47 = vor.u32 %v2834_v5, %v2831_v4 }
 0x1b3   : > { %v5842_v54 = vsel %vm885_vm1, %v2817_v56, %v2826_v17  ;;  %3208 = vmatpush.bf16.msra.mxu3 %v4525_v37  ;;  %v2974_v56 = vrot.slane %v5685_v53, 2  ;;  %v3245_v37 = vld [vmem:[#allocation2 + $0x30] sm:$0x7] }
 0x1b4   : > { %v5814_v0 = vld [vmem:[#allocation2 + $0x20] sm:$0xff]  ;;  %v2169_v25 = vor.u32 %v2168_v12, %v2165_v29  ;;  %v5854_v61 = vsel %vm885_vm1, %v2826_v17, %v2835_v47  ;;  %3502 = vmatpush.bf16.msra.mxu1 %v4547_v26  ;;  %v2976_v17 = vrot.slane %v5754_v49, 2  ;;  %v3278_v49 = vshll.u32 %v5830_v38, 16 }
 0x1b5   : > { %2482 = vmatmul.bf16.gmra.mxu2 %v5814_v0  ;;  %v2516_v62 = vrot.slane %v5814_v0, 1  ;;  %v2302_v31 = vshll.u32 %v5814_v0, 16  ;;  %3377 = vmatpush.bf16.msra.mxu0 %v4535_v42  ;;  %v3081_v42 = vld [vmem:[#allocation2 + $0x8] sm:$0xc] }
 0x1b6   : > { %v2170_v32 = vsel %vm5530_vm15, %v2161_v28, %v2169_v25  ;;  %v2171_v35 = vrot.slane %v2169_v25, 4  ;;  %v2306_v28 = vshrl.u32 %v5814_v0, 16 }
 0x1b7   : > { %2194 = vst [vmem:[#allocation2 + $0x28] sm:$0xf] %v2170_v32  ;;  %v2517_v59 = vsel %vm591_vm3, %v2514_v11, %v2516_v62  ;;  %v2304_v36 = vrot.slane %v2302_v31, 1  ;;  %v2952_v11 = vld [vmem:[#allocation2 + $0x4] sm:$0xc] }
 0x1b8   : > { %v2196_v30 = vsel %vm5267_vm13, %v2171_v35, %v2195_v40  ;;  %2596 = vmatmul.bf16.gmra.mxu3 %v2517_v59  ;;  %v2971_v2 = vunpack.c.l.b16 %v2952_v11  ;;  %v5873_v31 = vld [vmem:[#allocation2 + $0x20] sm:$0xff]  ;;  %v2977_v11 = vsel %vm1057_vm2, %v2974_v56, %v2976_v17 }
 0x1b9   : > { %2197 = vst [vmem:[#allocation2 + $0x2c] sm:$0x3] %v2196_v30  ;;  %v2305_v3 = vsel %vm351_vm0, %v2300_v13, %v2304_v36  ;;  %3378 = vmatpush.bf16.msra.mxu0 %v4534_v15  ;;  %v2308_v40 = vor.u32 %v2306_v28, %v2304_v36  ;;  %v4546_v13 = vld [vmem:[#allocation8 + $0x228] sm:$0xff]  ;;  %v3442_v24 = vrot.slane %v5873_v31, 3  ;;  %v3120_v36 = vunpack.c.l.b16 %v3081_v42 }
 0x1ba   : > { %2390 = vmatmul.bf16.gmra.mxu1 %v2305_v3  ;;  %v2972_v10 = vpack.c.b16 %v2657_v6, %v2971_v2  ;;  %v3138_v3 = vrot.slane %v5830_v38, 2  ;;  %v3275_v15 = vshrl.u32 %v5830_v38, 16  ;;  %v3293_v28 = vshrl.u32 %v5873_v31, 16 }
 0x1bb   : > { %3503 = vmatpush.bf16.msra.mxu1 %v4546_v13  ;;  %v5882_v59 = vsel %vm1523_vm4, %v3440_v34, %v3442_v24  ;;  %v3131_v52 = vpack.c.b16 %v3121_v57, %v3120_v36 }
 0x1bc   : > { %v2973_v6 = vrot.slane %v2972_v10, 2  ;;  %v3277_v34 = vrot.slane %v3275_v15, 2  ;;  %v3280_v10 = vrot.slane %v3278_v49, 3 }
 0x1bd   : > { %3379 = vmatpush.bf16.msra.mxu0 %v4533_v23  ;;  %v3137_v4 = vrot.slane %v3131_v52, 2  ;;  %v3267_v58 = vshrl.u32 %v3131_v52, 16  ;;  %v3270_v20 = vshll.u32 %v3131_v52, 16 }
 0x1be   : > { %v5849_v44 = vld [vmem:[#allocation2 + $0x24] sm:$0xff]  ;;  %v2975_v51 = vsel %vm1057_vm2, %v2973_v6, %v2974_v56  ;;  %v3281_v23 = vor.u32 %v3280_v10, %v3277_v34 }
 0x1bf   : > { %v2224_v60 = vld [vmem:[#allocation2 + $0x28] sm:$0x1]  ;;  %v2680_v8 = vrot.slane %v5849_v44, 1  ;;  %v2838_v19 = vshrl.u32 %v5849_v44, 16  ;;  %v2841_v29 = vshll.u32 %v5849_v44, 16  ;;  %v3139_v5 = vsel %vm1057_vm2, %v3137_v4, %v3138_v3  ;;  %3504 = vmatpush.bf16.msra.mxu1 %v4545_v18 }
 0x1c0   : > { %v2263_v50 = vunpack.c.l.b16 %v2224_v60  ;;  %v2627_v55 = vld [vmem:[#allocation2 + $0x2c] sm:$0x1]  ;;  %v3269_v38 = vrot.slane %v3267_v58, 2  ;;  %v3272_v60 = vrot.slane %v3270_v20, 3  ;;  %v2980_v26 = vrot.slane %v5849_v44, 2 }
 0x1c1   : > { %v2681_v1 = vsel %vm591_vm3, %v2678_v46, %v2680_v8  ;;  %v2840_v14 = vrot.slane %v2838_v19, 1  ;;  %v2843_v53 = vrot.slane %v2841_v29, 2  ;;  %v2666_v25 = vunpack.c.l.b16 %v2627_v55  ;;  %v5888_v45 = vld [vmem:[#allocation2 + $0x28] sm:$0xff] }
 0x1c2   : > { %v2269_v21 = vpack.c.b16 %v2263_v50, %v2263_v50  ;;  %2760 = vmatmul.bf16.gmra.mxu0 %v2681_v1  ;;  %v3444_v33 = vrot.slane %v5888_v45, 3  ;;  %v3273_v50 = vor.u32 %v3272_v60, %v3269_v38  ;;  %v4544_v1 = vld [vmem:[#allocation8 + $0x218] sm:$0xff]  ;;  %v3284_v19 = vshrl.u32 %v5835_v22, 16 }
 0x1c3   : > { %v5868_v39 = vor.u32 %v2843_v53, %v2840_v14  ;;  %v2672_v35 = vpack.c.b16 %v2666_v25, %v2666_v25  ;;  %3505 = vmatpush.bf16.msra.mxu1 %v4544_v1  ;;  %v3142_v14 = vrot.slane %v5873_v31, 2  ;;  %v4542_v25 = vld [vmem:[#allocation8 + $0x208] sm:$0xff]  ;;  %v3295_v44 = vrot.slane %v3293_v28, 2 }
 0x1c4   : > { %v2518_v12 = vrot.slane %v2269_v21, 1  ;;  %v2310_v27 = vshll.u32 %v2269_v21, 16  ;;  %v5900_v2 = vsel %vm1523_vm4, %v3442_v24, %v3444_v33  ;;  %v3282_v56 = vsel %vm1351_vm5, %v3273_v50, %v3281_v23 }
 0x1c5   : > { %3045 = vmatmul.bf16.vlgmr.msra.gmra.mxu2 %v2975_v51  ;;  %v5877_v48 = vsel %vm885_vm1, %v2835_v47, %v5868_v39  ;;  %v2682_v0 = vrot.slane %v2672_v35, 1  ;;  %v3140_v21 = vrot.slane %v5835_v22, 2  ;;  %v3302_v36 = vshrl.u32 %v5888_v45, 16 }
 0x1c6   : > { %v2312_v46 = vrot.slane %v2310_v27, 1  ;;  %v2519_v43 = vsel %vm591_vm3, %v2516_v62, %v2518_v12  ;;  %v3264_v62 = vunpack.c.l.b16 %v3245_v37  ;;  %v3286_v12 = vrot.slane %v3284_v19, 2 }
 0x1c7   : > { %v2683_v30 = vsel %vm591_vm3, %v2680_v8, %v2682_v0  ;;  %v2978_v8 = vrot.slane %v5801_v41, 2  ;;  %v3141_v29 = vsel %vm1057_vm2, %v3138_v3, %v3140_v21  ;;  %v4543_v41 = vld [vmem:[#allocation8 + $0x210] sm:$0xff]  ;;  %v4541_v0 = vld [vmem:[#allocation8 + $0x200] sm:$0xff]  ;;  %v3304_v4 = vrot.slane %v3302_v36, 2 }
 0x1c8   : > { %2601 = vmatmul.bf16.gmra.mxu3 %v2519_v43  ;;  %v2313_v32 = vsel %vm351_vm0, %v2308_v40, %v2312_v46  ;;  %v5890_v63 = vpack.c.b16 %v3264_v62, %v3264_v62  ;;  %3506 = vmatpush.bf16.msra.mxu1 %v4543_v41  ;;  %v3296_v46 = vshll.u32 %v5873_v31, 16  ;;  %v3143_v43 = vsel %vm1057_vm2, %v3140_v21, %v3142_v14  ;;  %v3091_v3 = vld [vmem:[#allocation2 + $0x30] sm:$0x3] }
 0x1c9   : > { %v2979_v6 = vsel %vm1057_vm2, %v2976_v17, %v2978_v8  ;;  %v2981_v53 = vsel %vm1057_vm2, %v2978_v8, %v2980_v26  ;;  %v3144_v31 = vrot.slane %v5888_v45, 2  ;;  %v3305_v17 = vshll.u32 %v5888_v45, 16 }
 0x1ca   : > { %2395 = vmatmul.bf16.gmra.mxu1 %v2313_v32  ;;  %v3446_v57 = vrot.slane %v5890_v63, 3  ;;  %v3298_v32 = vrot.slane %v3296_v46, 3 }
 0x1cb   : > { %v3307_v15 = vrot.slane %v3305_v17, 3 }
 0x1cc   : > { %v5903_v47 = vsel %vm1523_vm4, %v3444_v33, %v3446_v57  ;;  %3507 = vmatpush.bf16.msra.mxu1 %v4542_v25  ;;  %v3299_v13 = vor.u32 %v3298_v32, %v3295_v44  ;;  %v3130_v33 = vunpack.c.l.b16 %v3091_v3 }
 0x1cd   : > { %v3308_v20 = vor.u32 %v3307_v15, %v3304_v4 }
 0x1ce   : > { %v3136_v10 = vpack.c.b16 %v3130_v33, %v3130_v33 }
 0x1cf   : > { %v3309_v60 = vsel %vm1351_vm5, %v3299_v13, %v3308_v20 }
 0x1d0   : > { %3508 = vmatpush.bf16.msra.mxu1 %v4541_v0 }
 0x1d2   : > { %2765 = vmatmul.bf16.gmra.mxu0 %v2683_v30 }
 0x1d5   : > { %3050 = vmatmul.bf16.gmra.mxu2 %v2977_v11 }
 0x1d8   : > { %3209 = vmatmul.bf16.vlgmr.msra.gmra.mxu3 %v3139_v5 }
 0x1da   : > { %2916 = vmatmul.bf16.vlgmr.msrb.gmra.mxu1 %v5811_v9  ;;  %v3287_v9 = vshll.u32 %v5835_v22, 16  ;;  %v2781_v22 = vld [vmem:[#allocation2 + $0x2c] sm:$0x3] }
 0x1db   : > { %v2800_v40 = vunpack.c.l.b16 %v2781_v22 }
 0x1dc   : > { %v3289_v27 = vrot.slane %v3287_v9, 3  ;;  %v3311_v9 = vshrl.u32 %v5890_v63, 16 }
 0x1dd   : > { %v2801_v35 = vpack.c.b16 %v2800_v40, %v2800_v40 }
 0x1de   : > { %v3290_v55 = vor.u32 %v3289_v27, %v3286_v12 }
 0x1df   : > { %v2982_v42 = vrot.slane %v2801_v35, 2  ;;  %v2847_v18 = vshrl.u32 %v2801_v35, 16  ;;  %v2850_v45 = vshll.u32 %v2801_v35, 16 }
 0x1e0   : > { %v3291_v51 = vsel %vm1351_vm5, %v3281_v23, %v3290_v55  ;;  %v3300_v24 = vsel %vm1351_vm5, %v3290_v55, %v3299_v13 }
 0x1e1   : > { %v2983_v62 = vsel %vm1057_vm2, %v2980_v26, %v2982_v42  ;;  %v2849_v23 = vrot.slane %v2847_v18, 1  ;;  %v2852_v50 = vrot.slane %v2850_v45, 2  ;;  %v3313_v26 = vrot.slane %v3311_v9, 2 }
 0x1e2   : > { %3380 = vmatmul.bf16.vlgmr.msra.gmra.mxu0 %v3282_v56 }
 0x1e3   : > { %v2853_v19 = vor.u32 %v2852_v50, %v2849_v23 }
 0x1e5   : > { %3055 = vmatmul.bf16.gmra.mxu2 %v2979_v6  ;;  %v2854_v55 = vsel %vm885_vm1, %v5868_v39, %v2853_v19 }
 0x1e8   : > { %3214 = vmatmul.bf16.gmra.mxu3 %v3141_v29  ;;  %v3314_v29 = vshll.u32 %v5890_v63, 16 }
 0x1ea   : > { %2921 = vmatmul.bf16.gmra.mxu1 %v5842_v54 }
 0x1f2   : > { %3385 = vmatmul.bf16.gmra.mxu0 %v3291_v51  ;;  %v3316_v51 = vrot.slane %v3314_v29, 3 }
 0x1f4   : > { %v3317_v46 = vor.u32 %v3316_v51, %v3313_v26 }
 0x1f5   : > { %3060 = vmatmul.bf16.gmra.mxu2 %v2981_v53 }
 0x1f6   : > { %v3318_v63 = vsel %vm1351_vm5, %v3308_v20, %v3317_v46 }
 0x1f8   : > { %v2463_v54 = vpop.f32.mrf.mxu2  ;;  %3219 = vmatmul.bf16.gmra.mxu3 %v3143_v43 }
 0x1fa   : > { %2926 = vmatmul.bf16.gmra.mxu1 %v5854_v61  ;;  %v3145_v61 = vsel %vm1057_vm2, %v3142_v14, %v3144_v31 }
 0x200   : > { %v2465_v37 = vpop.f32.mrf.mxu2 }
 0x202   : > { %3390 = vmatmul.bf16.gmra.mxu0 %v3300_v24 }
 0x205   : > { %3065 = vmatmul.bf16.gmra.mxu2 %v2983_v62 }
 0x207   : > { %v2376_v52 = vpop.f32.mrf.mxu1 }
 0x208   : > { %v2464_v30 = vadd.f32 %v2463_v54, %v2376_v52  ;;  %3224 = vmatmul.bf16.gmra.mxu3 %v3145_v61  ;;  %v2468_v11 = vpop.f32.mrf.mxu2 }
 0x20a   : > { %2931 = vmatmul.bf16.gmra.mxu1 %v5877_v48  ;;  %v3146_v48 = vrot.slane %v3136_v10, 2 }
 0x20b   : > { %v2582_v49 = vpop.f32.mrf.mxu3 }
 0x20c   : > { %v2607_v57 = vadd.f32 %v2582_v49, %v2464_v30  ;;  %v3147_v27 = vsel %vm1057_vm2, %v3144_v31, %v3146_v48 }
 0x20d   : > { %v2746_v5 = vpop.f32.mrf.mxu0 }
 0x20e   : > { %v5929_v58 = vadd.f32 %v2746_v5, %v2607_v57 }
 0x20f   : > { %v2378_v34 = vpop.f32.mrf.mxu1 }
 0x210   : > { %v2466_v38 = vadd.f32 %v2465_v37, %v2378_v34  ;;  %v2470_v8 = vpop.f32.mrf.mxu2 }
 0x212   : > { %3395 = vmatmul.bf16.gmra.mxu0 %v3309_v60 }
 0x213   : > { %v2584_v56 = vpop.f32.mrf.mxu3 }
 0x214   : > { %v2608_v21 = vadd.f32 %v2584_v56, %v2466_v38 }
 0x215   : > { %v2748_v1 = vpop.f32.mrf.mxu0 }
 0x216   : > { %v5932_v6 = vadd.f32 %v2748_v1, %v2608_v21 }
 0x217   : > { %v2381_v12 = vpop.f32.mrf.mxu1 }
 0x218   : > { %v2469_v41 = vadd.f32 %v2468_v11, %v2381_v12  ;;  %3229 = vmatmul.bf16.gmra.mxu3 %v3147_v27  ;;  %v2473_v22 = vpop.f32.mrf.mxu2 }
 0x21a   : > { %2936 = vmatmul.bf16.gmra.mxu1 %v2854_v55 }
 0x21b   : > { %v2587_v14 = vpop.f32.mrf.mxu3 }
 0x21c   : > { %v2609_v53 = vadd.f32 %v2587_v14, %v2469_v41 }
 0x21d   : > { %v2751_v28 = vpop.f32.mrf.mxu0 }
 0x21e   : > { %v2773_v25 = vadd.f32 %v2751_v28, %v2609_v53 }
 0x21f   : > { %v2383_v54 = vpop.f32.mrf.mxu1 }
 0x220   : > { %v2471_v43 = vadd.f32 %v2470_v8, %v2383_v54  ;;  %v2475_v35 = vpop.f32.mrf.mxu2 }
 0x222   : > { %3400 = vmatmul.bf16.gmra.mxu0 %v3318_v63 }
 0x223   : > { %v2589_v40 = vpop.f32.mrf.mxu3 }
 0x224   : > { %v2610_v44 = vadd.f32 %v2589_v40, %v2471_v43 }
 0x225   : > { %v2753_v32 = vpop.f32.mrf.mxu0 }
 0x226   : > { %v2774_v13 = vadd.f32 %v2753_v32, %v2610_v44 }
 0x227   : > { %v2386_v39 = vpop.f32.mrf.mxu1 }
 0x228   : > { %v2474_v37 = vadd.f32 %v2473_v22, %v2386_v39  ;;  %v2478_v36 = vpop.f32.mrf.mxu2 }
 0x22a   : > { %3509 = vmatmul.bf16.vlgmr.msra.gmra.mxu1 %v5847_v7 }
 0x22b   : > { %v2592_v42 = vpop.f32.mrf.mxu3 }
 0x22c   : > { %v2611_v24 = vadd.f32 %v2592_v42, %v2474_v37 }
 0x22d   : > { %v2756_v31 = vpop.f32.mrf.mxu0 }
 0x22e   : > { %v2775_v0 = vadd.f32 %v2756_v31, %v2611_v24 }
 0x22f   : > { %v2388_v62 = vpop.f32.mrf.mxu1 }
 0x230   : > { %v2476_v17 = vadd.f32 %v2475_v35, %v2388_v62  ;;  %v2480_v15 = vpop.f32.mrf.mxu2 }
 0x233   : > { %v2594_v52 = vpop.f32.mrf.mxu3 }
 0x234   : > { %v2612_v61 = vadd.f32 %v2594_v52, %v2476_v17 }
 0x235   : > { %v2758_v30 = vpop.f32.mrf.mxu0 }
 0x236   : > { %v2776_v3 = vadd.f32 %v2758_v30, %v2612_v61 }
 0x237   : > { %v2391_v11 = vpop.f32.mrf.mxu1 }
 0x238   : > { %v2479_v4 = vadd.f32 %v2478_v36, %v2391_v11  ;;  %v2483_v34 = vpop.f32.mrf.mxu2 }
 0x23a   : > { %3514 = vmatmul.bf16.gmra.mxu1 %v5857_v16 }
 0x23b   : > { %v2597_v49 = vpop.f32.mrf.mxu3 }
 0x23c   : > { %v2613_v33 = vadd.f32 %v2597_v49, %v2479_v4  ;;  %v5958_v4 = vld [vmem:[%s6020_s4] ss:$0 sm:$0xff] }
 0x23f   : > { %v2761_v57 = vpop.f32.mrf.mxu0  ;;  %v2393_v7 = vpop.f32.mrf.mxu1 }
 0x240   : > { %v2777_v5 = vadd.f32 %v2761_v57, %v2613_v33  ;;  %v2481_v20 = vadd.f32 %v2480_v15, %v2393_v7  ;;  %v2485_v56 = vpop.f32.mrf.mxu2 }
 0x243   : > { %v2599_v18 = vpop.f32.mrf.mxu3 }
 0x244   : > { %v2614_v45 = vadd.f32 %v2599_v18, %v2481_v20 }
 0x247   : > { %v2763_v10 = vpop.f32.mrf.mxu0  ;;  %v2396_v38 = vpop.f32.mrf.mxu1 }
 0x248   : > { %v2778_v60 = vadd.f32 %v2763_v10, %v2614_v45  ;;  %v2484_v23 = vadd.f32 %v2483_v34, %v2396_v38  ;;  %v3046_v40 = vpop.f32.mrf.mxu2 }
 0x24a   : > { %3519 = vmatmul.bf16.gmra.mxu1 %v5882_v59 }
 0x24b   : > { %v2602_v50 = vpop.f32.mrf.mxu3 }
 0x24c   : > { %v2615_v8 = vadd.f32 %v2602_v50, %v2484_v23 }
 0x24f   : > { %v2766_v48 = vpop.f32.mrf.mxu0  ;;  %v2398_v16 = vpop.f32.mrf.mxu1 }
 0x250   : > { %v2779_v21 = vadd.f32 %v2766_v48, %v2615_v8  ;;  %v2486_v1 = vadd.f32 %v2485_v56, %v2398_v16 }
 0x253   : > { %v2604_v19 = vpop.f32.mrf.mxu3 }
 0x254   : > { %v2616_v9 = vadd.f32 %v2604_v19, %v2486_v1 }
 0x257   : > { %v2768_v29 = vpop.f32.mrf.mxu0  ;;  %v2917_v12 = vpop.f32.mrf.mxu1 }
 0x258   : > { %v2780_v27 = vadd.f32 %v2768_v29, %v2616_v9  ;;  %v2942_v41 = vadd.f32 %v2917_v12, %v5929_v58 }
 0x25a   : > { %3524 = vmatmul.bf16.gmra.mxu1 %v5900_v2  ;;  %v3071_v31 = vadd.f32 %v3046_v40, %v2942_v41 }
 0x25b   : > { %v3210_v58 = vpop.f32.mrf.mxu3 }
 0x25c   : > { %v3235_v62 = vadd.f32 %v3210_v58, %v3071_v31 }
 0x25f   : > { %v2919_v55 = vpop.f32.mrf.mxu1  ;;  %v3381_v32 = vpop.f32.mrf.mxu0 }
 0x260   : > { %v2943_v26 = vadd.f32 %v2919_v55, %v5932_v6  ;;  %v3048_v6 = vpop.f32.mrf.mxu2  ;;  %v3406_v61 = vadd.f32 %v3381_v32, %v3235_v62 }
 0x262   : > { %v3072_v36 = vadd.f32 %v3048_v6, %v2943_v26 }
 0x263   : > { %v3212_v35 = vpop.f32.mrf.mxu3 }
 0x264   : > { %v3236_v30 = vadd.f32 %v3212_v35, %v3072_v36 }
 0x267   : > { %v2922_v59 = vpop.f32.mrf.mxu1 }
 0x268   : > { %v2944_v51 = vadd.f32 %v2922_v59, %v2773_v25 }
 0x26a   : > { %3529 = vmatmul.bf16.gmra.mxu1 %v5903_v47  ;;  %v3383_v47 = vpop.f32.mrf.mxu0 }
 0x26b   : > { %v3215_v24 = vpop.f32.mrf.mxu3  ;;  %v3407_v15 = vadd.f32 %v3383_v47, %v3236_v30 }
 0x26f   : > { %v2924_v14 = vpop.f32.mrf.mxu1 }
 0x270   : > { %v2945_v53 = vadd.f32 %v2924_v14, %v2774_v13  ;;  %v3051_v13 = vpop.f32.mrf.mxu2 }
 0x277   : > { %v2927_v22 = vpop.f32.mrf.mxu1 }
 0x278   : > { %v2946_v28 = vadd.f32 %v2927_v22, %v2775_v0  ;;  %v3386_v0 = vpop.f32.mrf.mxu0  ;;  %v3053_v52 = vpop.f32.mrf.mxu2 }
 0x27f   : > { %v2929_v46 = vpop.f32.mrf.mxu1 }
 0x280   : > { %v2947_v54 = vadd.f32 %v2929_v46, %v2776_v3  ;;  %v3217_v3 = vpop.f32.mrf.mxu3  ;;  %v3388_v49 = vpop.f32.mrf.mxu0 }
 0x281   : > { %v3056_v18 = vpop.f32.mrf.mxu2 }
 0x287   : > { %v2932_v43 = vpop.f32.mrf.mxu1 }
 0x288   : > { %v5947_v63 = vadd.f32 %v2932_v43, %v2777_v5  ;;  %v3073_v5 = vadd.f32 %v3051_v13, %v2944_v51  ;;  %v3220_v10 = vpop.f32.mrf.mxu3  ;;  %v3391_v8 = vpop.f32.mrf.mxu0 }
 0x28a   : > { %v3237_v38 = vadd.f32 %v3215_v24, %v3073_v5 }
 0x28c   : > { %v3408_v56 = vadd.f32 %v3386_v0, %v3237_v38 }
 0x28f   : > { %v2934_v44 = vpop.f32.mrf.mxu1 }
 0x290   : > { %v5949_v2 = vadd.f32 %v2934_v44, %v2778_v60  ;;  %v3074_v60 = vadd.f32 %v3053_v52, %v2945_v53  ;;  %v3222_v19 = vpop.f32.mrf.mxu3  ;;  %v3393_v55 = vpop.f32.mrf.mxu0 }
 0x292   : > { %v3238_v48 = vadd.f32 %v3217_v3, %v3074_v60 }
 0x294   : > { %v3409_v1 = vadd.f32 %v3388_v49, %v3238_v48 }
 0x297   : > { %v2937_v25 = vpop.f32.mrf.mxu1 }
 0x298   : > { %v5951_v39 = vadd.f32 %v2937_v25, %v2779_v21  ;;  %v3058_v21 = vpop.f32.mrf.mxu2  ;;  %v3225_v43 = vpop.f32.mrf.mxu3 }
 0x299   : > { %v3076_v14 = vadd.f32 %v3058_v21, %v2947_v54  ;;  %v3396_v32 = vpop.f32.mrf.mxu0 }
 0x29b   : > { %v3240_v58 = vadd.f32 %v3222_v19, %v3076_v14 }
 0x29d   : > { %v3411_v6 = vadd.f32 %v3393_v55, %v3240_v58 }
 0x29f   : > { %v2939_v37 = vpop.f32.mrf.mxu1 }
 0x2a0   : > { %v5953_v42 = vadd.f32 %v2939_v37, %v2780_v27  ;;  %v3075_v27 = vadd.f32 %v3056_v18, %v2946_v28  ;;  %v3061_v22 = vpop.f32.mrf.mxu2  ;;  %v3227_v37 = vpop.f32.mrf.mxu3 }
 0x2a1   : > { %v3077_v13 = vadd.f32 %v3061_v22, %v5947_v63 }
 0x2a2   : > { %v3239_v51 = vadd.f32 %v3220_v10, %v3075_v27 }
 0x2a3   : > { %v3241_v0 = vadd.f32 %v3225_v43, %v3077_v13 }
 0x2a4   : > { %v3410_v40 = vadd.f32 %v3391_v8, %v3239_v51 }
 0x2a7   : > { %v3510_v17 = vpop.f32.mrf.mxu1 }
 0x2a8   : > { %v3535_v11 = vadd.f32 %v3510_v17, %v3406_v61  ;;  %v3063_v47 = vpop.f32.mrf.mxu2  ;;  %v3398_v17 = vpop.f32.mrf.mxu0  ;;  %v3412_v61 = vadd.f32 %v3396_v32, %v3241_v0 }
 0x2a9   : > { %v3078_v62 = vadd.f32 %v3063_v47, %v5949_v2 }
 0x2aa   : > { %v3549_v57 = vadd.f32 %v5958_v4, %v3535_v11 }
 0x2ab   : > { %v3242_v30 = vadd.f32 %v3227_v37, %v3078_v62 }
 0x2ac   : > { %v3559_v45 = vmax.f32 %v3549_v57, 0.0 }
 0x2ad   : > { %v3413_v49 = vadd.f32 %v3398_v17, %v3242_v30 }
 0x2af   : > { %v3512_v33 = vpop.f32.mrf.mxu1 }
 0x2b0   : > { %v3536_v7 = vadd.f32 %v3512_v33, %v3407_v15  ;;  %v3066_v3 = vpop.f32.mrf.mxu2  ;;  %v3230_v15 = vpop.f32.mrf.mxu3 }
 0x2b1   : > { %v3079_v63 = vadd.f32 %v3066_v3, %v5951_v39  ;;  %v3401_v5 = vpop.f32.mrf.mxu0 }
 0x2b2   : > { %v3550_v20 = vadd.f32 %v5958_v4, %v3536_v7 }
 0x2b3   : > { %v3243_v2 = vadd.f32 %v3230_v15, %v3079_v63 }
 0x2b4   : > { %v3560_v34 = vmax.f32 %v3550_v20, 0.0 }
 0x2b5   : > { %v3414_v10 = vadd.f32 %v3401_v5, %v3243_v2 }
 0x2b6   : > { %v4560_v23 = vpack.c.bf16 %v3560_v34, %v3559_v45 }
 0x2b7   : > { %v3515_v50 = vpop.f32.mrf.mxu1 }
 0x2b8   : > { %4561 = vst [vmem:[%s5963_s13] sm:$0xff] %v4560_v23   ;;  %v3537_v16 = vadd.f32 %v3515_v50, %v3408_v56  ;;  %v3068_v34 = vpop.f32.mrf.mxu2  ;;  %v3232_v23 = vpop.f32.mrf.mxu3 }
 0x2b9   : > { %v3080_v38 = vadd.f32 %v3068_v34, %v5953_v42  ;;  %v3403_v48 = vpop.f32.mrf.mxu0 }
 0x2ba   : > { %v3551_v29 = vadd.f32 %v5958_v4, %v3537_v16 }
 0x2bb   : > { %v3244_v8 = vadd.f32 %v3232_v23, %v3080_v38 }
 0x2bc   : > { %v3561_v26 = vmax.f32 %v3551_v29, 0.0 }
 0x2bd   : > { %v3415_v16 = vadd.f32 %v3403_v48, %v3244_v8 }
 0x2bf   : > { %v3517_v9 = vpop.f32.mrf.mxu1 }
 0x2c0   : > { %v3538_v12 = vadd.f32 %v3517_v9, %v3409_v1 }
 0x2c2   : > { %v3552_v41 = vadd.f32 %v5958_v4, %v3538_v12 }
 0x2c4   : > { %v3562_v59 = vmax.f32 %v3552_v41, 0.0 }
 0x2c6   : > { %v4565_v53 = vpack.c.bf16 %v3562_v59, %v3561_v26 }
 0x2c7   : > { %v3520_v46 = vpop.f32.mrf.mxu1 }
 0x2c8   : > { %4588 = vst [vmem:[%s5963_s13 + $0x8] sm:$0xff] %v4565_v53   ;;  %v3539_v44 = vadd.f32 %v3520_v46, %v3410_v40 }
 0x2ca   : > { %v3553_v28 = vadd.f32 %v5958_v4, %v3539_v44 }
 0x2cc   : > { %v3563_v24 = vmax.f32 %v3553_v28, 0.0 }
 0x2cf   : > { %v3522_v35 = vpop.f32.mrf.mxu1 }
 0x2d0   : > { %v3540_v25 = vadd.f32 %v3522_v35, %v3411_v6 }
 0x2d2   : > { %v3554_v54 = vadd.f32 %v5958_v4, %v3540_v25 }
 0x2d4   : > { %v3564_v31 = vmax.f32 %v3554_v54, 0.0 }
 0x2d6   : > { %v4570_v36 = vpack.c.bf16 %v3564_v31, %v3563_v24 }
 0x2d7   : > { %v3525_v52 = vpop.f32.mrf.mxu1 }
 0x2d8   : > { %4589 = vst [vmem:[%s5963_s13 + $0x10] sm:$0xff] %v4570_v36   ;;  %v3541_v11 = vadd.f32 %v3525_v52, %v3412_v61 }
 0x2da   : > { %v3555_v57 = vadd.f32 %v5958_v4, %v3541_v11 }
 0x2dc   : > { %v3565_v18 = vmax.f32 %v3555_v57, 0.0 }
 0x2df   : > { %v3527_v33 = vpop.f32.mrf.mxu1 }
 0x2e0   : > { %v3542_v7 = vadd.f32 %v3527_v33, %v3413_v49 }
 0x2e2   : > { %v3556_v20 = vadd.f32 %v5958_v4, %v3542_v7 }
 0x2e4   : > { %v3566_v45 = vmax.f32 %v3556_v20, 0.0 }
 0x2e6   : > { %v4575_v60 = vpack.c.bf16 %v3566_v45, %v3565_v18 }
 0x2e7   : > { %v3530_v50 = vpop.f32.mrf.mxu1 }
 0x2e8   : > { %4590 = vst [vmem:[%s5963_s13 + $0x18] sm:$0xff] %v4575_v60   ;;  %v3543_v39 = vadd.f32 %v3530_v50, %v3414_v10 }
 0x2ea   : > { %v3557_v56 = vadd.f32 %v5958_v4, %v3543_v39 }
 0x2ec   : > { %v3567_v19 = vmax.f32 %v3557_v56, 0.0 }
 0x2ef   : > { %v3532_v21 = vpop.f32.mrf.mxu1 }
 0x2f0   : > { %v3544_v1 = vadd.f32 %v3532_v21, %v3415_v16 }
 0x2f2   : > { %v3558_v42 = vadd.f32 %v5958_v4, %v3544_v1 }
 0x2f4   : > { %v3568_v9 = vmax.f32 %v3558_v42, 0.0 }
 0x2f6   : > { %v4580_v29 = vpack.c.bf16 %v3568_v9, %v3567_v19 }
 0x2f8   : > { %4591 = vst [vmem:[%s5963_s13 + $0x20] sm:$0xff] %v4580_v29  }
 0x2f9   : > { %4804 = shalt.err (!%p4801_p10)
}
 0x2fa   : > { %s4854_s1 = smov 64   ;;  %s4855_s9 = smov 4  }
 0x2fb   : > { %4623 = dma.vmem_to_hbm [thread:$0]  (%p4958_p3), %s3603_s28, 640, %s3605_s26, %s3590_s27, %s4854_s1, %s4854_s1, %s4855_s9  }
 0x2fc PF: > { %s3619_s12 = sand.u32 1, %s4835_s18   ;;  %p6081_p12 = scmp.ge.s32.totalorder %s4847_s21, 2 }
 0x2fd   : > { %s3620_s13 = scalar_lea.sflag [#allocation5], %s3619_s12 }
 0x2fe   : > { %p4637_p13 = pnand %p6081_p12, %p4921_p6 }
 0x300   : > { %p4638_p0 = pneg %p4637_p13 }
 0x302   : > { %4830 = dma.done.wait (%p4638_p0), %s3620_s13, 640  }
 0x303   : > { %4832 = vsyncadd (%p4638_p0), %s3620_s13, 4294966656  ;;  %p19_p5 = scmp.ge.s32.totalorder %s4948_s14, 4   ;;  %s6082_s18 = smov %s4839_s19 }
 0x304   : > { %s6083_s19 = smov %s4843_s20  ;;  %s6084_s20 = smov %s4964_s23 }
 0x305   : > { %s6085_s21 = smov %s4948_s14  ;;  %21 = sbr.rel (!%p19_p5) target bundleno = 8 (0x8), region = 109 }
 0x30a   :  { %3626 = vsyncpa [#allocation4], 1 }
 0x30b   :  { %3628 = vsyncpa [#allocation4 + $0x1], 1 }
 0x30c   :  { %3629 = vsyncpa [#allocation7], 1 }
 0x30d   :  { %3630 = vsyncpa [#allocation5], 1 }
 0x30e   :  { %3632 = vsyncpa [#allocation5 + $0x1], 1 }

</bundles_post_ra>
